<compile_context>
chip_gen: v7x
topology: tpu7x:2x2x1
jax: 0.10.0
libtpu: 0.0.40
codegen_flags: <defaults>
</compile_context>

<pallas_src>
import functools

import jax
import jax.numpy as jnp
from jax.experimental import pallas as pl
from jax.experimental.pallas import tpu as pltpu

_LANE = 128          # lane-dense padding target for channel / feature dims
_POOL = 2            # nn.MaxPool2d(2), floor mode


# ---------------------------------------------------------------------------
# Fused forward kernel: one batch element per grid step, all layers in VMEM.
# ---------------------------------------------------------------------------
def _convnet_kernel(p1_ref, w1_ref, b1_ref, w2k_ref, b2_ref,
                    wfc1_ref, bfc1_ref, wfc2_ref, bfc2_ref, o_ref,
                    *, ph, pw, kh, kw, n_classes):
    f32 = jnp.float32

    # ---- conv1 + bias + ReLU + fused 2x2 max-pool -------------------------
    # p1_ref[k] holds the im2col patches of the conv1 outputs belonging to
    # pool phase k = di*2+dj, so the pool is an elementwise max of the four
    # phase matmuls (identical total FLOPs; pool is free VPU filler).
    mx = None
    for k in range(_POOL * _POOL):
        r = jnp.dot(p1_ref[k], w1_ref[...], preferred_element_type=f32)
        mx = r if mx is None else jnp.maximum(mx, r)
    pooled1 = jnp.maximum(mx + b1_ref[...], 0.0)            # (ph*pw, 128)

    # ---- conv2 + bias + ReLU + fused 2x2 max-pool -------------------------
    # In-kernel im2col: conv2 output (row rr, cols 0..3) needs pooled1 map
    # rows (rr+ki, cc+kj) -> contiguous static slices of the resident tile.
    c2h, c2w = ph - kh + 1, pw - kw + 1
    p2h, p2w = c2h // _POOL, c2w // _POOL
    rows = []
    for rr in range(p2h * _POOL):                           # only rows the pool uses
        acc = None
        for ki in range(kh):
            for kj in range(kw):
                s = (rr + ki) * pw + kj
                t = jnp.dot(pooled1[s:s + p2w * _POOL, :],
                            w2k_ref[ki * kw + kj],
                            preferred_element_type=f32)
                acc = t if acc is None else acc + t
        rows.append(acc)                                    # (p2w*2, 128)

    b2 = b2_ref[...]
    pooled2 = []                                            # order p = pi*p2w + pj
    for pi in range(p2h):
        m = jnp.maximum(rows[_POOL * pi], rows[_POOL * pi + 1])
        for pj in range(p2w):
            v = jnp.max(m[_POOL * pj:_POOL * pj + _POOL, :], axis=0, keepdims=True)
            pooled2.append(jnp.maximum(v + b2, 0.0))        # (1, 128)

    # ---- fc1 (+ReLU): NCHW flatten order is folded into wfc1[p] -----------
    h = None
    for p, v in enumerate(pooled2):
        t = jnp.dot(v, wfc1_ref[p], preferred_element_type=f32)
        h = t if h is None else h + t
    h = jnp.maximum(h + bfc1_ref[...], 0.0)                 # (1, 128)

    # ---- fc2 + softmax over the first n_classes lanes ---------------------
    logits = jnp.dot(h, wfc2_ref[...], preferred_element_type=f32) + bfc2_ref[...]
    lane = jax.lax.broadcasted_iota(jnp.int32, logits.shape, 1)
    logits = jnp.where(lane < n_classes, logits, jnp.float32(-1e30))
    mmax = jnp.max(logits, axis=-1, keepdims=True)
    e = jnp.exp(logits - mmax)
    denom = jnp.sum(e, axis=-1, keepdims=True)
    o_ref[...] = e * pl.reciprocal(denom, approx=True)      # padded lanes -> 0


# ---------------------------------------------------------------------------
# Wrapper-side (one-time / tiny) data prep
# ---------------------------------------------------------------------------
def _conv1_pool_patches(x_nhwc, kh, kw):
    """conv1 im2col patches split by 2x2 pool phase (raw input only: tiny)."""
    n, hgt, wid, cin = x_nhwc.shape
    oh, ow = hgt - kh + 1, wid - kw + 1
    ph, pw = oh // _POOL, ow // _POOL
    mats = []
    for di in range(_POOL):
        for dj in range(_POOL):
            cols = []
            for ki in range(kh):
                for kj in range(kw):
                    s = x_nhwc[:, di + ki::_POOL, dj + kj::_POOL, :][:, :ph, :pw, :]
                    cols.append(s)                           # (N, ph, pw, cin)
            c = jnp.stack(cols, axis=3)                      # (N, ph, pw, kh*kw, cin)
            mats.append(c.reshape(n, ph * pw, kh * kw * cin))
    return jnp.stack(mats, axis=1)                           # (N, 4, ph*pw, kh*kw*cin)


def _pad_last(a, size):
    return jnp.pad(a, [(0, 0)] * (a.ndim - 1) + [(0, size - a.shape[-1])])


def _prep_weights(params):
    """Lane-pad to 128 and pre-permute weights for the fused kernel."""
    f32 = jnp.float32
    c1w = params["conv1_w"].astype(f32)      # (C1, Cin, KH, KW)
    c2w = params["conv2_w"].astype(f32)      # (C2, C1, KH, KW)
    fc1w = params["fc1_w"].astype(f32)       # (hidden, C2*P2H*P2W)
    fc2w = params["fc2_w"].astype(f32)       # (classes, hidden)
    c1, cin, kh, kw = c1w.shape
    c2 = c2w.shape[0]
    hidden, flat = fc1w.shape
    classes = fc2w.shape[0]
    npos = flat // c2                        # pooled spatial positions (2*2 = 4)

    w1 = _pad_last(jnp.transpose(c1w, (2, 3, 1, 0)).reshape(kh * kw * cin, c1), _LANE)
    b1 = _pad_last(params["conv1_b"].astype(f32).reshape(1, c1), _LANE)

    w2k = jnp.transpose(c2w, (2, 3, 1, 0)).reshape(kh * kw, c1, c2)   # [k, cin, cout]
    w2k = _pad_last(w2k, _LANE)
    w2k = jnp.pad(w2k, ((0, 0), (0, _LANE - c1), (0, 0)))
    b2 = _pad_last(params["conv2_b"].astype(f32).reshape(1, c2), _LANE)

    # wfc1[p, c, h] = fc1_w[h, c*npos + p]  (NCHW flatten + transpose folded in)
    wfc1 = fc1w.T.reshape(c2, npos, hidden).transpose(1, 0, 2)
    wfc1 = _pad_last(wfc1, _LANE)
    wfc1 = jnp.pad(wfc1, ((0, 0), (0, _LANE - c2), (0, 0)))
    bfc1 = _pad_last(params["fc1_b"].astype(f32).reshape(1, hidden), _LANE)

    wfc2 = jnp.pad(fc2w.T, ((0, _LANE - hidden), (0, _LANE - classes)))
    bfc2 = _pad_last(params["fc2_b"].astype(f32).reshape(1, classes), _LANE)
    return (w1, b1, w2k, b2, wfc1, bfc1, wfc2, bfc2), (kh, kw, classes)


# ---------------------------------------------------------------------------
# Full forward (mirrors TtConvNet.forward), single pallas_call
# ---------------------------------------------------------------------------
@jax.jit
def convnet_mnist_forward(x_nchw, params):
    x = jnp.transpose(x_nchw, (0, 2, 3, 1)).astype(jnp.float32)   # NHWC
    n, hgt, wid, cin = x.shape
    (w1, b1, w2k, b2, wfc1, bfc1, wfc2, bfc2), (kh, kw, classes) = _prep_weights(params)
    oh, ow = hgt - kh + 1, wid - kw + 1
    ph, pw = oh // _POOL, ow // _POOL
    npos = wfc1.shape[0]

    p1 = _conv1_pool_patches(x, kh, kw)          # (N, 4, ph*pw, kh*kw*cin)

    kernel = functools.partial(_convnet_kernel, ph=ph, pw=pw, kh=kh, kw=kw,
                               n_classes=classes)
    out_padded = pl.pallas_call(
        kernel,
        out_shape=jax.ShapeDtypeStruct((n, 1, _LANE), jnp.float32),
        grid=(n,),
        in_specs=[
            pl.BlockSpec((None, _POOL * _POOL, ph * pw, kh * kw * cin),
                         lambda b: (b, 0, 0, 0)),
            pl.BlockSpec((kh * kw * cin, _LANE), lambda b: (0, 0)),
            pl.BlockSpec((1, _LANE), lambda b: (0, 0)),
            pl.BlockSpec((kh * kw, _LANE, _LANE), lambda b: (0, 0, 0)),
            pl.BlockSpec((1, _LANE), lambda b: (0, 0)),
            pl.BlockSpec((npos, _LANE, _LANE), lambda b: (0, 0, 0)),
            pl.BlockSpec((1, _LANE), lambda b: (0, 0)),
            pl.BlockSpec((_LANE, _LANE), lambda b: (0, 0)),
            pl.BlockSpec((1, _LANE), lambda b: (0, 0)),
        ],
        out_specs=pl.BlockSpec((None, 1, _LANE), lambda b: (b, 0, 0)),
        compiler_params=pltpu.CompilerParams(dimension_semantics=("parallel",)),
    )(p1, w1, b1, w2k, b2, wfc1, bfc1, wfc2, bfc2)

    # TtConvNet returns an (N, 1, 1, num_classes) tensor
    return out_padded[:, :, :classes].reshape(n, 1, 1, classes)


# ---------------------------------------------------------------------------
# Plain-JAX reference (for correctness check) + synthetic params + demo
# ---------------------------------------------------------------------------
def _reference_forward(x_nchw, params):
    x = jnp.transpose(x_nchw, (0, 2, 3, 1)).astype(jnp.float32)

    def conv(x, w, b):
        y = jax.lax.conv_general_dilated(
            x, jnp.transpose(w, (2, 3, 1, 0)).astype(jnp.float32),
            window_strides=(1, 1), padding="VALID",
            dimension_numbers=("NHWC", "HWIO", "NHWC"))
        return y + b

    def pool2(x):
        n, h, w, c = x.shape
        oh, ow = h // 2, w // 2
        return x[:, :oh * 2, :ow * 2, :].reshape(n, oh, 2, ow, 2, c).max(axis=(2, 4))

    out = pool2(jax.nn.relu(conv(x, params["conv1_w"], params["conv1_b"])))
    out = pool2(jax.nn.relu(conv(out, params["conv2_w"], params["conv2_b"])))
    n = out.shape[0]
    out = jnp.transpose(out, (0, 3, 1, 2)).reshape(n, -1)     # NCHW flatten
    out = jax.nn.relu(out @ params["fc1_w"].T + params["fc1_b"])
    out = out @ params["fc2_w"].T + params["fc2_b"]
    out = jax.nn.softmax(out, axis=-1)
    return out.reshape(n, 1, 1, -1)


def init_params(key, cin=1, c1=8, c2=16, flat=64, hidden=32, classes=10):
    ks = jax.random.split(key, 8)
    s = 0.1
    return {
        "conv1_w": s * jax.random.normal(ks[0], (c1, cin, 3, 3), jnp.float32),
        "conv1_b": s * jax.random.normal(ks[1], (c1,), jnp.float32),
        "conv2_w": s * jax.random.normal(ks[2], (c2, c1, 3, 3), jnp.float32),
        "conv2_b": s * jax.random.normal(ks[3], (c2,), jnp.float32),
        "fc1_w": s * jax.random.normal(ks[4], (hidden, flat), jnp.float32),
        "fc1_b": s * jax.random.normal(ks[5], (hidden,), jnp.float32),
        "fc2_w": s * jax.random.normal(ks[6], (classes, hidden), jnp.float32),
        "fc2_b": s * jax.random.normal(ks[7], (classes,), jnp.float32),
    }


if __name__ == "__main__":
    key = jax.random.PRNGKey(0)
    kx, kp = jax.random.split(key)

    # MNIST-like toy input: batch=2, 1 channel, 16x16 spatial (NCHW)
    # shape trace: (2,1,16,16) -> conv1 (2,8,14,14) -> pool (2,8,7,7)
    #              -> conv2 (2,16,5,5) -> pool (2,16,2,2) -> flat 64 -> 32 -> 10
    x = jax.random.normal(kx, (2, 1, 16, 16), jnp.float32)
    params = init_params(kp)

    out = jax.block_until_ready(convnet_mnist_forward(x, params))
    assert out.shape == (2, 1, 1, 10), out.shape

    ref = jax.block_until_ready(_reference_forward(x, params))
    err = float(jnp.max(jnp.abs(out - ref)))
    assert err < 5e-3, f"mismatch vs plain-JAX reference: {err}"
    print("KERNEL_OK")
</pallas_src>

<mosaic_0001>
module attributes {stable_mosaic.version = 11 : i64} {
  func.func @_convnet_kernel(%arg0: i32, %arg1: memref<1x4x49x9xf32, #tpu.memory_space<vmem>>, %arg2: memref<9x128xf32, #tpu.memory_space<vmem>>, %arg3: memref<1x128xf32, #tpu.memory_space<vmem>>, %arg4: memref<9x128x128xf32, #tpu.memory_space<vmem>>, %arg5: memref<1x128xf32, #tpu.memory_space<vmem>>, %arg6: memref<4x128x128xf32, #tpu.memory_space<vmem>>, %arg7: memref<1x128xf32, #tpu.memory_space<vmem>>, %arg8: memref<128x128xf32, #tpu.memory_space<vmem>>, %arg9: memref<1x128xf32, #tpu.memory_space<vmem>>, %arg10: memref<1x1x128xf32, #tpu.memory_space<vmem>>) attributes {dimension_semantics = [#tpu.dimension_semantics<parallel>], iteration_bounds = array<i64: 2>, scalar_prefetch = 0 : i64, scratch_operands = 0 : i64, tpu.core_type = #tpu.core_type<tc>, window_params = [{transform_indices = @transform_0, window_bounds = array<i64: 1, 4, 49, 9>}, {pipeline_mode = #tpu.pipeline_mode<synchronous>, transform_indices = @transform_1, window_bounds = array<i64: 9, 128>}, {pipeline_mode = #tpu.pipeline_mode<synchronous>, transform_indices = @transform_2, window_bounds = array<i64: 1, 128>}, {pipeline_mode = #tpu.pipeline_mode<synchronous>, transform_indices = @transform_3, window_bounds = array<i64: 9, 128, 128>}, {pipeline_mode = #tpu.pipeline_mode<synchronous>, transform_indices = @transform_4, window_bounds = array<i64: 1, 128>}, {pipeline_mode = #tpu.pipeline_mode<synchronous>, transform_indices = @transform_5, window_bounds = array<i64: 4, 128, 128>}, {pipeline_mode = #tpu.pipeline_mode<synchronous>, transform_indices = @transform_6, window_bounds = array<i64: 1, 128>}, {pipeline_mode = #tpu.pipeline_mode<synchronous>, transform_indices = @transform_7, window_bounds = array<i64: 128, 128>}, {pipeline_mode = #tpu.pipeline_mode<synchronous>, transform_indices = @transform_8, window_bounds = array<i64: 1, 128>}, {transform_indices = @transform_9, window_bounds = array<i64: 1, 1, 128>}]} {
    %c0 = arith.constant 0 : index
    %c0_0 = arith.constant 0 : index
    %c0_1 = arith.constant 0 : index
    %c0_2 = arith.constant 0 : index
    %0 = vector.load %arg1[%c0, %c0_0, %c0_1, %c0_2] : memref<1x4x49x9xf32, #tpu.memory_space<vmem>>, vector<1x1x49x9xf32>
    %1 = vector.shape_cast %0 : vector<1x1x49x9xf32> to vector<49x9xf32>
    %c0_3 = arith.constant 0 : index
    %c0_4 = arith.constant 0 : index
    %2 = vector.load %arg2[%c0_3, %c0_4] : memref<9x128xf32, #tpu.memory_space<vmem>>, vector<9x128xf32>
    %cst = arith.constant dense<0.000000e+00> : vector<49x128xf32>
    %3 = tpu.matmul %1, %2, %cst {dimension_numbers = #tpu.dot_dimension_numbers<[1], [0], [0], [1], [0, 0, 1, 1], [], []>} : vector<49x9xf32>, vector<9x128xf32>, vector<49x128xf32> -> vector<49x128xf32>
    %c0_5 = arith.constant 0 : index
    %c1 = arith.constant 1 : index
    %c0_6 = arith.constant 0 : index
    %c0_7 = arith.constant 0 : index
    %4 = vector.load %arg1[%c0_5, %c1, %c0_6, %c0_7] : memref<1x4x49x9xf32, #tpu.memory_space<vmem>>, vector<1x1x49x9xf32>
    %5 = vector.shape_cast %4 : vector<1x1x49x9xf32> to vector<49x9xf32>
    %c0_8 = arith.constant 0 : index
    %c0_9 = arith.constant 0 : index
    %6 = vector.load %arg2[%c0_8, %c0_9] : memref<9x128xf32, #tpu.memory_space<vmem>>, vector<9x128xf32>
    %cst_10 = arith.constant dense<0.000000e+00> : vector<49x128xf32>
    %7 = tpu.matmul %5, %6, %cst_10 {dimension_numbers = #tpu.dot_dimension_numbers<[1], [0], [0], [1], [0, 0, 1, 1], [], []>} : vector<49x9xf32>, vector<9x128xf32>, vector<49x128xf32> -> vector<49x128xf32>
    %8 = arith.maximumf %3, %7 : vector<49x128xf32>
    %c0_11 = arith.constant 0 : index
    %c2 = arith.constant 2 : index
    %c0_12 = arith.constant 0 : index
    %c0_13 = arith.constant 0 : index
    %9 = vector.load %arg1[%c0_11, %c2, %c0_12, %c0_13] : memref<1x4x49x9xf32, #tpu.memory_space<vmem>>, vector<1x1x49x9xf32>
    %10 = vector.shape_cast %9 : vector<1x1x49x9xf32> to vector<49x9xf32>
    %c0_14 = arith.constant 0 : index
    %c0_15 = arith.constant 0 : index
    %11 = vector.load %arg2[%c0_14, %c0_15] : memref<9x128xf32, #tpu.memory_space<vmem>>, vector<9x128xf32>
    %cst_16 = arith.constant dense<0.000000e+00> : vector<49x128xf32>
    %12 = tpu.matmul %10, %11, %cst_16 {dimension_numbers = #tpu.dot_dimension_numbers<[1], [0], [0], [1], [0, 0, 1, 1], [], []>} : vector<49x9xf32>, vector<9x128xf32>, vector<49x128xf32> -> vector<49x128xf32>
    %13 = arith.maximumf %8, %12 : vector<49x128xf32>
    %c0_17 = arith.constant 0 : index
    %c3 = arith.constant 3 : index
    %c0_18 = arith.constant 0 : index
    %c0_19 = arith.constant 0 : index
    %14 = vector.load %arg1[%c0_17, %c3, %c0_18, %c0_19] : memref<1x4x49x9xf32, #tpu.memory_space<vmem>>, vector<1x1x49x9xf32>
    %15 = vector.shape_cast %14 : vector<1x1x49x9xf32> to vector<49x9xf32>
    %c0_20 = arith.constant 0 : index
    %c0_21 = arith.constant 0 : index
    %16 = vector.load %arg2[%c0_20, %c0_21] : memref<9x128xf32, #tpu.memory_space<vmem>>, vector<9x128xf32>
    %cst_22 = arith.constant dense<0.000000e+00> : vector<49x128xf32>
    %17 = tpu.matmul %15, %16, %cst_22 {dimension_numbers = #tpu.dot_dimension_numbers<[1], [0], [0], [1], [0, 0, 1, 1], [], []>} : vector<49x9xf32>, vector<9x128xf32>, vector<49x128xf32> -> vector<49x128xf32>
    %18 = arith.maximumf %13, %17 : vector<49x128xf32>
    %c0_23 = arith.constant 0 : index
    %c0_24 = arith.constant 0 : index
    %19 = vector.load %arg3[%c0_23, %c0_24] : memref<1x128xf32, #tpu.memory_space<vmem>>, vector<1x128xf32>
    %20 = vector.broadcast %19 : vector<1x128xf32> to vector<49x128xf32>
    %21 = arith.addf %18, %20 : vector<49x128xf32>
    %cst_25 = arith.constant 0.000000e+00 : f32
    %22 = vector.broadcast %cst_25 : f32 to vector<49x128xf32>
    %23 = arith.maximumf %21, %22 : vector<49x128xf32>
    %24 = vector.extract_strided_slice %23 {offsets = [0, 0], sizes = [4, 128], strides = [1, 1]} : vector<49x128xf32> to vector<4x128xf32>
    %c0_26 = arith.constant 0 : index
    %c0_27 = arith.constant 0 : index
    %c0_28 = arith.constant 0 : index
    %25 = vector.load %arg4[%c0_26, %c0_27, %c0_28] : memref<9x128x128xf32, #tpu.memory_space<vmem>>, vector<1x128x128xf32>
    %26 = vector.shape_cast %25 : vector<1x128x128xf32> to vector<128x128xf32>
    %cst_29 = arith.constant dense<0.000000e+00> : vector<4x128xf32>
    %27 = tpu.matmul %24, %26, %cst_29 {dimension_numbers = #tpu.dot_dimension_numbers<[1], [0], [0], [1], [0, 0, 1, 1], [], []>} : vector<4x128xf32>, vector<128x128xf32>, vector<4x128xf32> -> vector<4x128xf32>
    %28 = vector.extract_strided_slice %23 {offsets = [1, 0], sizes = [4, 128], strides = [1, 1]} : vector<49x128xf32> to vector<4x128xf32>
    %c1_30 = arith.constant 1 : index
    %c0_31 = arith.constant 0 : index
    %c0_32 = arith.constant 0 : index
    %29 = vector.load %arg4[%c1_30, %c0_31, %c0_32] : memref<9x128x128xf32, #tpu.memory_space<vmem>>, vector<1x128x128xf32>
    %30 = vector.shape_cast %29 : vector<1x128x128xf32> to vector<128x128xf32>
    %cst_33 = arith.constant dense<0.000000e+00> : vector<4x128xf32>
    %31 = tpu.matmul %28, %30, %cst_33 {dimension_numbers = #tpu.dot_dimension_numbers<[1], [0], [0], [1], [0, 0, 1, 1], [], []>} : vector<4x128xf32>, vector<128x128xf32>, vector<4x128xf32> -> vector<4x128xf32>
    %32 = arith.addf %27, %31 : vector<4x128xf32>
    %33 = vector.extract_strided_slice %23 {offsets = [2, 0], sizes = [4, 128], strides = [1, 1]} : vector<49x128xf32> to vector<4x128xf32>
    %c2_34 = arith.constant 2 : index
    %c0_35 = arith.constant 0 : index
    %c0_36 = arith.constant 0 : index
    %34 = vector.load %arg4[%c2_34, %c0_35, %c0_36] : memref<9x128x128xf32, #tpu.memory_space<vmem>>, vector<1x128x128xf32>
    %35 = vector.shape_cast %34 : vector<1x128x128xf32> to vector<128x128xf32>
    %cst_37 = arith.constant dense<0.000000e+00> : vector<4x128xf32>
    %36 = tpu.matmul %33, %35, %cst_37 {dimension_numbers = #tpu.dot_dimension_numbers<[1], [0], [0], [1], [0, 0, 1, 1], [], []>} : vector<4x128xf32>, vector<128x128xf32>, vector<4x128xf32> -> vector<4x128xf32>
    %37 = arith.addf %32, %36 : vector<4x128xf32>
    %38 = vector.extract_strided_slice %23 {offsets = [7, 0], sizes = [4, 128], strides = [1, 1]} : vector<49x128xf32> to vector<4x128xf32>
    %c3_38 = arith.constant 3 : index
    %c0_39 = arith.constant 0 : index
    %c0_40 = arith.constant 0 : index
    %39 = vector.load %arg4[%c3_38, %c0_39, %c0_40] : memref<9x128x128xf32, #tpu.memory_space<vmem>>, vector<1x128x128xf32>
    %40 = vector.shape_cast %39 : vector<1x128x128xf32> to vector<128x128xf32>
    %cst_41 = arith.constant dense<0.000000e+00> : vector<4x128xf32>
    %41 = tpu.matmul %38, %40, %cst_41 {dimension_numbers = #tpu.dot_dimension_numbers<[1], [0], [0], [1], [0, 0, 1, 1], [], []>} : vector<4x128xf32>, vector<128x128xf32>, vector<4x128xf32> -> vector<4x128xf32>
    %42 = arith.addf %37, %41 : vector<4x128xf32>
    %43 = vector.extract_strided_slice %23 {offsets = [8, 0], sizes = [4, 128], strides = [1, 1]} : vector<49x128xf32> to vector<4x128xf32>
    %c4 = arith.constant 4 : index
    %c0_42 = arith.constant 0 : index
    %c0_43 = arith.constant 0 : index
    %44 = vector.load %arg4[%c4, %c0_42, %c0_43] : memref<9x128x128xf32, #tpu.memory_space<vmem>>, vector<1x128x128xf32>
    %45 = vector.shape_cast %44 : vector<1x128x128xf32> to vector<128x128xf32>
    %cst_44 = arith.constant dense<0.000000e+00> : vector<4x128xf32>
    %46 = tpu.matmul %43, %45, %cst_44 {dimension_numbers = #tpu.dot_dimension_numbers<[1], [0], [0], [1], [0, 0, 1, 1], [], []>} : vector<4x128xf32>, vector<128x128xf32>, vector<4x128xf32> -> vector<4x128xf32>
    %47 = arith.addf %42, %46 : vector<4x128xf32>
    %48 = vector.extract_strided_slice %23 {offsets = [9, 0], sizes = [4, 128], strides = [1, 1]} : vector<49x128xf32> to vector<4x128xf32>
    %c5 = arith.constant 5 : index
    %c0_45 = arith.constant 0 : index
    %c0_46 = arith.constant 0 : index
    %49 = vector.load %arg4[%c5, %c0_45, %c0_46] : memref<9x128x128xf32, #tpu.memory_space<vmem>>, vector<1x128x128xf32>
    %50 = vector.shape_cast %49 : vector<1x128x128xf32> to vector<128x128xf32>
    %cst_47 = arith.constant dense<0.000000e+00> : vector<4x128xf32>
    %51 = tpu.matmul %48, %50, %cst_47 {dimension_numbers = #tpu.dot_dimension_numbers<[1], [0], [0], [1], [0, 0, 1, 1], [], []>} : vector<4x128xf32>, vector<128x128xf32>, vector<4x128xf32> -> vector<4x128xf32>
    %52 = arith.addf %47, %51 : vector<4x128xf32>
    %53 = vector.extract_strided_slice %23 {offsets = [14, 0], sizes = [4, 128], strides = [1, 1]} : vector<49x128xf32> to vector<4x128xf32>
    %c6 = arith.constant 6 : index
    %c0_48 = arith.constant 0 : index
    %c0_49 = arith.constant 0 : index
    %54 = vector.load %arg4[%c6, %c0_48, %c0_49] : memref<9x128x128xf32, #tpu.memory_space<vmem>>, vector<1x128x128xf32>
    %55 = vector.shape_cast %54 : vector<1x128x128xf32> to vector<128x128xf32>
    %cst_50 = arith.constant dense<0.000000e+00> : vector<4x128xf32>
    %56 = tpu.matmul %53, %55, %cst_50 {dimension_numbers = #tpu.dot_dimension_numbers<[1], [0], [0], [1], [0, 0, 1, 1], [], []>} : vector<4x128xf32>, vector<128x128xf32>, vector<4x128xf32> -> vector<4x128xf32>
    %57 = arith.addf %52, %56 : vector<4x128xf32>
    %58 = vector.extract_strided_slice %23 {offsets = [15, 0], sizes = [4, 128], strides = [1, 1]} : vector<49x128xf32> to vector<4x128xf32>
    %c7 = arith.constant 7 : index
    %c0_51 = arith.constant 0 : index
    %c0_52 = arith.constant 0 : index
    %59 = vector.load %arg4[%c7, %c0_51, %c0_52] : memref<9x128x128xf32, #tpu.memory_space<vmem>>, vector<1x128x128xf32>
    %60 = vector.shape_cast %59 : vector<1x128x128xf32> to vector<128x128xf32>
    %cst_53 = arith.constant dense<0.000000e+00> : vector<4x128xf32>
    %61 = tpu.matmul %58, %60, %cst_53 {dimension_numbers = #tpu.dot_dimension_numbers<[1], [0], [0], [1], [0, 0, 1, 1], [], []>} : vector<4x128xf32>, vector<128x128xf32>, vector<4x128xf32> -> vector<4x128xf32>
    %62 = arith.addf %57, %61 : vector<4x128xf32>
    %63 = vector.extract_strided_slice %23 {offsets = [16, 0], sizes = [4, 128], strides = [1, 1]} : vector<49x128xf32> to vector<4x128xf32>
    %c8 = arith.constant 8 : index
    %c0_54 = arith.constant 0 : index
    %c0_55 = arith.constant 0 : index
    %64 = vector.load %arg4[%c8, %c0_54, %c0_55] : memref<9x128x128xf32, #tpu.memory_space<vmem>>, vector<1x128x128xf32>
    %65 = vector.shape_cast %64 : vector<1x128x128xf32> to vector<128x128xf32>
    %cst_56 = arith.constant dense<0.000000e+00> : vector<4x128xf32>
    %66 = tpu.matmul %63, %65, %cst_56 {dimension_numbers = #tpu.dot_dimension_numbers<[1], [0], [0], [1], [0, 0, 1, 1], [], []>} : vector<4x128xf32>, vector<128x128xf32>, vector<4x128xf32> -> vector<4x128xf32>
    %67 = arith.addf %62, %66 : vector<4x128xf32>
    %68 = vector.extract_strided_slice %23 {offsets = [7, 0], sizes = [4, 128], strides = [1, 1]} : vector<49x128xf32> to vector<4x128xf32>
    %c0_57 = arith.constant 0 : index
    %c0_58 = arith.constant 0 : index
    %c0_59 = arith.constant 0 : index
    %69 = vector.load %arg4[%c0_57, %c0_58, %c0_59] : memref<9x128x128xf32, #tpu.memory_space<vmem>>, vector<1x128x128xf32>
    %70 = vector.shape_cast %69 : vector<1x128x128xf32> to vector<128x128xf32>
    %cst_60 = arith.constant dense<0.000000e+00> : vector<4x128xf32>
    %71 = tpu.matmul %68, %70, %cst_60 {dimension_numbers = #tpu.dot_dimension_numbers<[1], [0], [0], [1], [0, 0, 1, 1], [], []>} : vector<4x128xf32>, vector<128x128xf32>, vector<4x128xf32> -> vector<4x128xf32>
    %72 = vector.extract_strided_slice %23 {offsets = [8, 0], sizes = [4, 128], strides = [1, 1]} : vector<49x128xf32> to vector<4x128xf32>
    %c1_61 = arith.constant 1 : index
    %c0_62 = arith.constant 0 : index
    %c0_63 = arith.constant 0 : index
    %73 = vector.load %arg4[%c1_61, %c0_62, %c0_63] : memref<9x128x128xf32, #tpu.memory_space<vmem>>, vector<1x128x128xf32>
    %74 = vector.shape_cast %73 : vector<1x128x128xf32> to vector<128x128xf32>
    %cst_64 = arith.constant dense<0.000000e+00> : vector<4x128xf32>
    %75 = tpu.matmul %72, %74, %cst_64 {dimension_numbers = #tpu.dot_dimension_numbers<[1], [0], [0], [1], [0, 0, 1, 1], [], []>} : vector<4x128xf32>, vector<128x128xf32>, vector<4x128xf32> -> vector<4x128xf32>
    %76 = arith.addf %71, %75 : vector<4x128xf32>
    %77 = vector.extract_strided_slice %23 {offsets = [9, 0], sizes = [4, 128], strides = [1, 1]} : vector<49x128xf32> to vector<4x128xf32>
    %c2_65 = arith.constant 2 : index
    %c0_66 = arith.constant 0 : index
    %c0_67 = arith.constant 0 : index
    %78 = vector.load %arg4[%c2_65, %c0_66, %c0_67] : memref<9x128x128xf32, #tpu.memory_space<vmem>>, vector<1x128x128xf32>
    %79 = vector.shape_cast %78 : vector<1x128x128xf32> to vector<128x128xf32>
    %cst_68 = arith.constant dense<0.000000e+00> : vector<4x128xf32>
    %80 = tpu.matmul %77, %79, %cst_68 {dimension_numbers = #tpu.dot_dimension_numbers<[1], [0], [0], [1], [0, 0, 1, 1], [], []>} : vector<4x128xf32>, vector<128x128xf32>, vector<4x128xf32> -> vector<4x128xf32>
    %81 = arith.addf %76, %80 : vector<4x128xf32>
    %82 = vector.extract_strided_slice %23 {offsets = [14, 0], sizes = [4, 128], strides = [1, 1]} : vector<49x128xf32> to vector<4x128xf32>
    %c3_69 = arith.constant 3 : index
    %c0_70 = arith.constant 0 : index
    %c0_71 = arith.constant 0 : index
    %83 = vector.load %arg4[%c3_69, %c0_70, %c0_71] : memref<9x128x128xf32, #tpu.memory_space<vmem>>, vector<1x128x128xf32>
    %84 = vector.shape_cast %83 : vector<1x128x128xf32> to vector<128x128xf32>
    %cst_72 = arith.constant dense<0.000000e+00> : vector<4x128xf32>
    %85 = tpu.matmul %82, %84, %cst_72 {dimension_numbers = #tpu.dot_dimension_numbers<[1], [0], [0], [1], [0, 0, 1, 1], [], []>} : vector<4x128xf32>, vector<128x128xf32>, vector<4x128xf32> -> vector<4x128xf32>
    %86 = arith.addf %81, %85 : vector<4x128xf32>
    %87 = vector.extract_strided_slice %23 {offsets = [15, 0], sizes = [4, 128], strides = [1, 1]} : vector<49x128xf32> to vector<4x128xf32>
    %c4_73 = arith.constant 4 : index
    %c0_74 = arith.constant 0 : index
    %c0_75 = arith.constant 0 : index
    %88 = vector.load %arg4[%c4_73, %c0_74, %c0_75] : memref<9x128x128xf32, #tpu.memory_space<vmem>>, vector<1x128x128xf32>
    %89 = vector.shape_cast %88 : vector<1x128x128xf32> to vector<128x128xf32>
    %cst_76 = arith.constant dense<0.000000e+00> : vector<4x128xf32>
    %90 = tpu.matmul %87, %89, %cst_76 {dimension_numbers = #tpu.dot_dimension_numbers<[1], [0], [0], [1], [0, 0, 1, 1], [], []>} : vector<4x128xf32>, vector<128x128xf32>, vector<4x128xf32> -> vector<4x128xf32>
    %91 = arith.addf %86, %90 : vector<4x128xf32>
    %92 = vector.extract_strided_slice %23 {offsets = [16, 0], sizes = [4, 128], strides = [1, 1]} : vector<49x128xf32> to vector<4x128xf32>
    %c5_77 = arith.constant 5 : index
    %c0_78 = arith.constant 0 : index
    %c0_79 = arith.constant 0 : index
    %93 = vector.load %arg4[%c5_77, %c0_78, %c0_79] : memref<9x128x128xf32, #tpu.memory_space<vmem>>, vector<1x128x128xf32>
    %94 = vector.shape_cast %93 : vector<1x128x128xf32> to vector<128x128xf32>
    %cst_80 = arith.constant dense<0.000000e+00> : vector<4x128xf32>
    %95 = tpu.matmul %92, %94, %cst_80 {dimension_numbers = #tpu.dot_dimension_numbers<[1], [0], [0], [1], [0, 0, 1, 1], [], []>} : vector<4x128xf32>, vector<128x128xf32>, vector<4x128xf32> -> vector<4x128xf32>
    %96 = arith.addf %91, %95 : vector<4x128xf32>
    %97 = vector.extract_strided_slice %23 {offsets = [21, 0], sizes = [4, 128], strides = [1, 1]} : vector<49x128xf32> to vector<4x128xf32>
    %c6_81 = arith.constant 6 : index
    %c0_82 = arith.constant 0 : index
    %c0_83 = arith.constant 0 : index
    %98 = vector.load %arg4[%c6_81, %c0_82, %c0_83] : memref<9x128x128xf32, #tpu.memory_space<vmem>>, vector<1x128x128xf32>
    %99 = vector.shape_cast %98 : vector<1x128x128xf32> to vector<128x128xf32>
    %cst_84 = arith.constant dense<0.000000e+00> : vector<4x128xf32>
    %100 = tpu.matmul %97, %99, %cst_84 {dimension_numbers = #tpu.dot_dimension_numbers<[1], [0], [0], [1], [0, 0, 1, 1], [], []>} : vector<4x128xf32>, vector<128x128xf32>, vector<4x128xf32> -> vector<4x128xf32>
    %101 = arith.addf %96, %100 : vector<4x128xf32>
    %102 = vector.extract_strided_slice %23 {offsets = [22, 0], sizes = [4, 128], strides = [1, 1]} : vector<49x128xf32> to vector<4x128xf32>
    %c7_85 = arith.constant 7 : index
    %c0_86 = arith.constant 0 : index
    %c0_87 = arith.constant 0 : index
    %103 = vector.load %arg4[%c7_85, %c0_86, %c0_87] : memref<9x128x128xf32, #tpu.memory_space<vmem>>, vector<1x128x128xf32>
    %104 = vector.shape_cast %103 : vector<1x128x128xf32> to vector<128x128xf32>
    %cst_88 = arith.constant dense<0.000000e+00> : vector<4x128xf32>
    %105 = tpu.matmul %102, %104, %cst_88 {dimension_numbers = #tpu.dot_dimension_numbers<[1], [0], [0], [1], [0, 0, 1, 1], [], []>} : vector<4x128xf32>, vector<128x128xf32>, vector<4x128xf32> -> vector<4x128xf32>
    %106 = arith.addf %101, %105 : vector<4x128xf32>
    %107 = vector.extract_strided_slice %23 {offsets = [23, 0], sizes = [4, 128], strides = [1, 1]} : vector<49x128xf32> to vector<4x128xf32>
    %c8_89 = arith.constant 8 : index
    %c0_90 = arith.constant 0 : index
    %c0_91 = arith.constant 0 : index
    %108 = vector.load %arg4[%c8_89, %c0_90, %c0_91] : memref<9x128x128xf32, #tpu.memory_space<vmem>>, vector<1x128x128xf32>
    %109 = vector.shape_cast %108 : vector<1x128x128xf32> to vector<128x128xf32>
    %cst_92 = arith.constant dense<0.000000e+00> : vector<4x128xf32>
    %110 = tpu.matmul %107, %109, %cst_92 {dimension_numbers = #tpu.dot_dimension_numbers<[1], [0], [0], [1], [0, 0, 1, 1], [], []>} : vector<4x128xf32>, vector<128x128xf32>, vector<4x128xf32> -> vector<4x128xf32>
    %111 = arith.addf %106, %110 : vector<4x128xf32>
    %112 = vector.extract_strided_slice %23 {offsets = [14, 0], sizes = [4, 128], strides = [1, 1]} : vector<49x128xf32> to vector<4x128xf32>
    %c0_93 = arith.constant 0 : index
    %c0_94 = arith.constant 0 : index
    %c0_95 = arith.constant 0 : index
    %113 = vector.load %arg4[%c0_93, %c0_94, %c0_95] : memref<9x128x128xf32, #tpu.memory_space<vmem>>, vector<1x128x128xf32>
    %114 = vector.shape_cast %113 : vector<1x128x128xf32> to vector<128x128xf32>
    %cst_96 = arith.constant dense<0.000000e+00> : vector<4x128xf32>
    %115 = tpu.matmul %112, %114, %cst_96 {dimension_numbers = #tpu.dot_dimension_numbers<[1], [0], [0], [1], [0, 0, 1, 1], [], []>} : vector<4x128xf32>, vector<128x128xf32>, vector<4x128xf32> -> vector<4x128xf32>
    %116 = vector.extract_strided_slice %23 {offsets = [15, 0], sizes = [4, 128], strides = [1, 1]} : vector<49x128xf32> to vector<4x128xf32>
    %c1_97 = arith.constant 1 : index
    %c0_98 = arith.constant 0 : index
    %c0_99 = arith.constant 0 : index
    %117 = vector.load %arg4[%c1_97, %c0_98, %c0_99] : memref<9x128x128xf32, #tpu.memory_space<vmem>>, vector<1x128x128xf32>
    %118 = vector.shape_cast %117 : vector<1x128x128xf32> to vector<128x128xf32>
    %cst_100 = arith.constant dense<0.000000e+00> : vector<4x128xf32>
    %119 = tpu.matmul %116, %118, %cst_100 {dimension_numbers = #tpu.dot_dimension_numbers<[1], [0], [0], [1], [0, 0, 1, 1], [], []>} : vector<4x128xf32>, vector<128x128xf32>, vector<4x128xf32> -> vector<4x128xf32>
    %120 = arith.addf %115, %119 : vector<4x128xf32>
    %121 = vector.extract_strided_slice %23 {offsets = [16, 0], sizes = [4, 128], strides = [1, 1]} : vector<49x128xf32> to vector<4x128xf32>
    %c2_101 = arith.constant 2 : index
    %c0_102 = arith.constant 0 : index
    %c0_103 = arith.constant 0 : index
    %122 = vector.load %arg4[%c2_101, %c0_102, %c0_103] : memref<9x128x128xf32, #tpu.memory_space<vmem>>, vector<1x128x128xf32>
    %123 = vector.shape_cast %122 : vector<1x128x128xf32> to vector<128x128xf32>
    %cst_104 = arith.constant dense<0.000000e+00> : vector<4x128xf32>
    %124 = tpu.matmul %121, %123, %cst_104 {dimension_numbers = #tpu.dot_dimension_numbers<[1], [0], [0], [1], [0, 0, 1, 1], [], []>} : vector<4x128xf32>, vector<128x128xf32>, vector<4x128xf32> -> vector<4x128xf32>
    %125 = arith.addf %120, %124 : vector<4x128xf32>
    %126 = vector.extract_strided_slice %23 {offsets = [21, 0], sizes = [4, 128], strides = [1, 1]} : vector<49x128xf32> to vector<4x128xf32>
    %c3_105 = arith.constant 3 : index
    %c0_106 = arith.constant 0 : index
    %c0_107 = arith.constant 0 : index
    %127 = vector.load %arg4[%c3_105, %c0_106, %c0_107] : memref<9x128x128xf32, #tpu.memory_space<vmem>>, vector<1x128x128xf32>
    %128 = vector.shape_cast %127 : vector<1x128x128xf32> to vector<128x128xf32>
    %cst_108 = arith.constant dense<0.000000e+00> : vector<4x128xf32>
    %129 = tpu.matmul %126, %128, %cst_108 {dimension_numbers = #tpu.dot_dimension_numbers<[1], [0], [0], [1], [0, 0, 1, 1], [], []>} : vector<4x128xf32>, vector<128x128xf32>, vector<4x128xf32> -> vector<4x128xf32>
    %130 = arith.addf %125, %129 : vector<4x128xf32>
    %131 = vector.extract_strided_slice %23 {offsets = [22, 0], sizes = [4, 128], strides = [1, 1]} : vector<49x128xf32> to vector<4x128xf32>
    %c4_109 = arith.constant 4 : index
    %c0_110 = arith.constant 0 : index
    %c0_111 = arith.constant 0 : index
    %132 = vector.load %arg4[%c4_109, %c0_110, %c0_111] : memref<9x128x128xf32, #tpu.memory_space<vmem>>, vector<1x128x128xf32>
    %133 = vector.shape_cast %132 : vector<1x128x128xf32> to vector<128x128xf32>
    %cst_112 = arith.constant dense<0.000000e+00> : vector<4x128xf32>
    %134 = tpu.matmul %131, %133, %cst_112 {dimension_numbers = #tpu.dot_dimension_numbers<[1], [0], [0], [1], [0, 0, 1, 1], [], []>} : vector<4x128xf32>, vector<128x128xf32>, vector<4x128xf32> -> vector<4x128xf32>
    %135 = arith.addf %130, %134 : vector<4x128xf32>
    %136 = vector.extract_strided_slice %23 {offsets = [23, 0], sizes = [4, 128], strides = [1, 1]} : vector<49x128xf32> to vector<4x128xf32>
    %c5_113 = arith.constant 5 : index
    %c0_114 = arith.constant 0 : index
    %c0_115 = arith.constant 0 : index
    %137 = vector.load %arg4[%c5_113, %c0_114, %c0_115] : memref<9x128x128xf32, #tpu.memory_space<vmem>>, vector<1x128x128xf32>
    %138 = vector.shape_cast %137 : vector<1x128x128xf32> to vector<128x128xf32>
    %cst_116 = arith.constant dense<0.000000e+00> : vector<4x128xf32>
    %139 = tpu.matmul %136, %138, %cst_116 {dimension_numbers = #tpu.dot_dimension_numbers<[1], [0], [0], [1], [0, 0, 1, 1], [], []>} : vector<4x128xf32>, vector<128x128xf32>, vector<4x128xf32> -> vector<4x128xf32>
    %140 = arith.addf %135, %139 : vector<4x128xf32>
    %141 = vector.extract_strided_slice %23 {offsets = [28, 0], sizes = [4, 128], strides = [1, 1]} : vector<49x128xf32> to vector<4x128xf32>
    %c6_117 = arith.constant 6 : index
    %c0_118 = arith.constant 0 : index
    %c0_119 = arith.constant 0 : index
    %142 = vector.load %arg4[%c6_117, %c0_118, %c0_119] : memref<9x128x128xf32, #tpu.memory_space<vmem>>, vector<1x128x128xf32>
    %143 = vector.shape_cast %142 : vector<1x128x128xf32> to vector<128x128xf32>
    %cst_120 = arith.constant dense<0.000000e+00> : vector<4x128xf32>
    %144 = tpu.matmul %141, %143, %cst_120 {dimension_numbers = #tpu.dot_dimension_numbers<[1], [0], [0], [1], [0, 0, 1, 1], [], []>} : vector<4x128xf32>, vector<128x128xf32>, vector<4x128xf32> -> vector<4x128xf32>
    %145 = arith.addf %140, %144 : vector<4x128xf32>
    %146 = vector.extract_strided_slice %23 {offsets = [29, 0], sizes = [4, 128], strides = [1, 1]} : vector<49x128xf32> to vector<4x128xf32>
    %c7_121 = arith.constant 7 : index
    %c0_122 = arith.constant 0 : index
    %c0_123 = arith.constant 0 : index
    %147 = vector.load %arg4[%c7_121, %c0_122, %c0_123] : memref<9x128x128xf32, #tpu.memory_space<vmem>>, vector<1x128x128xf32>
    %148 = vector.shape_cast %147 : vector<1x128x128xf32> to vector<128x128xf32>
    %cst_124 = arith.constant dense<0.000000e+00> : vector<4x128xf32>
    %149 = tpu.matmul %146, %148, %cst_124 {dimension_numbers = #tpu.dot_dimension_numbers<[1], [0], [0], [1], [0, 0, 1, 1], [], []>} : vector<4x128xf32>, vector<128x128xf32>, vector<4x128xf32> -> vector<4x128xf32>
    %150 = arith.addf %145, %149 : vector<4x128xf32>
    %151 = vector.extract_strided_slice %23 {offsets = [30, 0], sizes = [4, 128], strides = [1, 1]} : vector<49x128xf32> to vector<4x128xf32>
    %c8_125 = arith.constant 8 : index
    %c0_126 = arith.constant 0 : index
    %c0_127 = arith.constant 0 : index
    %152 = vector.load %arg4[%c8_125, %c0_126, %c0_127] : memref<9x128x128xf32, #tpu.memory_space<vmem>>, vector<1x128x128xf32>
    %153 = vector.shape_cast %152 : vector<1x128x128xf32> to vector<128x128xf32>
    %cst_128 = arith.constant dense<0.000000e+00> : vector<4x128xf32>
    %154 = tpu.matmul %151, %153, %cst_128 {dimension_numbers = #tpu.dot_dimension_numbers<[1], [0], [0], [1], [0, 0, 1, 1], [], []>} : vector<4x128xf32>, vector<128x128xf32>, vector<4x128xf32> -> vector<4x128xf32>
    %155 = arith.addf %150, %154 : vector<4x128xf32>
    %156 = vector.extract_strided_slice %23 {offsets = [21, 0], sizes = [4, 128], strides = [1, 1]} : vector<49x128xf32> to vector<4x128xf32>
    %c0_129 = arith.constant 0 : index
    %c0_130 = arith.constant 0 : index
    %c0_131 = arith.constant 0 : index
    %157 = vector.load %arg4[%c0_129, %c0_130, %c0_131] : memref<9x128x128xf32, #tpu.memory_space<vmem>>, vector<1x128x128xf32>
    %158 = vector.shape_cast %157 : vector<1x128x128xf32> to vector<128x128xf32>
    %cst_132 = arith.constant dense<0.000000e+00> : vector<4x128xf32>
    %159 = tpu.matmul %156, %158, %cst_132 {dimension_numbers = #tpu.dot_dimension_numbers<[1], [0], [0], [1], [0, 0, 1, 1], [], []>} : vector<4x128xf32>, vector<128x128xf32>, vector<4x128xf32> -> vector<4x128xf32>
    %160 = vector.extract_strided_slice %23 {offsets = [22, 0], sizes = [4, 128], strides = [1, 1]} : vector<49x128xf32> to vector<4x128xf32>
    %c1_133 = arith.constant 1 : index
    %c0_134 = arith.constant 0 : index
    %c0_135 = arith.constant 0 : index
    %161 = vector.load %arg4[%c1_133, %c0_134, %c0_135] : memref<9x128x128xf32, #tpu.memory_space<vmem>>, vector<1x128x128xf32>
    %162 = vector.shape_cast %161 : vector<1x128x128xf32> to vector<128x128xf32>
    %cst_136 = arith.constant dense<0.000000e+00> : vector<4x128xf32>
    %163 = tpu.matmul %160, %162, %cst_136 {dimension_numbers = #tpu.dot_dimension_numbers<[1], [0], [0], [1], [0, 0, 1, 1], [], []>} : vector<4x128xf32>, vector<128x128xf32>, vector<4x128xf32> -> vector<4x128xf32>
    %164 = arith.addf %159, %163 : vector<4x128xf32>
    %165 = vector.extract_strided_slice %23 {offsets = [23, 0], sizes = [4, 128], strides = [1, 1]} : vector<49x128xf32> to vector<4x128xf32>
    %c2_137 = arith.constant 2 : index
    %c0_138 = arith.constant 0 : index
    %c0_139 = arith.constant 0 : index
    %166 = vector.load %arg4[%c2_137, %c0_138, %c0_139] : memref<9x128x128xf32, #tpu.memory_space<vmem>>, vector<1x128x128xf32>
    %167 = vector.shape_cast %166 : vector<1x128x128xf32> to vector<128x128xf32>
    %cst_140 = arith.constant dense<0.000000e+00> : vector<4x128xf32>
    %168 = tpu.matmul %165, %167, %cst_140 {dimension_numbers = #tpu.dot_dimension_numbers<[1], [0], [0], [1], [0, 0, 1, 1], [], []>} : vector<4x128xf32>, vector<128x128xf32>, vector<4x128xf32> -> vector<4x128xf32>
    %169 = arith.addf %164, %168 : vector<4x128xf32>
    %170 = vector.extract_strided_slice %23 {offsets = [28, 0], sizes = [4, 128], strides = [1, 1]} : vector<49x128xf32> to vector<4x128xf32>
    %c3_141 = arith.constant 3 : index
    %c0_142 = arith.constant 0 : index
    %c0_143 = arith.constant 0 : index
    %171 = vector.load %arg4[%c3_141, %c0_142, %c0_143] : memref<9x128x128xf32, #tpu.memory_space<vmem>>, vector<1x128x128xf32>
    %172 = vector.shape_cast %171 : vector<1x128x128xf32> to vector<128x128xf32>
    %cst_144 = arith.constant dense<0.000000e+00> : vector<4x128xf32>
    %173 = tpu.matmul %170, %172, %cst_144 {dimension_numbers = #tpu.dot_dimension_numbers<[1], [0], [0], [1], [0, 0, 1, 1], [], []>} : vector<4x128xf32>, vector<128x128xf32>, vector<4x128xf32> -> vector<4x128xf32>
    %174 = arith.addf %169, %173 : vector<4x128xf32>
    %175 = vector.extract_strided_slice %23 {offsets = [29, 0], sizes = [4, 128], strides = [1, 1]} : vector<49x128xf32> to vector<4x128xf32>
    %c4_145 = arith.constant 4 : index
    %c0_146 = arith.constant 0 : index
    %c0_147 = arith.constant 0 : index
    %176 = vector.load %arg4[%c4_145, %c0_146, %c0_147] : memref<9x128x128xf32, #tpu.memory_space<vmem>>, vector<1x128x128xf32>
    %177 = vector.shape_cast %176 : vector<1x128x128xf32> to vector<128x128xf32>
    %cst_148 = arith.constant dense<0.000000e+00> : vector<4x128xf32>
    %178 = tpu.matmul %175, %177, %cst_148 {dimension_numbers = #tpu.dot_dimension_numbers<[1], [0], [0], [1], [0, 0, 1, 1], [], []>} : vector<4x128xf32>, vector<128x128xf32>, vector<4x128xf32> -> vector<4x128xf32>
    %179 = arith.addf %174, %178 : vector<4x128xf32>
    %180 = vector.extract_strided_slice %23 {offsets = [30, 0], sizes = [4, 128], strides = [1, 1]} : vector<49x128xf32> to vector<4x128xf32>
    %c5_149 = arith.constant 5 : index
    %c0_150 = arith.constant 0 : index
    %c0_151 = arith.constant 0 : index
    %181 = vector.load %arg4[%c5_149, %c0_150, %c0_151] : memref<9x128x128xf32, #tpu.memory_space<vmem>>, vector<1x128x128xf32>
    %182 = vector.shape_cast %181 : vector<1x128x128xf32> to vector<128x128xf32>
    %cst_152 = arith.constant dense<0.000000e+00> : vector<4x128xf32>
    %183 = tpu.matmul %180, %182, %cst_152 {dimension_numbers = #tpu.dot_dimension_numbers<[1], [0], [0], [1], [0, 0, 1, 1], [], []>} : vector<4x128xf32>, vector<128x128xf32>, vector<4x128xf32> -> vector<4x128xf32>
    %184 = arith.addf %179, %183 : vector<4x128xf32>
    %185 = vector.extract_strided_slice %23 {offsets = [35, 0], sizes = [4, 128], strides = [1, 1]} : vector<49x128xf32> to vector<4x128xf32>
    %c6_153 = arith.constant 6 : index
    %c0_154 = arith.constant 0 : index
    %c0_155 = arith.constant 0 : index
    %186 = vector.load %arg4[%c6_153, %c0_154, %c0_155] : memref<9x128x128xf32, #tpu.memory_space<vmem>>, vector<1x128x128xf32>
    %187 = vector.shape_cast %186 : vector<1x128x128xf32> to vector<128x128xf32>
    %cst_156 = arith.constant dense<0.000000e+00> : vector<4x128xf32>
    %188 = tpu.matmul %185, %187, %cst_156 {dimension_numbers = #tpu.dot_dimension_numbers<[1], [0], [0], [1], [0, 0, 1, 1], [], []>} : vector<4x128xf32>, vector<128x128xf32>, vector<4x128xf32> -> vector<4x128xf32>
    %189 = arith.addf %184, %188 : vector<4x128xf32>
    %190 = vector.extract_strided_slice %23 {offsets = [36, 0], sizes = [4, 128], strides = [1, 1]} : vector<49x128xf32> to vector<4x128xf32>
    %c7_157 = arith.constant 7 : index
    %c0_158 = arith.constant 0 : index
    %c0_159 = arith.constant 0 : index
    %191 = vector.load %arg4[%c7_157, %c0_158, %c0_159] : memref<9x128x128xf32, #tpu.memory_space<vmem>>, vector<1x128x128xf32>
    %192 = vector.shape_cast %191 : vector<1x128x128xf32> to vector<128x128xf32>
    %cst_160 = arith.constant dense<0.000000e+00> : vector<4x128xf32>
    %193 = tpu.matmul %190, %192, %cst_160 {dimension_numbers = #tpu.dot_dimension_numbers<[1], [0], [0], [1], [0, 0, 1, 1], [], []>} : vector<4x128xf32>, vector<128x128xf32>, vector<4x128xf32> -> vector<4x128xf32>
    %194 = arith.addf %189, %193 : vector<4x128xf32>
    %195 = vector.extract_strided_slice %23 {offsets = [37, 0], sizes = [4, 128], strides = [1, 1]} : vector<49x128xf32> to vector<4x128xf32>
    %c8_161 = arith.constant 8 : index
    %c0_162 = arith.constant 0 : index
    %c0_163 = arith.constant 0 : index
    %196 = vector.load %arg4[%c8_161, %c0_162, %c0_163] : memref<9x128x128xf32, #tpu.memory_space<vmem>>, vector<1x128x128xf32>
    %197 = vector.shape_cast %196 : vector<1x128x128xf32> to vector<128x128xf32>
    %cst_164 = arith.constant dense<0.000000e+00> : vector<4x128xf32>
    %198 = tpu.matmul %195, %197, %cst_164 {dimension_numbers = #tpu.dot_dimension_numbers<[1], [0], [0], [1], [0, 0, 1, 1], [], []>} : vector<4x128xf32>, vector<128x128xf32>, vector<4x128xf32> -> vector<4x128xf32>
    %199 = arith.addf %194, %198 : vector<4x128xf32>
    %c0_165 = arith.constant 0 : index
    %c0_166 = arith.constant 0 : index
    %200 = vector.load %arg5[%c0_165, %c0_166] : memref<1x128xf32, #tpu.memory_space<vmem>>, vector<1x128xf32>
    %201 = arith.maximumf %67, %111 : vector<4x128xf32>
    %202 = vector.extract_strided_slice %201 {offsets = [0, 0], sizes = [2, 128], strides = [1, 1]} : vector<4x128xf32> to vector<2x128xf32>
    %cst_167 = arith.constant dense<0xFF800000> : vector<128xf32>
    %203 = vector.multi_reduction <maximumf>, %202, %cst_167 [0] : vector<2x128xf32> to vector<128xf32>
    %204 = vector.shape_cast %203 : vector<128xf32> to vector<1x128xf32>
    %205 = arith.addf %204, %200 : vector<1x128xf32>
    %cst_168 = arith.constant 0.000000e+00 : f32
    %206 = vector.broadcast %cst_168 : f32 to vector<1x128xf32>
    %207 = arith.maximumf %205, %206 : vector<1x128xf32>
    %208 = vector.extract_strided_slice %201 {offsets = [2, 0], sizes = [2, 128], strides = [1, 1]} : vector<4x128xf32> to vector<2x128xf32>
    %cst_169 = arith.constant dense<0xFF800000> : vector<128xf32>
    %209 = vector.multi_reduction <maximumf>, %208, %cst_169 [0] : vector<2x128xf32> to vector<128xf32>
    %210 = vector.shape_cast %209 : vector<128xf32> to vector<1x128xf32>
    %211 = arith.addf %210, %200 : vector<1x128xf32>
    %cst_170 = arith.constant 0.000000e+00 : f32
    %212 = vector.broadcast %cst_170 : f32 to vector<1x128xf32>
    %213 = arith.maximumf %211, %212 : vector<1x128xf32>
    %214 = arith.maximumf %155, %199 : vector<4x128xf32>
    %215 = vector.extract_strided_slice %214 {offsets = [0, 0], sizes = [2, 128], strides = [1, 1]} : vector<4x128xf32> to vector<2x128xf32>
    %cst_171 = arith.constant dense<0xFF800000> : vector<128xf32>
    %216 = vector.multi_reduction <maximumf>, %215, %cst_171 [0] : vector<2x128xf32> to vector<128xf32>
    %217 = vector.shape_cast %216 : vector<128xf32> to vector<1x128xf32>
    %218 = arith.addf %217, %200 : vector<1x128xf32>
    %cst_172 = arith.constant 0.000000e+00 : f32
    %219 = vector.broadcast %cst_172 : f32 to vector<1x128xf32>
    %220 = arith.maximumf %218, %219 : vector<1x128xf32>
    %221 = vector.extract_strided_slice %214 {offsets = [2, 0], sizes = [2, 128], strides = [1, 1]} : vector<4x128xf32> to vector<2x128xf32>
    %cst_173 = arith.constant dense<0xFF800000> : vector<128xf32>
    %222 = vector.multi_reduction <maximumf>, %221, %cst_173 [0] : vector<2x128xf32> to vector<128xf32>
    %223 = vector.shape_cast %222 : vector<128xf32> to vector<1x128xf32>
    %224 = arith.addf %223, %200 : vector<1x128xf32>
    %cst_174 = arith.constant 0.000000e+00 : f32
    %225 = vector.broadcast %cst_174 : f32 to vector<1x128xf32>
    %226 = arith.maximumf %224, %225 : vector<1x128xf32>
    %c0_175 = arith.constant 0 : index
    %c0_176 = arith.constant 0 : index
    %c0_177 = arith.constant 0 : index
    %227 = vector.load %arg6[%c0_175, %c0_176, %c0_177] : memref<4x128x128xf32, #tpu.memory_space<vmem>>, vector<1x128x128xf32>
    %228 = vector.shape_cast %227 : vector<1x128x128xf32> to vector<128x128xf32>
    %cst_178 = arith.constant dense<0.000000e+00> : vector<1x128xf32>
    %229 = tpu.matmul %207, %228, %cst_178 {dimension_numbers = #tpu.dot_dimension_numbers<[1], [0], [0], [1], [0, 0, 1, 1], [], []>} : vector<1x128xf32>, vector<128x128xf32>, vector<1x128xf32> -> vector<1x128xf32>
    %c1_179 = arith.constant 1 : index
    %c0_180 = arith.constant 0 : index
    %c0_181 = arith.constant 0 : index
    %230 = vector.load %arg6[%c1_179, %c0_180, %c0_181] : memref<4x128x128xf32, #tpu.memory_space<vmem>>, vector<1x128x128xf32>
    %231 = vector.shape_cast %230 : vector<1x128x128xf32> to vector<128x128xf32>
    %cst_182 = arith.constant dense<0.000000e+00> : vector<1x128xf32>
    %232 = tpu.matmul %213, %231, %cst_182 {dimension_numbers = #tpu.dot_dimension_numbers<[1], [0], [0], [1], [0, 0, 1, 1], [], []>} : vector<1x128xf32>, vector<128x128xf32>, vector<1x128xf32> -> vector<1x128xf32>
    %233 = arith.addf %229, %232 : vector<1x128xf32>
    %c2_183 = arith.constant 2 : index
    %c0_184 = arith.constant 0 : index
    %c0_185 = arith.constant 0 : index
    %234 = vector.load %arg6[%c2_183, %c0_184, %c0_185] : memref<4x128x128xf32, #tpu.memory_space<vmem>>, vector<1x128x128xf32>
    %235 = vector.shape_cast %234 : vector<1x128x128xf32> to vector<128x128xf32>
    %cst_186 = arith.constant dense<0.000000e+00> : vector<1x128xf32>
    %236 = tpu.matmul %220, %235, %cst_186 {dimension_numbers = #tpu.dot_dimension_numbers<[1], [0], [0], [1], [0, 0, 1, 1], [], []>} : vector<1x128xf32>, vector<128x128xf32>, vector<1x128xf32> -> vector<1x128xf32>
    %237 = arith.addf %233, %236 : vector<1x128xf32>
    %c3_187 = arith.constant 3 : index
    %c0_188 = arith.constant 0 : index
    %c0_189 = arith.constant 0 : index
    %238 = vector.load %arg6[%c3_187, %c0_188, %c0_189] : memref<4x128x128xf32, #tpu.memory_space<vmem>>, vector<1x128x128xf32>
    %239 = vector.shape_cast %238 : vector<1x128x128xf32> to vector<128x128xf32>
    %cst_190 = arith.constant dense<0.000000e+00> : vector<1x128xf32>
    %240 = tpu.matmul %226, %239, %cst_190 {dimension_numbers = #tpu.dot_dimension_numbers<[1], [0], [0], [1], [0, 0, 1, 1], [], []>} : vector<1x128xf32>, vector<128x128xf32>, vector<1x128xf32> -> vector<1x128xf32>
    %241 = arith.addf %237, %240 : vector<1x128xf32>
    %c0_191 = arith.constant 0 : index
    %c0_192 = arith.constant 0 : index
    %242 = vector.load %arg7[%c0_191, %c0_192] : memref<1x128xf32, #tpu.memory_space<vmem>>, vector<1x128xf32>
    %243 = arith.addf %241, %242 : vector<1x128xf32>
    %cst_193 = arith.constant 0.000000e+00 : f32
    %244 = vector.broadcast %cst_193 : f32 to vector<1x128xf32>
    %245 = arith.maximumf %243, %244 : vector<1x128xf32>
    %c0_194 = arith.constant 0 : index
    %c0_195 = arith.constant 0 : index
    %246 = vector.load %arg8[%c0_194, %c0_195] : memref<128x128xf32, #tpu.memory_space<vmem>>, vector<128x128xf32>
    %cst_196 = arith.constant dense<0.000000e+00> : vector<1x128xf32>
    %247 = tpu.matmul %245, %246, %cst_196 {dimension_numbers = #tpu.dot_dimension_numbers<[1], [0], [0], [1], [0, 0, 1, 1], [], []>} : vector<1x128xf32>, vector<128x128xf32>, vector<1x128xf32> -> vector<1x128xf32>
    %c0_197 = arith.constant 0 : index
    %c0_198 = arith.constant 0 : index
    %248 = vector.load %arg9[%c0_197, %c0_198] : memref<1x128xf32, #tpu.memory_space<vmem>>, vector<1x128xf32>
    %249 = arith.addf %247, %248 : vector<1x128xf32>
    %250 = tpu.iota {dimensions = array<i32: 1>} : vector<1x128xi32>
    %c10_i32 = arith.constant 10 : i32
    %251 = vector.broadcast %c10_i32 : i32 to vector<1x128xi32>
    %252 = arith.cmpi slt, %250, %251 : vector<1x128xi32>
    %cst_199 = arith.constant -1.000000e+30 : f32
    %253 = vector.broadcast %cst_199 : f32 to vector<1x128xf32>
    %254 = arith.select %252, %249, %253 : vector<1x128xi1>, vector<1x128xf32>
    %cst_200 = arith.constant dense<0xFF800000> : vector<1xf32>
    %255 = vector.multi_reduction <maximumf>, %254, %cst_200 [1] : vector<1x128xf32> to vector<1xf32>
    %256 = vector.shape_cast %255 : vector<1xf32> to vector<1x1xf32>
    %257 = vector.broadcast %256 : vector<1x1xf32> to vector<1x128xf32>
    %258 = arith.subf %254, %257 : vector<1x128xf32>
    %259 = math.exp %258 : vector<1x128xf32>
    %cst_201 = arith.constant dense<0.000000e+00> : vector<1xf32>
    %260 = vector.multi_reduction <add>, %259, %cst_201 [1] : vector<1x128xf32> to vector<1xf32>
    %261 = vector.shape_cast %260 : vector<1xf32> to vector<1x1xf32>
    %262 = tpu.reciprocal %261 {approx = true} : vector<1x1xf32> -> vector<1x1xf32>
    %263 = vector.broadcast %262 : vector<1x1xf32> to vector<1x128xf32>
    %264 = arith.mulf %259, %263 : vector<1x128xf32>
    %c0_202 = arith.constant 0 : index
    %c0_203 = arith.constant 0 : index
    %c0_204 = arith.constant 0 : index
    %265 = vector.load %arg10[%c0_202, %c0_203, %c0_204] : memref<1x1x128xf32, #tpu.memory_space<vmem>>, vector<1x1x128xf32>
    %266 = vector.shape_cast %265 : vector<1x1x128xf32> to vector<1x128xf32>
    %267 = vector.shape_cast %264 : vector<1x128xf32> to vector<1x1x128xf32>
    tpu.vector_store %arg10[%c0_202, %c0_203, %c0_204], %267 {strides = array<i32>} : memref<1x1x128xf32, #tpu.memory_space<vmem>>, vector<1x1x128xf32>,
    return
  }
  func.func @transform_0(%arg0: i32) -> (i32, i32, i32, i32) {
    %c0_i32 = arith.constant 0 : i32
    %c0_i32_0 = arith.constant 0 : i32
    %c0_i32_1 = arith.constant 0 : i32
    %c0_i32_2 = arith.constant 0 : i32
    return %arg0, %c0_i32, %c0_i32_0, %c0_i32_1 : i32, i32, i32, i32
  }
  func.func @transform_1(%arg0: i32) -> (i32, i32) {
    %c0_i32 = arith.constant 0 : i32
    %c0_i32_0 = arith.constant 0 : i32
    %c0_i32_1 = arith.constant 0 : i32
    return %c0_i32, %c0_i32_0 : i32, i32
  }
  func.func @transform_2(%arg0: i32) -> (i32, i32) {
    %c0_i32 = arith.constant 0 : i32
    %c0_i32_0 = arith.constant 0 : i32
    %c0_i32_1 = arith.constant 0 : i32
    return %c0_i32, %c0_i32_0 : i32, i32
  }
  func.func @transform_3(%arg0: i32) -> (i32, i32, i32) {
    %c0_i32 = arith.constant 0 : i32
    %c0_i32_0 = arith.constant 0 : i32
    %c0_i32_1 = arith.constant 0 : i32
    %c0_i32_2 = arith.constant 0 : i32
    return %c0_i32, %c0_i32_0, %c0_i32_1 : i32, i32, i32
  }
  func.func @transform_4(%arg0: i32) -> (i32, i32) {
    %c0_i32 = arith.constant 0 : i32
    %c0_i32_0 = arith.constant 0 : i32
    %c0_i32_1 = arith.constant 0 : i32
    return %c0_i32, %c0_i32_0 : i32, i32
  }
  func.func @transform_5(%arg0: i32) -> (i32, i32, i32) {
    %c0_i32 = arith.constant 0 : i32
    %c0_i32_0 = arith.constant 0 : i32
    %c0_i32_1 = arith.constant 0 : i32
    %c0_i32_2 = arith.constant 0 : i32
    return %c0_i32, %c0_i32_0, %c0_i32_1 : i32, i32, i32
  }
  func.func @transform_6(%arg0: i32) -> (i32, i32) {
    %c0_i32 = arith.constant 0 : i32
    %c0_i32_0 = arith.constant 0 : i32
    %c0_i32_1 = arith.constant 0 : i32
    return %c0_i32, %c0_i32_0 : i32, i32
  }
  func.func @transform_7(%arg0: i32) -> (i32, i32) {
    %c0_i32 = arith.constant 0 : i32
    %c0_i32_0 = arith.constant 0 : i32
    %c0_i32_1 = arith.constant 0 : i32
    return %c0_i32, %c0_i32_0 : i32, i32
  }
  func.func @transform_8(%arg0: i32) -> (i32, i32) {
    %c0_i32 = arith.constant 0 : i32
    %c0_i32_0 = arith.constant 0 : i32
    %c0_i32_1 = arith.constant 0 : i32
    return %c0_i32, %c0_i32_0 : i32, i32
  }
  func.func @transform_9(%arg0: i32) -> (i32, i32, i32) {
    %c0_i32 = arith.constant 0 : i32
    %c0_i32_0 = arith.constant 0 : i32
    %c0_i32_1 = arith.constant 0 : i32
    return %arg0, %c0_i32, %c0_i32_0 : i32, i32, i32
  }
}

</mosaic_0001>

<bundles_post_ra>
// kernel: convnet_mnist_forward.1
= control target key start
LH: loop header
LB: loop body
LE: loop exit
PB: predicated region body
PF: predicated region fallthrough
CT: control target
= control target key end

     0   :  { %s7827_s30 = smov 0   ;;  %s9647_s0 = inlined_call_operand.vmem [shape: f32[2,4,49,9], index: 0, kind: input, shape index: {}]   ;;  %s9648_s1 = inlined_call_operand.vmem [shape: f32[9,128], index: 1, kind: input, shape index: {}]   ;;  %s9649_s2 = inlined_call_operand.vmem [shape: f32[1,128], index: 2, kind: input, shape index: {}]   ;;  %s9650_s3 = inlined_call_operand.vmem [shape: f32[9,128,128], index: 3, kind: input, shape index: {}]   ;;  %s9651_s4 = inlined_call_operand.vmem [shape: f32[1,128], index: 4, kind: input, shape index: {}]   ;;  %s9652_s5 = inlined_call_operand.vmem [shape: f32[4,128,128], index: 5, kind: input, shape index: {}]   ;;  %s9653_s6 = inlined_call_operand.vmem [shape: f32[1,128], index: 6, kind: input, shape index: {}]   ;;  %s9654_s7 = inlined_call_operand.vmem [shape: f32[128,128], index: 7, kind: input, shape index: {}]   ;;  %s9655_s8 = inlined_call_operand.vmem [shape: f32[1,128], index: 8, kind: input, shape index: {}]   ;;  %s9656_s9 = inlined_call_operand.vmem [shape: f32[2,1,128], index: 9, kind: output, shape index: {}]  }
   0x1 LB: > { %s4176_s10 = sadd.s32 4294967295, %s7771_s30   ;;  %p4180_p0 = scmp.ge.s32.totalorder %s7771_s30, 1  ;;  %s7771_s30 = sphi %s7827_s30, %s19_s30  }
   0x2   : > { %p287_p1 = scmp.lt.s32.totalorder %s7771_s30, 3 }
   0x4   : > { %p288_p2 = pnand %p4180_p0, %p287_p1 }
   0x6   : > { %291 = sbr.rel (%p288_p2) target bundleno = 1812 (0x714), region = 56 }
   0xd   : > { %v336_v0 = vld [vmem:[%s9648_s1] sm:$0xff]  ;;  %v337_v1 = vld [vmem:[%s9648_s1 + $0x8] sm:$0x1]  ;;  %vm360_vm0 = vcmask 1040384   ;;  %v7773_v2 = vmov 0.0|0.0   ;;  %vm7774_vm1 = vmmov 1  }
   0xe   : > { %7682 = vmatprep.subr.bf16.mxu1 %v7773_v2  ;;  %v6683_v3 = vpack.c.bf16 %v337_v1, %v336_v0  ;;  %vm7843_vm2 = vmpackc.low %vm360_vm0, %vm7774_vm1  ;;  %p321_p3 = scmp.lt.s32.totalorder %s4176_s10, 1  ;;  %6682 = vmatprep.subr.bf16.mxu0 %v7773_v2  ;;  %vm7775_vm3 = vmmov 0   ;;  %v9658_v5 = vmov 0.0   ;;  %vm338_vm4 = vcmask 72704   ;;  %v4236_v32 = vld [vmem:[%s9650_s3 + $0x80] sm:$0xff]  ;;  %v4237_v33 = vld [vmem:[%s9650_s3 + $0x88] sm:$0xff] }
   0xf   : > { %5160 = vmatprep.mubr.msk.f32.mxu1 %vm7775_vm3, %v9658_v5  ;;  %5151 = vmatprep.mubr.msk.f32.mxu0 %vm7775_vm3, %v9658_v5  ;;  %v7985_v34 = vpack.c.bf16 %v4237_v33, %v4236_v32  ;;  %v4238_v35 = vld [vmem:[%s9650_s3 + $0x90] sm:$0xff]  ;;  %v4239_v36 = vld [vmem:[%s9650_s3 + $0x98] sm:$0xff]  ;;  %v4240_v38 = vld [vmem:[%s9650_s3 + $0xa0] sm:$0xff]  ;;  %vm1439_vm5 = vcmask 1041408   ;;  %vm2119_vm6 = vcmask 1042432   ;;  %vm3645_vm7 = vcmask 1043458  }
  0x10   : > { %7683 = vmatpush3.bf16.msk.msra.mxu1 %vm7843_vm2, %v6683_v3  ;;  %s9764_s10 = smov (!%p321_p3, %s4176_s10), 1  ;;  %6685 = vmatpush3.bf16.msk.msra.mxu0 %vm7843_vm2, %v6683_v3  ;;  %v7997_v37 = vpack.c.bf16 %v4239_v36, %v4238_v35  ;;  %v4241_v39 = vld [vmem:[%s9650_s3 + $0xa8] sm:$0xff]  ;;  %v4242_v41 = vld [vmem:[%s9650_s3 + $0xb0] sm:$0xff]  ;;  %v4243_v42 = vld [vmem:[%s9650_s3 + $0xb8] sm:$0xff] }
  0x11   : > { %6686 = vmatprep.subr.bf16.mxu1 %v7773_v2  ;;  %6690 = vmatprep.subr.bf16.mxu0 %v7773_v2  ;;  %s7748_s15 = smul.u32 224, %s9764_s10  ;;  %v8009_v40 = vpack.c.bf16 %v4241_v39, %v4240_v38  ;;  %v8021_v43 = vpack.c.bf16 %v4243_v42, %v4242_v41  ;;  %v4244_v44 = vld [vmem:[%s9650_s3 + $0xc0] sm:$0xff]  ;;  %v4245_v45 = vld [vmem:[%s9650_s3 + $0xc8] sm:$0xff]  ;;  %v4246_v47 = vld [vmem:[%s9650_s3 + $0xd0] sm:$0xff]  ;;  %s328_s22 = scalar_lea.vmem %s9656_s9, %s9764_s10 }
  0x12   : > { %v8033_v46 = vpack.c.bf16 %v4245_v45, %v4244_v44  ;;  %v4247_v48 = vld [vmem:[%s9650_s3 + $0xd8] sm:$0xff]  ;;  %v4248_v50 = vld [vmem:[%s9650_s3 + $0xe0] sm:$0xff]  ;;  %v4249_v51 = vld [vmem:[%s9650_s3 + $0xe8] sm:$0xff] }
  0x13   : > { %s7864_s18 = scalar_lea.vmem %s9647_s0, %s7748_s15  ;;  %v8045_v49 = vpack.c.bf16 %v4247_v48, %v4246_v47  ;;  %v8057_v52 = vpack.c.bf16 %v4249_v51, %v4248_v50  ;;  %v4250_v53 = vld [vmem:[%s9650_s3 + $0xf0] sm:$0xff]  ;;  %v4251_v54 = vld [vmem:[%s9650_s3 + $0xf8] sm:$0xff] }
  0x14   : > { %v332_v6 = vld [vmem:[%s7864_s18 + $0x18] sm:$0xff]  ;;  %v329_v7 = vld [vmem:[%s7864_s18] sm:$0xff]  ;;  %v330_v9 = vld [vmem:[%s7864_s18 + $0x8] sm:$0xff]  ;;  %v8069_v55 = vpack.c.bf16 %v4251_v54, %v4250_v53 }
  0x15   : > { %5161 = vmatmul.mubr.msk.f32.vlgmr.msra.gmra.mrb[0].mxu1 %vm338_vm4, %v332_v6  ;;  %5152 = vmatmul.mubr.msk.f32.vlgmr.msra.gmra.mrb[0].mxu0 %vm338_vm4, %v329_v7  ;;  %v333_v8 = vld [vmem:[%s7864_s18 + $0x20] sm:$0xff]  ;;  %v334_v10 = vld [vmem:[%s7864_s18 + $0x28] sm:$0xff]  ;;  %v331_v11 = vld [vmem:[%s7864_s18 + $0x10] sm:$0xff] }
  0x16   : > { %6689 = vmatpush3.bf16.msk.msra.mxu1 %vm7843_vm2, %v6683_v3  ;;  %5163 = vmatprep.mubr.msk.f32.mxu1 %vm7775_vm3, %v9658_v5  ;;  %v335_v12 = vld [vmem:[%s7864_s18 + $0x30] sm:$0x1]  ;;  %v4190_v14 = vld [vmem:[%s7864_s18 + $0x38] sm:$0xff]  ;;  %v4191_v16 = vld [vmem:[%s7864_s18 + $0x40] sm:$0xff] }
  0x17   : > { %5154 = vmatprep.mubr.msk.f32.mxu0 %vm7775_vm3, %v9658_v5  ;;  %6693 = vmatpush3.bf16.msk.msra.mxu0 %vm7843_vm2, %v6683_v3  ;;  %v4205_v13 = vld [vmem:[%s7864_s18 + $0x70] sm:$0xff]  ;;  %v4206_v15 = vld [vmem:[%s7864_s18 + $0x78] sm:$0xff]  ;;  %v4207_v17 = vld [vmem:[%s7864_s18 + $0x80] sm:$0xff] }
  0x18   : > { %6694 = vmatprep.subr.bf16.mxu1 %v7773_v2  ;;  %6698 = vmatprep.subr.bf16.mxu0 %v7773_v2  ;;  %v4192_v18 = vld [vmem:[%s7864_s18 + $0x48] sm:$0xff]  ;;  %v4193_v20 = vld [vmem:[%s7864_s18 + $0x50] sm:$0xff]  ;;  %v4194_v22 = vld [vmem:[%s7864_s18 + $0x58] sm:$0xff] }
  0x19   : > { %5164 = vmatmul.mubr.msk.f32.gmra.mrb[2].mxu1 %vm338_vm4, %v333_v8  ;;  %5155 = vmatmul.mubr.msk.f32.gmra.mrb[2].mxu0 %vm338_vm4, %v330_v9  ;;  %v4208_v19 = vld [vmem:[%s7864_s18 + $0x88] sm:$0xff]  ;;  %v4209_v21 = vld [vmem:[%s7864_s18 + $0x90] sm:$0xff]  ;;  %v4210_v23 = vld [vmem:[%s7864_s18 + $0x98] sm:$0xff] }
  0x1a   : > { %5166 = vmatprep.mubr.msk.f32.mxu1 %vm7775_vm3, %v9658_v5  ;;  %5157 = vmatprep.mubr.msk.f32.mxu0 %vm7775_vm3, %v9658_v5  ;;  %v4195_v24 = vld [vmem:[%s7864_s18 + $0x60] sm:$0xff]  ;;  %v4196_v25 = vld [vmem:[%s7864_s18 + $0x68] sm:$0x1]  ;;  %v4221_v27 = vld [vmem:[%s7864_s18 + $0xb0] sm:$0xff] }
  0x1b   : > { %v4220_v26 = vld [vmem:[%s7864_s18 + $0xa8] sm:$0xff]  ;;  %v4222_v28 = vld [vmem:[%s7864_s18 + $0xb8] sm:$0xff]  ;;  %v4223_v29 = vld [vmem:[%s7864_s18 + $0xc0] sm:$0xff] }
  0x1c   : > { %v4224_v30 = vld [vmem:[%s7864_s18 + $0xc8] sm:$0xff]  ;;  %v4225_v31 = vld [vmem:[%s7864_s18 + $0xd0] sm:$0xff]  ;;  %v4211_v56 = vld [vmem:[%s7864_s18 + $0xa0] sm:$0x1] }
  0x1d   : > { %5167 = vmatmul.mubr.msk.f32.gmra.mrb[4].mxu1 %vm338_vm4, %v334_v10  ;;  %5158 = vmatmul.mubr.msk.f32.gmra.mrb[4].mxu0 %vm338_vm4, %v331_v11  ;;  %v4226_v57 = vld [vmem:[%s7864_s18 + $0xd8] sm:$0x1] }
  0x1e   : > { %5169 = vmatprep.mubr.msk.f32.mxu1 %vm7775_vm3, %v9658_v5  ;;  %5201 = vmatprep.mubr.msk.f32.mxu0 %vm7775_vm3, %v9658_v5 }
  0x21   : > { %5170 = vmatmul.mubr.msk.f32.gmra.mrb[6].mxu1 %vm338_vm4, %v335_v12  ;;  %5202 = vmatmul.mubr.msk.f32.vlgmr.msra.gmra.mrb[6].mxu0 %vm338_vm4, %v4205_v13 }
  0x22   : > { %5176 = vmatprep.mubr.msk.f32.mxu1 %vm7775_vm3, %v9658_v5  ;;  %5204 = vmatprep.mubr.msk.f32.mxu0 %vm7775_vm3, %v9658_v5 }
  0x23   : > { %6700 = vmatpush3.bf16.msra.mxu0 %v7985_v34 }
  0x24   : > { %6701 = vmatprep.subr.bf16.mxu0 %v7773_v2 }
  0x25   : > { %5177 = vmatmul.mubr.msk.f32.vlgmr.msra.gmra.mrb[8].mxu1 %vm338_vm4, %v4190_v14  ;;  %5205 = vmatmul.mubr.msk.f32.gmra.mrb[8].mxu0 %vm338_vm4, %v4206_v15 }
  0x26   : > { %6697 = vmatpush3.bf16.msk.msra.mxu1 %vm7843_vm2, %v6683_v3  ;;  %5179 = vmatprep.mubr.msk.f32.mxu1 %vm7775_vm3, %v9658_v5 }
  0x27   : > { %5207 = vmatprep.mubr.msk.f32.mxu0 %vm7775_vm3, %v9658_v5  ;;  %6914 = vmatprep.subr.bf16.mxu1 %v7773_v2 }
  0x28   : > { %6703 = vmatpush3.bf16.msra.mxu0 %v7997_v37 }
  0x29   : > { %5180 = vmatmul.mubr.msk.f32.gmra.mrb[10].mxu1 %vm338_vm4, %v4191_v16  ;;  %5208 = vmatmul.mubr.msk.f32.gmra.mrb[10].mxu0 %vm338_vm4, %v4207_v17 }
  0x2a   : > { %5182 = vmatprep.mubr.msk.f32.mxu1 %vm7775_vm3, %v9658_v5  ;;  %5210 = vmatprep.mubr.msk.f32.mxu0 %vm7775_vm3, %v9658_v5 }
  0x2b   : > { %6704 = vmatprep.subr.bf16.mxu0 %v7773_v2 }
  0x2c   : > { %6706 = vmatpush3.bf16.msra.mxu0 %v8009_v40 }
  0x2d   : > { %5183 = vmatmul.mubr.msk.f32.gmra.mrb[12].mxu1 %vm338_vm4, %v4192_v18  ;;  %5211 = vmatmul.mubr.msk.f32.gmra.mrb[12].mxu0 %vm338_vm4, %v4208_v19 }
  0x2e   : > { %5185 = vmatprep.mubr.msk.f32.mxu1 %vm7775_vm3, %v9658_v5  ;;  %5213 = vmatprep.mubr.msk.f32.mxu0 %vm7775_vm3, %v9658_v5 }
  0x2f   : > { %6707 = vmatprep.subr.bf16.mxu0 %v7773_v2 }
  0x30   : > { %6709 = vmatpush3.bf16.msra.mxu0 %v8021_v43 }
  0x31   : > { %5186 = vmatmul.mubr.msk.f32.gmra.mrb[14].mxu1 %vm338_vm4, %v4193_v20  ;;  %5214 = vmatmul.mubr.msk.f32.gmra.mrb[14].mxu0 %vm338_vm4, %v4209_v21 }
  0x32   : > { %5188 = vmatprep.mubr.msk.f32.mxu1 %vm7775_vm3, %v9658_v5  ;;  %5216 = vmatprep.mubr.msk.f32.mxu0 %vm7775_vm3, %v9658_v5 }
  0x33   : > { %6710 = vmatprep.subr.bf16.mxu0 %v7773_v2 }
  0x34   : > { %6712 = vmatpush3.bf16.msra.mxu0 %v8033_v46 }
  0x35   : > { %5189 = vmatmul.mubr.msk.f32.gmra.mrb[16].mxu1 %vm338_vm4, %v4194_v22  ;;  %5217 = vmatmul.mubr.msk.f32.gmra.mrb[16].mxu0 %vm338_vm4, %v4210_v23 }
  0x36   : > { %5191 = vmatprep.mubr.msk.f32.mxu1 %vm7775_vm3, %v9658_v5  ;;  %5219 = vmatprep.mubr.msk.f32.mxu0 %vm7775_vm3, %v9658_v5 }
  0x37   : > { %6713 = vmatprep.subr.bf16.mxu0 %v7773_v2 }
  0x38   : > { %6715 = vmatpush3.bf16.msra.mxu0 %v8045_v49 }
  0x39   : > { %5192 = vmatmul.mubr.msk.f32.gmra.mrb[18].mxu1 %vm338_vm4, %v4195_v24  ;;  %6716 = vmatprep.subr.bf16.mxu0 %v7773_v2 }
  0x3a   : > { %5194 = vmatprep.mubr.msk.f32.mxu1 %vm7775_vm3, %v9658_v5  ;;  %5220 = vmatmul.mubr.msk.f32.gmra.mrb[18].mxu0 %vm338_vm4, %v4211_v56 }
  0x3b   : > { %5279 = vmatprep.mubr.msk.f32.mxu0 %vm7775_vm3, %v9658_v5 }
  0x3c   : > { %6718 = vmatpush3.bf16.msra.mxu0 %v8057_v52 }
  0x3d   : > { %5195 = vmatmul.mubr.msk.f32.gmra.mrb[20].mxu1 %vm338_vm4, %v4196_v25  ;;  %6719 = vmatprep.subr.bf16.mxu0 %v7773_v2 }
  0x3e   : > { %5226 = vmatprep.mubr.msk.f32.mxu1 %vm7775_vm3, %v9658_v5 }
  0x40   : > { %6721 = vmatpush3.bf16.msra.mxu0 %v8069_v55 }
  0x41   : > { %5227 = vmatmul.mubr.msk.f32.vlgmr.msra.gmra.mrb[22].mxu1 %vm338_vm4, %v4220_v26  ;;  %6722 = vmatprep.subr.bf16.mxu0 %v7773_v2 }
  0x42   : > { %5229 = vmatprep.mubr.msk.f32.mxu1 %vm7775_vm3, %v9658_v5  ;;  %6916 = vmatpush3.bf16.msra.mxu1 %v7985_v34 }
  0x43   : > { %6917 = vmatprep.subr.bf16.mxu1 %v7773_v2 }
  0x45   : > { %5230 = vmatmul.mubr.msk.f32.gmra.mrb[24].mxu1 %vm338_vm4, %v4221_v27 }
  0x46   : > { %5232 = vmatprep.mubr.msk.f32.mxu1 %vm7775_vm3, %v9658_v5  ;;  %6919 = vmatpush3.bf16.msra.mxu1 %v7997_v37 }
  0x47   : > { %6920 = vmatprep.subr.bf16.mxu1 %v7773_v2 }
  0x49   : > { %5233 = vmatmul.mubr.msk.f32.gmra.mrb[26].mxu1 %vm338_vm4, %v4222_v28 }
  0x4a   : > { %5235 = vmatprep.mubr.msk.f32.mxu1 %vm7775_vm3, %v9658_v5  ;;  %6922 = vmatpush3.bf16.msra.mxu1 %v8009_v40 }
  0x4b   : > { %6923 = vmatprep.subr.bf16.mxu1 %v7773_v2 }
  0x4d   : > { %5236 = vmatmul.mubr.msk.f32.gmra.mrb[28].mxu1 %vm338_vm4, %v4223_v29 }
  0x4e   : > { %5238 = vmatprep.mubr.msk.f32.mxu1 %vm7775_vm3, %v9658_v5  ;;  %6925 = vmatpush3.bf16.msra.mxu1 %v8021_v43 }
  0x4f   : > { %6926 = vmatprep.subr.bf16.mxu1 %v7773_v2 }
  0x51   : > { %5239 = vmatmul.mubr.msk.f32.gmra.mrb[30].mxu1 %vm338_vm4, %v4224_v30 }
  0x52   : > { %5241 = vmatprep.mubr.msk.f32.mxu1 %vm7775_vm3, %v9658_v5  ;;  %6928 = vmatpush3.bf16.msra.mxu1 %v8033_v46 }
  0x53   : > { %6929 = vmatprep.subr.bf16.mxu1 %v7773_v2 }
  0x55   : > { %5242 = vmatmul.mubr.msk.f32.gmra.mrb[32].mxu1 %vm338_vm4, %v4225_v31 }
  0x56   : > { %5244 = vmatprep.mubr.msk.f32.mxu1 %vm7775_vm3, %v9658_v5  ;;  %6931 = vmatpush3.bf16.msra.mxu1 %v8045_v49 }
  0x57   : > { %6932 = vmatprep.subr.bf16.mxu1 %v7773_v2 }
  0x59   : > { %5245 = vmatmul.mubr.msk.f32.gmra.mrb[34].mxu1 %vm338_vm4, %v4226_v57  ;;  %v8088_v57 = vld [vmem:[%s9649_s2] ss:$0 sm:$0xff] }
  0x5a   : > { %6934 = vmatpush3.bf16.msra.mxu1 %v8057_v52  ;;  %5594 = vmatprep.mubr.msk.f32.mxu1 %vm7775_vm3, %v9658_v5 }
  0x5b   : > { %6935 = vmatprep.subr.bf16.mxu1 %v7773_v2 }
  0x5e   : > { %6937 = vmatpush3.bf16.msra.mxu1 %v8069_v55 }
  0x5f   : > { %6938 = vmatprep.subr.bf16.mxu1 %v7773_v2 }
  0xe8   : > { %v445_v58 = vpop.f32.mrb[0].mxu1  ;;  %v430_v59 = vpop.f32.mrb[0].mxu0 }
  0xe9   : > { %v5162_v60 = vpop.f32.mrb[1].mxu1  ;;  %v5153_v61 = vpop.f32.mrb[1].mxu0 }
  0xea   : > { %v884_v61 = vld [vmem:[%s9650_s3] sm:$0xff] }
  0xec   : > { %v450_v62 = vpop.f32.mrb[2].mxu1  ;;  %v435_v63 = vpop.f32.mrb[2].mxu0 }
  0xed   : > { %v5165_v0 = vpop.f32.mrb[3].mxu1  ;;  %v5156_v1 = vpop.f32.mrb[3].mxu0 }
  0xf0   : > { %v455_v3 = vpop.f32.mrb[4].mxu1  ;;  %v440_v4 = vpop.f32.mrb[4].mxu0 }
  0xf1   : > { %v5168_v6 = vpop.f32.mrb[5].mxu1  ;;  %v5159_v7 = vpop.f32.mrb[5].mxu0 }
  0xf4   : > { %v460_v8 = vpop.f32.mrb[6].mxu1  ;;  %v692_v9 = vpop.f32.mrb[6].mxu0 }
  0xf5   : > { %v5171_v10 = vpop.f32.mrb[7].mxu1  ;;  %v5203_v11 = vpop.f32.mrb[7].mxu0  ;;  %v886_v8 = vld [vmem:[%s9650_s3 + $0x10] sm:$0xff] }
  0xf8   : > { %v558_v12 = vpop.f32.mrb[8].mxu1  ;;  %v697_v13 = vpop.f32.mrb[8].mxu0 }
  0xf9   : > { %v591_v14 = vmax.f32 %v430_v59, %v558_v12  ;;  %v5178_v15 = vpop.f32.mrb[9].mxu1  ;;  %v5206_v16 = vpop.f32.mrb[9].mxu0 }
  0xfa   : > { %v888_v16 = vld [vmem:[%s9650_s3 + $0x20] sm:$0xff] }
  0xfb   : > { %v725_v17 = vmax.f32 %v591_v14, %v692_v9  ;;  %v887_v9 = vld [vmem:[%s9650_s3 + $0x18] sm:$0xff] }
  0xfc   : > { %v563_v18 = vpop.f32.mrb[10].mxu1  ;;  %v702_v19 = vpop.f32.mrb[10].mxu0  ;;  %v8112_v14 = vpack.c.bf16 %v887_v9, %v886_v8  ;;  %v898_v8 = vld [vmem:[%s9650_s3 + $0x70] sm:$0xff]  ;;  %v899_v9 = vld [vmem:[%s9650_s3 + $0x78] sm:$0xff] }
  0xfd   : > { %v592_v20 = vmax.f32 %v435_v63, %v563_v18  ;;  %v5181_v21 = vpop.f32.mrb[11].mxu1  ;;  %v5209_v22 = vpop.f32.mrb[11].mxu0 }
  0xff   : > { %v726_v23 = vmax.f32 %v592_v20, %v697_v13 }
 0x100   : > { %v568_v24 = vpop.f32.mrb[12].mxu1  ;;  %v707_v25 = vpop.f32.mrb[12].mxu0 }
 0x101   : > { %v593_v26 = vmax.f32 %v440_v4, %v568_v24  ;;  %v5184_v27 = vpop.f32.mrb[13].mxu1  ;;  %v5212_v28 = vpop.f32.mrb[13].mxu0  ;;  %v890_v24 = vld [vmem:[%s9650_s3 + $0x30] sm:$0xff] }
 0x103   : > { %v727_v29 = vmax.f32 %v593_v26, %v702_v19 }
 0x104   : > { %v573_v30 = vpop.f32.mrb[14].mxu1  ;;  %v712_v31 = vpop.f32.mrb[14].mxu0 }
 0x105   : > { %v594_v32 = vmax.f32 %v445_v58, %v573_v30  ;;  %v5187_v33 = vpop.f32.mrb[15].mxu1  ;;  %v5215_v35 = vpop.f32.mrb[15].mxu0 }
 0x106   : > { %v893_v33 = vld [vmem:[%s9650_s3 + $0x48] sm:$0xff] }
 0x107   : > { %v728_v36 = vmax.f32 %v594_v32, %v707_v25  ;;  %v891_v25 = vld [vmem:[%s9650_s3 + $0x38] sm:$0xff]  ;;  %v892_v32 = vld [vmem:[%s9650_s3 + $0x40] sm:$0xff] }
 0x108   : > { %v578_v38 = vpop.f32.mrb[16].mxu1  ;;  %v717_v39 = vpop.f32.mrb[16].mxu0  ;;  %v8147_v30 = vpack.c.bf16 %v891_v25, %v890_v24  ;;  %v4256_v24 = vld [vmem:[%s9650_s3 + $0x120] sm:$0xff]  ;;  %v4257_v25 = vld [vmem:[%s9650_s3 + $0x128] sm:$0xff] }
 0x109   : > { %v595_v41 = vmax.f32 %v450_v62, %v578_v38  ;;  %v5190_v42 = vpop.f32.mrb[17].mxu1  ;;  %v5218_v44 = vpop.f32.mrb[17].mxu0  ;;  %v885_v62 = vld [vmem:[%s9650_s3 + $0x8] sm:$0xff] }
 0x10a   : > { %v8099_v4 = vpack.c.bf16 %v885_v62, %v884_v61 }
 0x10b   : > { %v729_v45 = vmax.f32 %v595_v41, %v712_v31 }
 0x10c   : > { %v583_v47 = vpop.f32.mrb[18].mxu1 }
 0x10d   : > { %v596_v48 = vmax.f32 %v455_v3, %v583_v47  ;;  %v5193_v50 = vpop.f32.mrb[19].mxu1 }
 0x10f   : > { %v8083_v51 = vmax.f32 %v596_v48, %v717_v39  ;;  %v8172_v48 = vpack.c.bf16 %v893_v33, %v892_v32  ;;  %v4260_v32 = vld [vmem:[%s9650_s3 + $0x140] sm:$0xff]  ;;  %v4261_v33 = vld [vmem:[%s9650_s3 + $0x148] sm:$0xff] }
 0x110   : > { %v588_v53 = vpop.f32.mrb[20].mxu1 }
 0x111   : > { %v5196_v54 = vpop.f32.mrb[21].mxu1 }
 0x112   : > { %v895_v54 = vld [vmem:[%s9650_s3 + $0x58] sm:$0xff] }
 0x114   : > { %v826_v56 = vpop.f32.mrb[22].mxu1 }
 0x115   : > { %v859_v58 = vmax.f32 %v725_v17, %v826_v56  ;;  %v5228_v59 = vpop.f32.mrb[23].mxu1  ;;  %v889_v17 = vld [vmem:[%s9650_s3 + $0x28] sm:$0xff] }
 0x116   : > { %v8130_v21 = vpack.c.bf16 %v889_v17, %v888_v16  ;;  %v4254_v17 = vld [vmem:[%s9650_s3 + $0x110] sm:$0xff] }
 0x117   : > { %v872_v60 = vadd.f32 %v8088_v57, %v859_v58 }
 0x118   : > { %v831_v63 = vpop.f32.mrb[24].mxu1 }
 0x119   : > { %v8097_v0 = vmax.f32 %v872_v60, 0.0  ;;  %v860_v1 = vmax.f32 %v726_v23, %v831_v63  ;;  %v5231_v3 = vpop.f32.mrb[25].mxu1 }
 0x11a   : > { %v897_v3 = vld [vmem:[%s9650_s3 + $0x68] sm:$0xff] }
 0x11b   : > { %v918_v6 = vrot.slane %v8097_v0, 1  ;;  %v873_v7 = vadd.f32 %v8088_v57, %v860_v1  ;;  %v896_v1 = vld [vmem:[%s9650_s3 + $0x60] sm:$0xff] }
 0x11c   : > { %v836_v10 = vpop.f32.mrb[26].mxu1 }
 0x11d   : > { %v8109_v11 = vmax.f32 %v873_v7, 0.0  ;;  %v861_v12 = vmax.f32 %v727_v29, %v836_v10  ;;  %5280 = vmatmul.mubr.f32.vlgmr.msra.gmra.mrb[20].mxu0 %v918_v6  ;;  %v5234_v13 = vpop.f32.mrb[27].mxu1  ;;  %v8216_v7 = vpack.c.bf16 %v897_v3, %v896_v1  ;;  %v8228_v10 = vpack.c.bf16 %v899_v9, %v898_v8  ;;  %v4270_v8 = vld [vmem:[%s9650_s3 + $0x190] sm:$0xff]  ;;  %v4271_v9 = vld [vmem:[%s9650_s3 + $0x198] sm:$0xff] }
 0x11e   : > { %6724 = vmatpush3.bf16.msra.mxu0 %v8099_v4  ;;  %5314 = vmatprep.mubr.msk.f32.mxu0 %vm7775_vm3, %v9658_v5  ;;  %v4253_v13 = vld [vmem:[%s9650_s3 + $0x108] sm:$0xff]  ;;  %v1077_v3 = vrot.slane %v8097_v0, 2 }
 0x11f   : > { %v874_v15 = vadd.f32 %v8088_v57, %v861_v12  ;;  %5595 = vmatmul.mubr.f32.vlgmr.msra.gmra.mrb[36].mxu1 %v8109_v11  ;;  %6725 = vmatprep.subr.bf16.mxu0 %v7773_v2  ;;  %v4252_v12 = vld [vmem:[%s9650_s3 + $0x100] sm:$0xff]  ;;  %v1169_v16 = vrot.slane %v8109_v11, 7 }
 0x120   : > { %6940 = vmatpush3.bf16.msra.mxu1 %v8099_v4  ;;  %v841_v18 = vpop.f32.mrb[28].mxu1  ;;  %5629 = vmatprep.mubr.msk.f32.mxu1 %vm7775_vm3, %v9658_v5 }
 0x121   : > { %v862_v19 = vmax.f32 %v728_v36, %v841_v18  ;;  %6941 = vmatprep.subr.bf16.mxu1 %v7773_v2  ;;  %v5237_v20 = vpop.f32.mrb[29].mxu1  ;;  %v8132_v22 = vmax.f32 %v874_v15, 0.0  ;;  %v8240_v15 = vpack.c.bf16 %v4253_v13, %v4252_v12  ;;  %v4255_v18 = vld [vmem:[%s9650_s3 + $0x118] sm:$0xff]  ;;  %v9660_v12 = vrot.slane %v8109_v11, 1  ;;  %v4272_v13 = vld [vmem:[%s9650_s3 + $0x1a0] sm:$0xff] }
 0x122   : > { %6727 = vmatpush3.bf16.msra.mxu0 %v8112_v14 }
 0x123   : > { %v875_v23 = vadd.f32 %v8088_v57, %v862_v19  ;;  %6728 = vmatprep.subr.bf16.mxu0 %v7773_v2  ;;  %v1441_v35 = vrot.slane %v8132_v22, 6  ;;  %v1532_v41 = vrot.slane %v8132_v22, 7  ;;  %v1168_v19 = vrot.slane %v8097_v0, 7 }
 0x124   : > { %6943 = vmatpush3.bf16.msra.mxu1 %v8112_v14  ;;  %v846_v26 = vpop.f32.mrb[30].mxu1 }
 0x125   : > { %v8143_v27 = vmax.f32 %v875_v23, 0.0  ;;  %v863_v28 = vmax.f32 %v729_v45, %v846_v26  ;;  %6944 = vmatprep.subr.bf16.mxu1 %v7773_v2  ;;  %v5240_v29 = vpop.f32.mrb[31].mxu1  ;;  %v8258_v20 = vsel %vm360_vm0, %v1168_v19, %v1169_v16  ;;  %v8260_v23 = vpack.c.bf16 %v4255_v18, %v4254_v17  ;;  %v4273_v17 = vld [vmem:[%s9650_s3 + $0x1a8] sm:$0xff]  ;;  %v4274_v19 = vld [vmem:[%s9650_s3 + $0x1b0] sm:$0xff] }
 0x126   : > { %6730 = vmatpush3.bf16.msra.mxu0 %v8130_v21  ;;  %v8277_v26 = vpack.c.bf16 %v4257_v25, %v4256_v24  ;;  %v4259_v29 = vld [vmem:[%s9650_s3 + $0x138] sm:$0xff]  ;;  %v8381_v18 = vpack.c.bf16 %v4273_v17, %v4272_v13  ;;  %v4284_v17 = vld [vmem:[%s9650_s3 + $0x200] sm:$0xff] }
 0x127   : > { %v876_v31 = vadd.f32 %v8088_v57, %v863_v28  ;;  %6731 = vmatprep.subr.bf16.mxu0 %v7773_v2  ;;  %v2195_v36 = vrot.slane %v8143_v27, 6  ;;  %v2269_v38 = vrot.slane %v8143_v27, 7  ;;  %v9657_v56 = vrot.slane %v8143_v27, 5  ;;  %v4258_v28 = vld [vmem:[%s9650_s3 + $0x130] sm:$0xff]  ;;  %v4275_v24 = vld [vmem:[%s9650_s3 + $0x1b8] sm:$0xff] }
 0x128   : > { %6946 = vmatpush3.bf16.msra.mxu1 %v8130_v21  ;;  %v851_v39 = vpop.f32.mrb[32].mxu1  ;;  %v8393_v25 = vpack.c.bf16 %v4275_v24, %v4274_v19  ;;  %v4285_v19 = vld [vmem:[%s9650_s3 + $0x208] sm:$0xff] }
 0x129   : > { %v8162_v42 = vmax.f32 %v876_v31, 0.0  ;;  %v864_v44 = vmax.f32 %v8083_v51, %v851_v39  ;;  %6947 = vmatprep.subr.bf16.mxu1 %v7773_v2  ;;  %v5243_v45 = vpop.f32.mrb[33].mxu1  ;;  %v8169_v47 = vsel %vm1439_vm5, %v1441_v35, %v2195_v36  ;;  %v8177_v50 = vsel %vm360_vm0, %v1532_v41, %v2269_v38  ;;  %v894_v51 = vld [vmem:[%s9650_s3 + $0x50] sm:$0xff]  ;;  %v4263_v39 = vld [vmem:[%s9650_s3 + $0x158] sm:$0xff] }
 0x12a   : > { %6733 = vmatpush3.bf16.msra.mxu0 %v8147_v30  ;;  %v8201_v62 = vpack.c.bf16 %v895_v54, %v894_v51  ;;  %v8289_v31 = vpack.c.bf16 %v4259_v29, %v4258_v28  ;;  %v4262_v38 = vld [vmem:[%s9650_s3 + $0x150] sm:$0xff]  ;;  %v4264_v45 = vld [vmem:[%s9650_s3 + $0x160] sm:$0xff]  ;;  %v4277_v29 = vld [vmem:[%s9650_s3 + $0x1c8] sm:$0xff]  ;;  %v8453_v24 = vpack.c.bf16 %v4285_v19, %v4284_v17 }
 0x12b   : > { %9710 = vst [vmem:[#allocation2_spill] sm:$0xff] %v8162_v42  ;;  %v877_v53 = vadd.f32 %v8088_v57, %v864_v44  ;;  %6734 = vmatprep.subr.bf16.mxu0 %v7773_v2  ;;  %v2841_v58 = vrot.slane %v8162_v42, 5  ;;  %v2915_v59 = vrot.slane %v8162_v42, 6  ;;  %v8313_v44 = vpack.c.bf16 %v4263_v39, %v4262_v38  ;;  %v4266_v54 = vld [vmem:[%s9650_s3 + $0x170] sm:$0xff]  ;;  %v4276_v28 = vld [vmem:[%s9650_s3 + $0x1c0] sm:$0xff]  ;;  %v4279_v38 = vld [vmem:[%s9650_s3 + $0x1d8] sm:$0xff] }
 0x12c   : > { %6949 = vmatpush3.bf16.msra.mxu1 %v8147_v30  ;;  %v722_v39 = vpop.f32.mrb[18].mxu0  ;;  %v4294_v17 = vld [vmem:[%s9650_s3 + $0x250] sm:$0xff]  ;;  %v4295_v19 = vld [vmem:[%s9650_s3 + $0x258] sm:$0xff]  ;;  %v9716_v42 = vrot.slane %v8109_v11, 1 }
 0x12d   : > { %v883_v57 = vmax.f32 %v877_v53, 0.0  ;;  %6950 = vmatprep.subr.bf16.mxu1 %v7773_v2  ;;  %v8195_v60 = vsel %vm2119_vm6, %v9657_v56, %v2841_v58  ;;  %v8198_v61 = vsel %vm1439_vm5, %v2195_v36, %v2915_v59  ;;  %v8301_v36 = vpack.c.bf16 %v4261_v33, %v4260_v32  ;;  %v4265_v53 = vld [vmem:[%s9650_s3 + $0x168] sm:$0xff]  ;;  %v4278_v33 = vld [vmem:[%s9650_s3 + $0x1d0] sm:$0xff] }
 0x12e   : > { %9711 = vst [vmem:[#allocation3_spill] sm:$0xff] %v8198_v61  ;;  %6736 = vmatpush3.bf16.msra.mxu0 %v8172_v48  ;;  %v8325_v51 = vpack.c.bf16 %v4265_v53, %v4264_v45  ;;  %v8405_v32 = vpack.c.bf16 %v4277_v29, %v4276_v28  ;;  %v856_v45 = vpop.f32.mrb[34].mxu1  ;;  %v5221_v53 = vpop.f32.mrb[19].mxu0  ;;  %v4286_v28 = vld [vmem:[%s9650_s3 + $0x210] sm:$0xff]  ;;  %v4287_v29 = vld [vmem:[%s9650_s3 + $0x218] sm:$0xff]  ;;  %v4320_v61 = vld [vmem:[%s9650_s3 + $0x320] sm:$0xff] }
 0x12f   : > { %v3560_v63 = vrot.slane %v883_v57, 5  ;;  %6737 = vmatprep.subr.bf16.mxu0 %v7773_v2  ;;  %v4268_v57 = vld [vmem:[%s9650_s3 + $0x180] sm:$0xff]  ;;  %v8472_v39 = vpack.c.bf16 %v4287_v29, %v4286_v28  ;;  %v4289_v45 = vld [vmem:[%s9650_s3 + $0x228] sm:$0xff]  ;;  %v4290_v53 = vld [vmem:[%s9650_s3 + $0x230] sm:$0xff]  ;;  %v8525_v28 = vpack.c.bf16 %v4295_v19, %v4294_v17 }
 0x130   : > { %6952 = vmatpush3.bf16.msra.mxu1 %v8172_v48  ;;  %v4296_v29 = vld [vmem:[%s9650_s3 + $0x260] sm:$0xff]  ;;  %v4302_v19 = vld [vmem:[%s9650_s3 + $0x290] sm:$0xff] }
 0x131   : > { %6953 = vmatprep.subr.bf16.mxu1 %v7773_v2  ;;  %v8213_v6 = vsel %vm2119_vm6, %v2841_v58, %v3560_v63  ;;  %v4267_v58 = vld [vmem:[%s9650_s3 + $0x178] sm:$0xff]  ;;  %v4269_v63 = vld [vmem:[%s9650_s3 + $0x188] sm:$0xff] }
 0x132   : > { %9712 = vst [vmem:[#allocation4_spill] sm:$0xff] %v8213_v6  ;;  %6739 = vmatpush3.bf16.msra.mxu0 %v8201_v62  ;;  %v8337_v59 = vpack.c.bf16 %v4267_v58, %v4266_v54  ;;  %v8349_v1 = vpack.c.bf16 %v4269_v63, %v4268_v57  ;;  %v8417_v54 = vpack.c.bf16 %v4279_v38, %v4278_v33  ;;  %v5246_v58 = vpop.f32.mrb[35].mxu1  ;;  %v4280_v57 = vld [vmem:[%s9650_s3 + $0x1e0] sm:$0xff]  ;;  %v4281_v63 = vld [vmem:[%s9650_s3 + $0x1e8] sm:$0xff]  ;;  %v1440_v33 = vrot.slane %v8109_v11, 6 }
 0x133   : > { %6740 = vmatprep.subr.bf16.mxu0 %v7773_v2  ;;  %v4291_v58 = vld [vmem:[%s9650_s3 + $0x238] sm:$0xff] }
 0x134   : > { %6955 = vmatpush3.bf16.msra.mxu1 %v8201_v62  ;;  %v8470_v38 = vsel %vm1439_vm5, %v1440_v33, %v1441_v35  ;;  %v4297_v33 = vld [vmem:[%s9650_s3 + $0x268] sm:$0xff] }
 0x135   : > { %6956 = vmatprep.subr.bf16.mxu1 %v7773_v2 }
 0x136   : > { %6742 = vmatpush3.bf16.msra.mxu0 %v8216_v7 }
 0x137   : > { %6743 = vmatprep.subr.bf16.mxu0 %v7773_v2 }
 0x138   : > { %6958 = vmatpush3.bf16.msra.mxu1 %v8216_v7 }
 0x139   : > { %6959 = vmatprep.subr.bf16.mxu1 %v7773_v2 }
 0x13a   : > { %6745 = vmatpush3.bf16.msra.mxu0 %v8228_v10 }
 0x13b   : > { %6746 = vmatprep.subr.bf16.mxu0 %v7773_v2 }
 0x13c   : > { %6961 = vmatpush3.bf16.msra.mxu1 %v8228_v10 }
 0x13d   : > { %5315 = vmatmul.mubr.f32.vlgmr.msra.gmra.mrb[20].mxu0 %v8097_v0  ;;  %6962 = vmatprep.subr.bf16.mxu1 %v7773_v2  ;;  %v8363_v0 = vpack.c.bf16 %v4271_v9, %v4270_v8  ;;  %v4282_v8 = vld [vmem:[%s9650_s3 + $0x1f0] sm:$0xff]  ;;  %v4283_v9 = vld [vmem:[%s9650_s3 + $0x1f8] sm:$0xff] }
 0x13e   : > { %6748 = vmatpush3.bf16.msra.mxu0 %v8240_v15  ;;  %5349 = vmatprep.mubr.msk.f32.mxu0 %vm7775_vm3, %v9658_v5  ;;  %v8441_v13 = vpack.c.bf16 %v4283_v9, %v4282_v8  ;;  %v4293_v8 = vld [vmem:[%s9650_s3 + $0x248] sm:$0xff] }
 0x13f   : > { %5630 = vmatmul.mubr.f32.vlgmr.msra.gmra.mrb[36].mxu1 %v8258_v20  ;;  %6749 = vmatprep.subr.bf16.mxu0 %v7773_v2 }
 0x140   : > { %6964 = vmatpush3.bf16.msra.mxu1 %v8240_v15  ;;  %5664 = vmatprep.mubr.msk.f32.mxu1 %vm7775_vm3, %v9658_v5 }
 0x141   : > { %6965 = vmatprep.subr.bf16.mxu1 %v7773_v2 }
 0x142   : > { %6751 = vmatpush3.bf16.msra.mxu0 %v8260_v23 }
 0x143   : > { %6752 = vmatprep.subr.bf16.mxu0 %v7773_v2 }
 0x144   : > { %6967 = vmatpush3.bf16.msra.mxu1 %v8260_v23 }
 0x145   : > { %6968 = vmatprep.subr.bf16.mxu1 %v7773_v2 }
 0x146   : > { %6754 = vmatpush3.bf16.msra.mxu0 %v8277_v26 }
 0x147   : > { %6755 = vmatprep.subr.bf16.mxu0 %v7773_v2 }
 0x148   : > { %6970 = vmatpush3.bf16.msra.mxu1 %v8277_v26 }
 0x149   : > { %6971 = vmatprep.subr.bf16.mxu1 %v7773_v2 }
 0x14a   : > { %6757 = vmatpush3.bf16.msra.mxu0 %v8289_v31 }
 0x14b   : > { %6758 = vmatprep.subr.bf16.mxu0 %v7773_v2 }
 0x14c   : > { %6973 = vmatpush3.bf16.msra.mxu1 %v8289_v31 }
 0x14d   : > { %6974 = vmatprep.subr.bf16.mxu1 %v7773_v2 }
 0x14e   : > { %6760 = vmatpush3.bf16.msra.mxu0 %v8301_v36 }
 0x14f   : > { %6761 = vmatprep.subr.bf16.mxu0 %v7773_v2 }
 0x150   : > { %6976 = vmatpush3.bf16.msra.mxu1 %v8301_v36 }
 0x151   : > { %6977 = vmatprep.subr.bf16.mxu1 %v7773_v2 }
 0x152   : > { %6763 = vmatpush3.bf16.msra.mxu0 %v8313_v44 }
 0x153   : > { %6764 = vmatprep.subr.bf16.mxu0 %v7773_v2 }
 0x154   : > { %6979 = vmatpush3.bf16.msra.mxu1 %v8313_v44 }
 0x155   : > { %6980 = vmatprep.subr.bf16.mxu1 %v7773_v2 }
 0x156   : > { %6766 = vmatpush3.bf16.msra.mxu0 %v8325_v51 }
 0x157   : > { %6767 = vmatprep.subr.bf16.mxu0 %v7773_v2 }
 0x158   : > { %6982 = vmatpush3.bf16.msra.mxu1 %v8325_v51 }
 0x159   : > { %6983 = vmatprep.subr.bf16.mxu1 %v7773_v2 }
 0x15a   : > { %6769 = vmatpush3.bf16.msra.mxu0 %v8337_v59 }
 0x15b   : > { %6770 = vmatprep.subr.bf16.mxu0 %v7773_v2 }
 0x15c   : > { %6985 = vmatpush3.bf16.msra.mxu1 %v8337_v59 }
 0x15d   : > { %5350 = vmatmul.mubr.f32.vlgmr.msra.gmra.mrb[20].mxu0 %v1077_v3  ;;  %6986 = vmatprep.subr.bf16.mxu1 %v7773_v2  ;;  %v8429_v3 = vpack.c.bf16 %v4281_v63, %v4280_v57  ;;  %v8501_v57 = vpack.c.bf16 %v4291_v58, %v4290_v53  ;;  %v4292_v63 = vld [vmem:[%s9650_s3 + $0x240] sm:$0xff]  ;;  %v4299_v53 = vld [vmem:[%s9650_s3 + $0x278] sm:$0xff] }
 0x15e   : > { %6772 = vmatpush3.bf16.msra.mxu0 %v8349_v1  ;;  %5384 = vmatprep.mubr.msk.f32.mxu0 %vm7775_vm3, %v9658_v5  ;;  %v8513_v9 = vpack.c.bf16 %v4293_v8, %v4292_v63  ;;  %v4300_v63 = vld [vmem:[%s9650_s3 + $0x280] sm:$0xff]  ;;  %v4301_v8 = vld [vmem:[%s9650_s3 + $0x288] sm:$0xff] }
 0x15f   : > { %5665 = vmatmul.mubr.f32.vlgmr.msra.gmra.mrb[36].mxu1 %v9660_v12  ;;  %6773 = vmatprep.subr.bf16.mxu0 %v7773_v2  ;;  %v8561_v17 = vpack.c.bf16 %v4301_v8, %v4300_v63  ;;  %v4305_v63 = vld [vmem:[%s9650_s3 + $0x2a8] sm:$0xff]  ;;  %v4307_v8 = vld [vmem:[%s9650_s3 + $0x2b8] sm:$0xff] }
 0x160   : > { %6988 = vmatpush3.bf16.msra.mxu1 %v8349_v1  ;;  %5699 = vmatprep.mubr.msk.f32.mxu1 %vm7775_vm3, %v9658_v5 }
 0x161   : > { %6989 = vmatprep.subr.bf16.mxu1 %v7773_v2 }
 0x162   : > { %6775 = vmatpush3.bf16.msra.mxu0 %v8363_v0 }
 0x163   : > { %6776 = vmatprep.subr.bf16.mxu0 %v7773_v2 }
 0x164   : > { %6991 = vmatpush3.bf16.msra.mxu1 %v8363_v0 }
 0x165   : > { %6992 = vmatprep.subr.bf16.mxu1 %v7773_v2 }
 0x166   : > { %6778 = vmatpush3.bf16.msra.mxu0 %v8381_v18 }
 0x167   : > { %6779 = vmatprep.subr.bf16.mxu0 %v7773_v2 }
 0x168   : > { %6994 = vmatpush3.bf16.msra.mxu1 %v8381_v18 }
 0x169   : > { %6995 = vmatprep.subr.bf16.mxu1 %v7773_v2 }
 0x16a   : > { %6781 = vmatpush3.bf16.msra.mxu0 %v8393_v25 }
 0x16b   : > { %6782 = vmatprep.subr.bf16.mxu0 %v7773_v2 }
 0x16c   : > { %6997 = vmatpush3.bf16.msra.mxu1 %v8393_v25 }
 0x16d   : > { %6998 = vmatprep.subr.bf16.mxu1 %v7773_v2 }
 0x16e   : > { %6784 = vmatpush3.bf16.msra.mxu0 %v8405_v32 }
 0x16f   : > { %6785 = vmatprep.subr.bf16.mxu0 %v7773_v2 }
 0x170   : > { %7000 = vmatpush3.bf16.msra.mxu1 %v8405_v32 }
 0x171   : > { %7001 = vmatprep.subr.bf16.mxu1 %v7773_v2 }
 0x172   : > { %6787 = vmatpush3.bf16.msra.mxu0 %v8417_v54 }
 0x173   : > { %6788 = vmatprep.subr.bf16.mxu0 %v7773_v2 }
 0x174   : > { %7003 = vmatpush3.bf16.msra.mxu1 %v8417_v54 }
 0x175   : > { %7004 = vmatprep.subr.bf16.mxu1 %v7773_v2 }
 0x176   : > { %6790 = vmatpush3.bf16.msra.mxu0 %v8429_v3 }
 0x177   : > { %6791 = vmatprep.subr.bf16.mxu0 %v7773_v2 }
 0x178   : > { %7006 = vmatpush3.bf16.msra.mxu1 %v8429_v3 }
 0x179   : > { %7007 = vmatprep.subr.bf16.mxu1 %v7773_v2 }
 0x17a   : > { %6793 = vmatpush3.bf16.msra.mxu0 %v8441_v13 }
 0x17b   : > { %6794 = vmatprep.subr.bf16.mxu0 %v7773_v2 }
 0x17c   : > { %7009 = vmatpush3.bf16.msra.mxu1 %v8441_v13 }
 0x17d   : > { %5385 = vmatmul.mubr.f32.vlgmr.msra.gmra.mrb[20].mxu0 %v8258_v20  ;;  %7010 = vmatprep.subr.bf16.mxu1 %v7773_v2  ;;  %v4288_v20 = vld [vmem:[%s9650_s3 + $0x220] sm:$0xff] }
 0x17e   : > { %6796 = vmatpush3.bf16.msra.mxu0 %v8453_v24  ;;  %5419 = vmatprep.mubr.msk.f32.mxu0 %vm7775_vm3, %v9658_v5  ;;  %v8489_v35 = vpack.c.bf16 %v4289_v45, %v4288_v20  ;;  %v8537_v20 = vpack.c.bf16 %v4297_v33, %v4296_v29  ;;  %v4298_v45 = vld [vmem:[%s9650_s3 + $0x270] sm:$0xff]  ;;  %v4303_v29 = vld [vmem:[%s9650_s3 + $0x298] sm:$0xff]  ;;  %v8579_v33 = vsel %vm360_vm0, %v1169_v16, %v1532_v41 }
 0x17f   : > { %5700 = vmatmul.mubr.f32.vlgmr.msra.gmra.mrb[36].mxu1 %v8470_v38  ;;  %6797 = vmatprep.subr.bf16.mxu0 %v7773_v2  ;;  %v8549_v58 = vpack.c.bf16 %v4299_v53, %v4298_v45  ;;  %v8581_v45 = vpack.c.bf16 %v4303_v29, %v4302_v19  ;;  %v4304_v53 = vld [vmem:[%s9650_s3 + $0x2a0] sm:$0xff]  ;;  %v4306_v16 = vld [vmem:[%s9650_s3 + $0x2b0] sm:$0xff] }
 0x180   : > { %7012 = vmatpush3.bf16.msra.mxu1 %v8453_v24  ;;  %5734 = vmatprep.mubr.msk.f32.mxu1 %vm7775_vm3, %v9658_v5  ;;  %v8598_v41 = vpack.c.bf16 %v4305_v63, %v4304_v53  ;;  %v8610_v19 = vpack.c.bf16 %v4307_v8, %v4306_v16  ;;  %v4308_v29 = vld [vmem:[%s9650_s3 + $0x2c0] sm:$0xff]  ;;  %v4309_v53 = vld [vmem:[%s9650_s3 + $0x2c8] sm:$0xff]  ;;  %v4310_v16 = vld [vmem:[%s9650_s3 + $0x2d0] sm:$0xff] }
 0x181   : > { %7013 = vmatprep.subr.bf16.mxu1 %v7773_v2  ;;  %v8622_v63 = vpack.c.bf16 %v4309_v53, %v4308_v29  ;;  %v4311_v8 = vld [vmem:[%s9650_s3 + $0x2d8] sm:$0xff]  ;;  %v4312_v29 = vld [vmem:[%s9650_s3 + $0x2e0] sm:$0xff]  ;;  %v4313_v53 = vld [vmem:[%s9650_s3 + $0x2e8] sm:$0xff] }
 0x182   : > { %6799 = vmatpush3.bf16.msra.mxu0 %v8472_v39  ;;  %v8634_v56 = vpack.c.bf16 %v4311_v8, %v4310_v16  ;;  %v4314_v16 = vld [vmem:[%s9650_s3 + $0x2f0] sm:$0xff]  ;;  %v4315_v8 = vld [vmem:[%s9650_s3 + $0x2f8] sm:$0xff] }
 0x183   : > { %6800 = vmatprep.subr.bf16.mxu0 %v7773_v2  ;;  %v8658_v12 = vpack.c.bf16 %v4315_v8, %v4314_v16  ;;  %v4318_v16 = vld [vmem:[%s9650_s3 + $0x310] sm:$0xff]  ;;  %v4319_v8 = vld [vmem:[%s9650_s3 + $0x318] sm:$0xff] }
 0x184   : > { %7015 = vmatpush3.bf16.msra.mxu1 %v8472_v39 }
 0x185   : > { %7016 = vmatprep.subr.bf16.mxu1 %v7773_v2  ;;  %9714 = vst [vmem:[#allocation6_spill] sm:$0xff] %v8658_v12 }
 0x186   : > { %6802 = vmatpush3.bf16.msra.mxu0 %v8489_v35 }
 0x187   : > { %6803 = vmatprep.subr.bf16.mxu0 %v7773_v2 }
 0x188   : > { %7018 = vmatpush3.bf16.msra.mxu1 %v8489_v35 }
 0x189   : > { %7019 = vmatprep.subr.bf16.mxu1 %v7773_v2 }
 0x18a   : > { %6805 = vmatpush3.bf16.msra.mxu0 %v8501_v57 }
 0x18b   : > { %6806 = vmatprep.subr.bf16.mxu0 %v7773_v2 }
 0x18c   : > { %7021 = vmatpush3.bf16.msra.mxu1 %v8501_v57 }
 0x18d   : > { %7022 = vmatprep.subr.bf16.mxu1 %v7773_v2 }
 0x18e   : > { %6808 = vmatpush3.bf16.msra.mxu0 %v8513_v9 }
 0x18f   : > { %6809 = vmatprep.subr.bf16.mxu0 %v7773_v2 }
 0x190   : > { %7024 = vmatpush3.bf16.msra.mxu1 %v8513_v9 }
 0x191   : > { %7025 = vmatprep.subr.bf16.mxu1 %v7773_v2 }
 0x192   : > { %6811 = vmatpush3.bf16.msra.mxu0 %v8525_v28 }
 0x193   : > { %6812 = vmatprep.subr.bf16.mxu0 %v7773_v2 }
 0x194   : > { %7027 = vmatpush3.bf16.msra.mxu1 %v8525_v28 }
 0x195   : > { %7028 = vmatprep.subr.bf16.mxu1 %v7773_v2 }
 0x196   : > { %6814 = vmatpush3.bf16.msra.mxu0 %v8537_v20 }
 0x197   : > { %6815 = vmatprep.subr.bf16.mxu0 %v7773_v2 }
 0x198   : > { %7030 = vmatpush3.bf16.msra.mxu1 %v8537_v20 }
 0x199   : > { %7031 = vmatprep.subr.bf16.mxu1 %v7773_v2 }
 0x19a   : > { %6817 = vmatpush3.bf16.msra.mxu0 %v8549_v58 }
 0x19b   : > { %6818 = vmatprep.subr.bf16.mxu0 %v7773_v2 }
 0x19c   : > { %7033 = vmatpush3.bf16.msra.mxu1 %v8549_v58 }
 0x19d   : > { %5420 = vmatmul.mubr.f32.vlgmr.msra.gmra.mrb[20].mxu0 %v8109_v11  ;;  %7034 = vmatprep.subr.bf16.mxu1 %v7773_v2  ;;  %v4321_v11 = vld [vmem:[%s9650_s3 + $0x328] sm:$0xff] }
 0x19e   : > { %6820 = vmatpush3.bf16.msra.mxu0 %v8561_v17  ;;  %5454 = vmatprep.mubr.msk.f32.mxu0 %vm7775_vm3, %v9658_v5 }
 0x19f   : > { %5735 = vmatmul.mubr.f32.vlgmr.msra.gmra.mrb[36].mxu1 %v8579_v33  ;;  %6821 = vmatprep.subr.bf16.mxu0 %v7773_v2 }
 0x1a0   : > { %7036 = vmatpush3.bf16.msra.mxu1 %v8561_v17  ;;  %5769 = vmatprep.mubr.msk.f32.mxu1 %vm7775_vm3, %v9658_v5  ;;  %v8646_v5 = vpack.c.bf16 %v4313_v53, %v4312_v29  ;;  %v4316_v29 = vld [vmem:[%s9650_s3 + $0x300] sm:$0xff]  ;;  %v4317_v53 = vld [vmem:[%s9650_s3 + $0x308] sm:$0xff] }
 0x1a1   : > { %7037 = vmatprep.subr.bf16.mxu1 %v7773_v2  ;;  %v8670_v6 = vpack.c.bf16 %v4317_v53, %v4316_v29  ;;  %v8684_v29 = vpack.c.bf16 %v4319_v8, %v4318_v16  ;;  %v9718_v53 = vmov 0.0   ;;  %v4322_v16 = vld [vmem:[%s9650_s3 + $0x330] sm:$0xff]  ;;  %v4323_v8 = vld [vmem:[%s9650_s3 + $0x338] sm:$0xff] }
 0x1a2   : > { %6823 = vmatpush3.bf16.msra.mxu0 %v8581_v45  ;;  %9713 = vst [vmem:[#allocation5_spill] sm:$0xff] %v8646_v5 }
 0x1a3   : > { %6824 = vmatprep.subr.bf16.mxu0 %v7773_v2  ;;  %9715 = vst [vmem:[#allocation7_spill] sm:$0xff] %v8670_v6  ;;  %9717 = vst [vmem:[#allocation8_spill] sm:$0xff] %v8684_v29 }
 0x1a4   : > { %7039 = vmatpush3.bf16.msra.mxu1 %v8581_v45 }
 0x1a5   : > { %7040 = vmatprep.subr.bf16.mxu1 %v7773_v2 }
 0x1a6   : > { %6826 = vmatpush3.bf16.msra.mxu0 %v8598_v41 }
 0x1a7   : > { %6827 = vmatprep.subr.bf16.mxu0 %v7773_v2 }
 0x1a8   : > { %7042 = vmatpush3.bf16.msra.mxu1 %v8598_v41 }
 0x1a9   : > { %7043 = vmatprep.subr.bf16.mxu1 %v7773_v2 }
 0x1aa   : > { %6829 = vmatpush3.bf16.msra.mxu0 %v8610_v19 }
 0x1ab   : > { %6830 = vmatprep.subr.bf16.mxu0 %v7773_v2 }
 0x1ac   : > { %7045 = vmatpush3.bf16.msra.mxu1 %v8610_v19 }
 0x1ad   : > { %7046 = vmatprep.subr.bf16.mxu1 %v7773_v2 }
 0x1ae   : > { %6832 = vmatpush3.bf16.msra.mxu0 %v8622_v63 }
 0x1af   : > { %6833 = vmatprep.subr.bf16.mxu0 %v7773_v2 }
 0x1b0   : > { %7048 = vmatpush3.bf16.msra.mxu1 %v8622_v63 }
 0x1b1   : > { %7049 = vmatprep.subr.bf16.mxu1 %v7773_v2 }
 0x1b2   : > { %6835 = vmatpush3.bf16.msra.mxu0 %v8634_v56 }
 0x1b3   : > { %6836 = vmatprep.subr.bf16.mxu0 %v7773_v2 }
 0x1b4   : > { %7051 = vmatpush3.bf16.msra.mxu1 %v8634_v56 }
 0x1b5   : > { %7052 = vmatprep.subr.bf16.mxu1 %v7773_v2 }
 0x1b6   : > { %6838 = vmatpush3.bf16.msra.mxu0 %v8646_v5 }
 0x1b7   : > { %6839 = vmatprep.subr.bf16.mxu0 %v7773_v2 }
 0x1b8   : > { %7054 = vmatpush3.bf16.msra.mxu1 %v8646_v5  ;;  %v4337_v5 = vld [vmem:[%s9650_s3 + $0x3a8] sm:$0xff] }
 0x1b9   : > { %7055 = vmatprep.subr.bf16.mxu1 %v7773_v2 }
 0x1ba   : > { %6841 = vmatpush3.bf16.msra.mxu0 %v8658_v12 }
 0x1bb   : > { %6842 = vmatprep.subr.bf16.mxu0 %v7773_v2 }
 0x1bc   : > { %7057 = vmatpush3.bf16.msra.mxu1 %v8658_v12 }
 0x1bd   : > { %5455 = vmatmul.mubr.f32.vlgmr.msra.gmra.mrb[20].mxu0 %v9716_v42  ;;  %7058 = vmatprep.subr.bf16.mxu1 %v7773_v2  ;;  %v8701_v42 = vpack.c.bf16 %v4321_v11, %v4320_v61  ;;  %v4324_v61 = vld [vmem:[%s9650_s3 + $0x340] sm:$0xff]  ;;  %v4325_v11 = vld [vmem:[%s9650_s3 + $0x348] sm:$0xff] }
 0x1be   : > { %6844 = vmatpush3.bf16.msra.mxu0 %v8670_v6  ;;  %5489 = vmatprep.mubr.msk.f32.mxu0 %vm7775_vm3, %v9718_v53 }
 0x1bf   : > { %5770 = vmatmul.mubr.f32.vlgmr.msra.gmra.mrb[36].mxu1 %v8132_v22  ;;  %6845 = vmatprep.subr.bf16.mxu0 %v7773_v2  ;;  %9719 = vst [vmem:[#allocation9_spill] sm:$0xff] %v8701_v42 }
 0x1c0   : > { %7060 = vmatpush3.bf16.msra.mxu1 %v8670_v6  ;;  %5804 = vmatprep.mubr.msk.f32.mxu1 %vm7775_vm3, %v9718_v53  ;;  %v8713_v6 = vpack.c.bf16 %v4323_v8, %v4322_v16  ;;  %v4326_v16 = vld [vmem:[%s9650_s3 + $0x350] sm:$0xff]  ;;  %v4327_v8 = vld [vmem:[%s9650_s3 + $0x358] sm:$0xff] }
 0x1c1   : > { %7061 = vmatprep.subr.bf16.mxu1 %v7773_v2 }
 0x1c2   : > { %6847 = vmatpush3.bf16.msra.mxu0 %v8684_v29  ;;  %9720 = vst [vmem:[#allocation10_spill] sm:$0xff] %v8713_v6 }
 0x1c3   : > { %6848 = vmatprep.subr.bf16.mxu0 %v7773_v2 }
 0x1c4   : > { %7063 = vmatpush3.bf16.msra.mxu1 %v8684_v29  ;;  %v8725_v29 = vpack.c.bf16 %v4325_v11, %v4324_v61  ;;  %v4328_v61 = vld [vmem:[%s9650_s3 + $0x360] sm:$0xff]  ;;  %v4329_v11 = vld [vmem:[%s9650_s3 + $0x368] sm:$0xff] }
 0x1c5   : > { %7064 = vmatprep.subr.bf16.mxu1 %v7773_v2 }
 0x1c6   : > { %6850 = vmatpush3.bf16.msra.mxu0 %v8701_v42  ;;  %9721 = vst [vmem:[#allocation11_spill] sm:$0xff] %v8725_v29 }
 0x1c7   : > { %6851 = vmatprep.subr.bf16.mxu0 %v7773_v2 }
 0x1c8   : > { %7066 = vmatpush3.bf16.msra.mxu1 %v8701_v42  ;;  %v8737_v42 = vpack.c.bf16 %v4327_v8, %v4326_v16  ;;  %v4330_v16 = vld [vmem:[%s9650_s3 + $0x370] sm:$0xff]  ;;  %v4331_v8 = vld [vmem:[%s9650_s3 + $0x378] sm:$0xff] }
 0x1c9   : > { %7067 = vmatprep.subr.bf16.mxu1 %v7773_v2 }
 0x1ca   : > { %6853 = vmatpush3.bf16.msra.mxu0 %v8713_v6  ;;  %9722 = vst [vmem:[#allocation12_spill] sm:$0xff] %v8737_v42 }
 0x1cb   : > { %6854 = vmatprep.subr.bf16.mxu0 %v7773_v2 }
 0x1cc   : > { %7069 = vmatpush3.bf16.msra.mxu1 %v8713_v6  ;;  %v8749_v6 = vpack.c.bf16 %v4329_v11, %v4328_v61  ;;  %v4332_v61 = vld [vmem:[%s9650_s3 + $0x380] sm:$0xff]  ;;  %v4333_v11 = vld [vmem:[%s9650_s3 + $0x388] sm:$0xff] }
 0x1cd   : > { %7070 = vmatprep.subr.bf16.mxu1 %v7773_v2 }
 0x1ce   : > { %6856 = vmatpush3.bf16.msra.mxu0 %v8725_v29  ;;  %9723 = vst [vmem:[#allocation13_spill] sm:$0xff] %v8749_v6 }
 0x1cf   : > { %6857 = vmatprep.subr.bf16.mxu0 %v7773_v2 }
 0x1d0   : > { %7072 = vmatpush3.bf16.msra.mxu1 %v8725_v29  ;;  %v8761_v29 = vpack.c.bf16 %v4331_v8, %v4330_v16  ;;  %v4334_v16 = vld [vmem:[%s9650_s3 + $0x390] sm:$0xff]  ;;  %v4335_v8 = vld [vmem:[%s9650_s3 + $0x398] sm:$0xff] }
 0x1d1   : > { %7073 = vmatprep.subr.bf16.mxu1 %v7773_v2  ;;  %v8792_v12 = vpack.c.bf16 %v4335_v8, %v4334_v16  ;;  %v4338_v16 = vld [vmem:[%s9650_s3 + $0x3b0] sm:$0xff]  ;;  %v4339_v8 = vld [vmem:[%s9650_s3 + $0x3b8] sm:$0xff] }
 0x1d2   : > { %6859 = vmatpush3.bf16.msra.mxu0 %v8737_v42  ;;  %9724 = vst [vmem:[#allocation14_spill] sm:$0xff] %v8761_v29 }
 0x1d3   : > { %6860 = vmatprep.subr.bf16.mxu0 %v7773_v2  ;;  %9726 = vst [vmem:[#allocation15_spill] sm:$0xff] %v8792_v12 }
 0x1d4   : > { %7075 = vmatpush3.bf16.msra.mxu1 %v8737_v42  ;;  %v8773_v42 = vpack.c.bf16 %v4333_v11, %v4332_v61  ;;  %v9725_v61 = vrot.slane %v8143_v27, 5 }
 0x1d5   : > { %7076 = vmatprep.subr.bf16.mxu1 %v7773_v2 }
 0x1d6   : > { %6862 = vmatpush3.bf16.msra.mxu0 %v8749_v6 }
 0x1d7   : > { %6863 = vmatprep.subr.bf16.mxu0 %v7773_v2 }
 0x1d8   : > { %7078 = vmatpush3.bf16.msra.mxu1 %v8749_v6  ;;  %v2120_v6 = vrot.slane %v8132_v22, 5 }
 0x1d9   : > { %7079 = vmatprep.subr.bf16.mxu1 %v7773_v2 }
 0x1da   : > { %6865 = vmatpush3.bf16.msra.mxu0 %v8761_v29  ;;  %v8790_v11 = vsel %vm2119_vm6, %v2120_v6, %v9725_v61  ;;  %v8821_v61 = vpack.c.bf16 %v4339_v8, %v4338_v16  ;;  %v4342_v16 = vld [vmem:[%s9650_s3 + $0x3d0] sm:$0xff]  ;;  %v4343_v8 = vld [vmem:[%s9650_s3 + $0x3d8] sm:$0xff] }
 0x1db   : > { %6866 = vmatprep.subr.bf16.mxu0 %v7773_v2 }
 0x1dc   : > { %7081 = vmatpush3.bf16.msra.mxu1 %v8761_v29  ;;  %v4336_v29 = vld [vmem:[%s9650_s3 + $0x3a0] sm:$0xff]  ;;  %9728 = vst [vmem:[#allocation17_spill] sm:$0xff] %v8821_v61 }
 0x1dd   : > { %5490 = vmatmul.mubr.f32.vlgmr.msra.gmra.mrb[20].mxu0 %v8470_v38  ;;  %7082 = vmatprep.subr.bf16.mxu1 %v7773_v2  ;;  %v8809_v6 = vpack.c.bf16 %v4337_v5, %v4336_v29  ;;  %v4340_v5 = vld [vmem:[%s9650_s3 + $0x3c0] sm:$0xff]  ;;  %v4341_v29 = vld [vmem:[%s9650_s3 + $0x3c8] sm:$0xff] }
 0x1de   : > { %6868 = vmatpush3.bf16.msra.mxu0 %v8773_v42  ;;  %5524 = vmatprep.mubr.msk.f32.mxu0 %vm7775_vm3, %v9718_v53 }
 0x1df   : > { %5805 = vmatmul.mubr.f32.vlgmr.msra.gmra.mrb[36].mxu1 %v8790_v11  ;;  %6869 = vmatprep.subr.bf16.mxu0 %v7773_v2  ;;  %9727 = vst [vmem:[#allocation16_spill] sm:$0xff] %v8809_v6 }
 0x1e0   : > { %7084 = vmatpush3.bf16.msra.mxu1 %v8773_v42  ;;  %5839 = vmatprep.mubr.msk.f32.mxu1 %vm7775_vm3, %v9718_v53 }
 0x1e1   : > { %7085 = vmatprep.subr.bf16.mxu1 %v7773_v2 }
 0x1e2   : > { %6871 = vmatpush3.bf16.msra.mxu0 %v8792_v12 }
 0x1e3   : > { %6872 = vmatprep.subr.bf16.mxu0 %v7773_v2 }
 0x1e4   : > { %7087 = vmatpush3.bf16.msra.mxu1 %v8792_v12  ;;  %v8833_v12 = vpack.c.bf16 %v4341_v29, %v4340_v5  ;;  %v4344_v5 = vld [vmem:[%s9650_s3 + $0x3e0] sm:$0xff]  ;;  %v4345_v29 = vld [vmem:[%s9650_s3 + $0x3e8] sm:$0xff] }
 0x1e5   : > { %7088 = vmatprep.subr.bf16.mxu1 %v7773_v2 }
 0x1e6   : > { %6874 = vmatpush3.bf16.msra.mxu0 %v8809_v6  ;;  %9729 = vst [vmem:[#allocation18_spill] sm:$0xff] %v8833_v12 }
 0x1e7   : > { %6875 = vmatprep.subr.bf16.mxu0 %v7773_v2 }
 0x1e8   : > { %7090 = vmatpush3.bf16.msra.mxu1 %v8809_v6  ;;  %v8845_v6 = vpack.c.bf16 %v4343_v8, %v4342_v16  ;;  %v4346_v16 = vld [vmem:[%s9650_s3 + $0x3f0] sm:$0xff]  ;;  %v4347_v8 = vld [vmem:[%s9650_s3 + $0x3f8] sm:$0xff] }
 0x1e9   : > { %7091 = vmatprep.subr.bf16.mxu1 %v7773_v2 }
 0x1ea   : > { %6877 = vmatpush3.bf16.msra.mxu0 %v8821_v61  ;;  %9730 = vst [vmem:[#allocation19_spill] sm:$0xff] %v8845_v6 }
 0x1eb   : > { %6878 = vmatprep.subr.bf16.mxu0 %v7773_v2 }
 0x1ec   : > { %7093 = vmatpush3.bf16.msra.mxu1 %v8821_v61  ;;  %v8857_v61 = vpack.c.bf16 %v4345_v29, %v4344_v5  ;;  %v4348_v5 = vld [vmem:[%s9650_s3 + $0x400] sm:$0xff]  ;;  %v4349_v29 = vld [vmem:[%s9650_s3 + $0x408] sm:$0xff] }
 0x1ed   : > { %7094 = vmatprep.subr.bf16.mxu1 %v7773_v2 }
 0x1ee   : > { %6880 = vmatpush3.bf16.msra.mxu0 %v8833_v12  ;;  %9731 = vst [vmem:[#allocation20_spill] sm:$0xff] %v8857_v61 }
 0x1ef   : > { %6881 = vmatprep.subr.bf16.mxu0 %v7773_v2 }
 0x1f0   : > { %7096 = vmatpush3.bf16.msra.mxu1 %v8833_v12  ;;  %v8869_v12 = vpack.c.bf16 %v4347_v8, %v4346_v16  ;;  %v4350_v16 = vld [vmem:[%s9650_s3 + $0x410] sm:$0xff]  ;;  %v4351_v8 = vld [vmem:[%s9650_s3 + $0x418] sm:$0xff] }
 0x1f1   : > { %7097 = vmatprep.subr.bf16.mxu1 %v7773_v2 }
 0x1f2   : > { %6883 = vmatpush3.bf16.msra.mxu0 %v8845_v6  ;;  %9732 = vst [vmem:[#allocation21_spill] sm:$0xff] %v8869_v12 }
 0x1f3   : > { %6884 = vmatprep.subr.bf16.mxu0 %v7773_v2 }
 0x1f4   : > { %7099 = vmatpush3.bf16.msra.mxu1 %v8845_v6  ;;  %v8881_v6 = vpack.c.bf16 %v4349_v29, %v4348_v5  ;;  %v8894_v5 = vpack.c.bf16 %v4351_v8, %v4350_v16  ;;  %v4352_v29 = vld [vmem:[%s9650_s3 + $0x420] sm:$0xff]  ;;  %v4354_v8 = vld [vmem:[%s9650_s3 + $0x430] sm:$0xff] }
 0x1f5   : > { %7100 = vmatprep.subr.bf16.mxu1 %v7773_v2 }
 0x1f6   : > { %6886 = vmatpush3.bf16.msra.mxu0 %v8857_v61  ;;  %9733 = vst [vmem:[#allocation22_spill] sm:$0xff] %v8881_v6  ;;  %9734 = vst [vmem:[#allocation23_spill] sm:$0xff] %v8894_v5 }
 0x1f7   : > { %6887 = vmatprep.subr.bf16.mxu0 %v7773_v2 }
 0x1f8   : > { %7102 = vmatpush3.bf16.msra.mxu1 %v8857_v61  ;;  %v4355_v61 = vld [vmem:[%s9650_s3 + $0x438] sm:$0xff] }
 0x1f9   : > { %7103 = vmatprep.subr.bf16.mxu1 %v7773_v2 }
 0x1fa   : > { %6889 = vmatpush3.bf16.msra.mxu0 %v8869_v12 }
 0x1fb   : > { %6890 = vmatprep.subr.bf16.mxu0 %v7773_v2 }
 0x1fc   : > { %7105 = vmatpush3.bf16.msra.mxu1 %v8869_v12  ;;  %v4353_v12 = vld [vmem:[%s9650_s3 + $0x428] sm:$0xff] }
 0x1fd   : > { %5525 = vmatmul.mubr.f32.vlgmr.msra.gmra.mrb[20].mxu0 %v8579_v33  ;;  %7106 = vmatprep.subr.bf16.mxu1 %v7773_v2  ;;  %v8911_v16 = vpack.c.bf16 %v4353_v12, %v4352_v29  ;;  %v4356_v12 = vld [vmem:[%s9650_s3 + $0x440] sm:$0xff]  ;;  %v4357_v29 = vld [vmem:[%s9650_s3 + $0x448] sm:$0xff] }
 0x1fe   : > { %6892 = vmatpush3.bf16.msra.mxu0 %v8881_v6  ;;  %5559 = vmatprep.mubr.msk.f32.mxu0 %vm7775_vm3, %v9718_v53 }
 0x1ff   : > { %5840 = vmatmul.mubr.f32.vlgmr.msra.gmra.mrb[36].mxu1 %v8169_v47  ;;  %6893 = vmatprep.subr.bf16.mxu0 %v7773_v2  ;;  %9735 = vst [vmem:[#allocation24_spill] sm:$0xff] %v8911_v16 }
 0x200   : > { %7108 = vmatpush3.bf16.msra.mxu1 %v8881_v6  ;;  %5874 = vmatprep.mubr.msk.f32.mxu1 %vm7775_vm3, %v9718_v53  ;;  %v8923_v6 = vpack.c.bf16 %v4355_v61, %v4354_v8  ;;  %v4358_v61 = vld [vmem:[%s9650_s3 + $0x450] sm:$0xff]  ;;  %v4359_v8 = vld [vmem:[%s9650_s3 + $0x458] sm:$0xff] }
 0x201   : > { %7109 = vmatprep.subr.bf16.mxu1 %v7773_v2 }
 0x202   : > { %6895 = vmatpush3.bf16.msra.mxu0 %v8894_v5  ;;  %9736 = vst [vmem:[#allocation25_spill] sm:$0xff] %v8923_v6 }
 0x203   : > { %6896 = vmatprep.subr.bf16.mxu0 %v7773_v2 }
 0x204   : > { %7111 = vmatpush3.bf16.msra.mxu1 %v8894_v5  ;;  %v8935_v5 = vpack.c.bf16 %v4357_v29, %v4356_v12  ;;  %v4360_v12 = vld [vmem:[%s9650_s3 + $0x460] sm:$0xff]  ;;  %v4361_v29 = vld [vmem:[%s9650_s3 + $0x468] sm:$0xff] }
 0x205   : > { %7112 = vmatprep.subr.bf16.mxu1 %v7773_v2 }
 0x206   : > { %6898 = vmatpush3.bf16.msra.mxu0 %v8911_v16  ;;  %9737 = vst [vmem:[#allocation26_spill] sm:$0xff] %v8935_v5 }
 0x207   : > { %6899 = vmatprep.subr.bf16.mxu0 %v7773_v2 }
 0x208   : > { %7114 = vmatpush3.bf16.msra.mxu1 %v8911_v16  ;;  %v8947_v16 = vpack.c.bf16 %v4359_v8, %v4358_v61  ;;  %v4362_v61 = vld [vmem:[%s9650_s3 + $0x470] sm:$0xff]  ;;  %v4363_v8 = vld [vmem:[%s9650_s3 + $0x478] sm:$0xff] }
 0x209   : > { %7115 = vmatprep.subr.bf16.mxu1 %v7773_v2 }
 0x20a   : > { %6901 = vmatpush3.bf16.msra.mxu0 %v8923_v6 }
 0x20b   : > { %6902 = vmatprep.subr.bf16.mxu0 %v7773_v2 }
 0x20c   : > { %7117 = vmatpush3.bf16.msra.mxu1 %v8923_v6  ;;  %v8959_v6 = vpack.c.bf16 %v4361_v29, %v4360_v12  ;;  %v3680_v29 = vld [vmem:[%s9652_s5 + $0x30] sm:$0xff] }
 0x20d   : > { %7118 = vmatprep.subr.bf16.mxu1 %v7773_v2 }
 0x20e   : > { %6904 = vmatpush3.bf16.msra.mxu0 %v8935_v5 }
 0x20f   : > { %6905 = vmatprep.subr.bf16.mxu0 %v7773_v2 }
 0x210   : > { %7120 = vmatpush3.bf16.msra.mxu1 %v8935_v5  ;;  %v8971_v5 = vpack.c.bf16 %v4363_v8, %v4362_v61  ;;  %v3681_v61 = vld [vmem:[%s9652_s5 + $0x38] sm:$0xff] }
 0x211   : > { %7121 = vmatprep.subr.bf16.mxu1 %v7773_v2 }
 0x212   : > { %6907 = vmatpush3.bf16.msra.mxu0 %v8947_v16 }
 0x213   : > { %6908 = vmatprep.subr.bf16.mxu0 %v7773_v2 }
 0x214   : > { %7123 = vmatpush3.bf16.msra.mxu1 %v8947_v16 }
 0x215   : > { %7124 = vmatprep.subr.bf16.mxu1 %v7773_v2 }
 0x216   : > { %6910 = vmatpush3.bf16.msra.mxu0 %v8959_v6 }
 0x217   : > { %6911 = vmatprep.subr.bf16.mxu0 %v7773_v2 }
 0x218   : > { %7126 = vmatpush3.bf16.msra.mxu1 %v8959_v6 }
 0x219   : > { %7127 = vmatprep.subr.bf16.mxu1 %v7773_v2 }
 0x21a   : > { %6913 = vmatpush3.bf16.msra.mxu0 %v8971_v5 }
 0x21b   : > { %7130 = vmatprep.subr.bf16.mxu0 %v7773_v2 }
 0x21c   : > { %7129 = vmatpush3.bf16.msra.mxu1 %v8971_v5 }
 0x21d   : > { %5560 = vmatmul.mubr.f32.vlgmr.msra.gmra.mrb[20].mxu0 %v8132_v22  ;;  %7346 = vmatprep.subr.bf16.mxu1 %v7773_v2 }
 0x21e   : > { %7132 = vmatpush3.bf16.msra.mxu0 %v7985_v34  ;;  %5909 = vmatprep.mubr.msk.f32.mxu0 %vm7775_vm3, %v9718_v53 }
 0x21f   : > { %5875 = vmatmul.mubr.f32.vlgmr.msra.gmra.mrb[36].mxu1 %v8177_v50  ;;  %7133 = vmatprep.subr.bf16.mxu0 %v7773_v2 }
 0x220   : > { %7348 = vmatpush3.bf16.msra.mxu1 %v7985_v34  ;;  %6224 = vmatprep.mubr.msk.f32.mxu1 %vm7775_vm3, %v9718_v53  ;;  %v2767_v34 = vrot.slane %v8143_v27, 4  ;;  %v9750_v27 = vld [vmem:[#allocation15_spill] sm:$0xff] }
 0x221   : > { %7349 = vmatprep.subr.bf16.mxu1 %v7773_v2 }
 0x222   : > { %7135 = vmatpush3.bf16.msra.mxu0 %v7997_v37 }
 0x223   : > { %7136 = vmatprep.subr.bf16.mxu0 %v7773_v2 }
 0x224   : > { %7351 = vmatpush3.bf16.msra.mxu1 %v7997_v37  ;;  %v9738_v37 = vld [vmem:[#allocation5_spill] sm:$0xff] }
 0x225   : > { %7352 = vmatprep.subr.bf16.mxu1 %v7773_v2 }
 0x226   : > { %7138 = vmatpush3.bf16.msra.mxu0 %v8009_v40 }
 0x227   : > { %7139 = vmatprep.subr.bf16.mxu0 %v7773_v2 }
 0x228   : > { %7354 = vmatpush3.bf16.msra.mxu1 %v8009_v40  ;;  %v9739_v40 = vld [vmem:[#allocation6_spill] sm:$0xff] }
 0x229   : > { %7355 = vmatprep.subr.bf16.mxu1 %v7773_v2 }
 0x22a   : > { %7141 = vmatpush3.bf16.msra.mxu0 %v8021_v43 }
 0x22b   : > { %7142 = vmatprep.subr.bf16.mxu0 %v7773_v2 }
 0x22c   : > { %7357 = vmatpush3.bf16.msra.mxu1 %v8021_v43  ;;  %v9740_v43 = vld [vmem:[#allocation7_spill] sm:$0xff] }
 0x22d   : > { %7358 = vmatprep.subr.bf16.mxu1 %v7773_v2 }
 0x22e   : > { %7144 = vmatpush3.bf16.msra.mxu0 %v8033_v46 }
 0x22f   : > { %7145 = vmatprep.subr.bf16.mxu0 %v7773_v2 }
 0x230   : > { %7360 = vmatpush3.bf16.msra.mxu1 %v8033_v46  ;;  %v9741_v46 = vld [vmem:[#allocation3_spill] sm:$0xff] }
 0x231   : > { %7361 = vmatprep.subr.bf16.mxu1 %v7773_v2 }
 0x232   : > { %7147 = vmatpush3.bf16.msra.mxu0 %v8045_v49 }
 0x233   : > { %7148 = vmatprep.subr.bf16.mxu0 %v7773_v2 }
 0x234   : > { %7363 = vmatpush3.bf16.msra.mxu1 %v8045_v49  ;;  %v9742_v49 = vld [vmem:[#allocation8_spill] sm:$0xff] }
 0x235   : > { %7364 = vmatprep.subr.bf16.mxu1 %v7773_v2 }
 0x236   : > { %7150 = vmatpush3.bf16.msra.mxu0 %v8057_v52 }
 0x237   : > { %7151 = vmatprep.subr.bf16.mxu0 %v7773_v2 }
 0x238   : > { %7366 = vmatpush3.bf16.msra.mxu1 %v8057_v52  ;;  %v9743_v52 = vld [vmem:[#allocation9_spill] sm:$0xff] }
 0x239   : > { %7367 = vmatprep.subr.bf16.mxu1 %v7773_v2 }
 0x23a   : > { %7153 = vmatpush3.bf16.msra.mxu0 %v8069_v55 }
 0x23b   : > { %7154 = vmatprep.subr.bf16.mxu0 %v7773_v2 }
 0x23c   : > { %7369 = vmatpush3.bf16.msra.mxu1 %v8069_v55  ;;  %v9744_v55 = vld [vmem:[#allocation10_spill] sm:$0xff] }
 0x23d   : > { %5910 = vmatmul.mubr.f32.vlgmr.msra.gmra.mrb[22].mxu0 %v8579_v33  ;;  %7370 = vmatprep.subr.bf16.mxu1 %v7773_v2  ;;  %v4369_v33 = vld [vmem:[%s9652_s5 + $0xa8] sm:$0xff] }
 0x23e   : > { %7156 = vmatpush3.bf16.msra.mxu0 %v8099_v4  ;;  %5944 = vmatprep.mubr.msk.f32.mxu0 %vm7775_vm3, %v9718_v53 }
 0x23f   : > { %6225 = vmatmul.mubr.f32.vlgmr.msra.gmra.mrb[38].mxu1 %v8169_v47  ;;  %7157 = vmatprep.subr.bf16.mxu0 %v7773_v2 }
 0x240   : > { %7372 = vmatpush3.bf16.msra.mxu1 %v8099_v4  ;;  %6259 = vmatprep.mubr.msk.f32.mxu1 %vm7775_vm3, %v9718_v53  ;;  %v9745_v4 = vld [vmem:[#allocation11_spill] sm:$0xff] }
 0x241   : > { %7373 = vmatprep.subr.bf16.mxu1 %v7773_v2 }
 0x242   : > { %7159 = vmatpush3.bf16.msra.mxu0 %v8112_v14 }
 0x243   : > { %7160 = vmatprep.subr.bf16.mxu0 %v7773_v2 }
 0x244   : > { %7375 = vmatpush3.bf16.msra.mxu1 %v8112_v14 }
 0x245   : > { %7376 = vmatprep.subr.bf16.mxu1 %v7773_v2 }
 0x246   : > { %7162 = vmatpush3.bf16.msra.mxu0 %v8130_v21 }
 0x247   : > { %7163 = vmatprep.subr.bf16.mxu0 %v7773_v2 }
 0x248   : > { %7378 = vmatpush3.bf16.msra.mxu1 %v8130_v21 }
 0x249   : > { %7379 = vmatprep.subr.bf16.mxu1 %v7773_v2 }
 0x24a   : > { %7165 = vmatpush3.bf16.msra.mxu0 %v8147_v30 }
 0x24b   : > { %7166 = vmatprep.subr.bf16.mxu0 %v7773_v2 }
 0x24c   : > { %7381 = vmatpush3.bf16.msra.mxu1 %v8147_v30  ;;  %v9746_v30 = vld [vmem:[#allocation12_spill] sm:$0xff] }
 0x24d   : > { %7382 = vmatprep.subr.bf16.mxu1 %v7773_v2 }
 0x24e   : > { %7168 = vmatpush3.bf16.msra.mxu0 %v8172_v48 }
 0x24f   : > { %7169 = vmatprep.subr.bf16.mxu0 %v7773_v2 }
 0x250   : > { %7384 = vmatpush3.bf16.msra.mxu1 %v8172_v48 }
 0x251   : > { %7385 = vmatprep.subr.bf16.mxu1 %v7773_v2 }
 0x252   : > { %7171 = vmatpush3.bf16.msra.mxu0 %v8201_v62 }
 0x253   : > { %7172 = vmatprep.subr.bf16.mxu0 %v7773_v2 }
 0x254   : > { %7387 = vmatpush3.bf16.msra.mxu1 %v8201_v62  ;;  %v9749_v62 = vld [vmem:[#allocation2_spill] sm:$0xff] }
 0x255   : > { %7388 = vmatprep.subr.bf16.mxu1 %v7773_v2 }
 0x256   : > { %7174 = vmatpush3.bf16.msra.mxu0 %v8216_v7 }
 0x257   : > { %7175 = vmatprep.subr.bf16.mxu0 %v7773_v2 }
 0x258   : > { %7390 = vmatpush3.bf16.msra.mxu1 %v8216_v7  ;;  %v3413_v7 = vrot.slane %v9749_v62, 3 }
 0x259   : > { %7391 = vmatprep.subr.bf16.mxu1 %v7773_v2 }
 0x25a   : > { %7177 = vmatpush3.bf16.msra.mxu0 %v8228_v10 }
 0x25b   : > { %7178 = vmatprep.subr.bf16.mxu0 %v7773_v2 }
 0x25c   : > { %7393 = vmatpush3.bf16.msra.mxu1 %v8228_v10  ;;  %v9751_v10 = vld [vmem:[#allocation16_spill] sm:$0xff] }
 0x25d   : > { %5945 = vmatmul.mubr.f32.vlgmr.msra.gmra.mrb[22].mxu0 %v8470_v38  ;;  %7394 = vmatprep.subr.bf16.mxu1 %v7773_v2 }
 0x25e   : > { %7180 = vmatpush3.bf16.msra.mxu0 %v8240_v15  ;;  %5979 = vmatprep.mubr.msk.f32.mxu0 %vm7775_vm3, %v9718_v53 }
 0x25f   : > { %6260 = vmatmul.mubr.f32.vlgmr.msra.gmra.mrb[38].mxu1 %v8790_v11  ;;  %7181 = vmatprep.subr.bf16.mxu0 %v7773_v2 }
 0x260   : > { %7396 = vmatpush3.bf16.msra.mxu1 %v8240_v15  ;;  %6294 = vmatprep.mubr.msk.f32.mxu1 %vm7775_vm3, %v9718_v53  ;;  %v9752_v15 = vld [vmem:[#allocation17_spill] sm:$0xff] }
 0x261   : > { %7397 = vmatprep.subr.bf16.mxu1 %v7773_v2 }
 0x262   : > { %7183 = vmatpush3.bf16.msra.mxu0 %v8260_v23 }
 0x263   : > { %7184 = vmatprep.subr.bf16.mxu0 %v7773_v2 }
 0x264   : > { %7399 = vmatpush3.bf16.msra.mxu1 %v8260_v23  ;;  %v9753_v23 = vld [vmem:[#allocation18_spill] sm:$0xff] }
 0x265   : > { %7400 = vmatprep.subr.bf16.mxu1 %v7773_v2 }
 0x266   : > { %7186 = vmatpush3.bf16.msra.mxu0 %v8277_v26 }
 0x267   : > { %7187 = vmatprep.subr.bf16.mxu0 %v7773_v2 }
 0x268   : > { %7402 = vmatpush3.bf16.msra.mxu1 %v8277_v26  ;;  %v9754_v26 = vld [vmem:[#allocation19_spill] sm:$0xff] }
 0x269   : > { %7403 = vmatprep.subr.bf16.mxu1 %v7773_v2 }
 0x26a   : > { %7189 = vmatpush3.bf16.msra.mxu0 %v8289_v31 }
 0x26b   : > { %7190 = vmatprep.subr.bf16.mxu0 %v7773_v2 }
 0x26c   : > { %7405 = vmatpush3.bf16.msra.mxu1 %v8289_v31  ;;  %v9755_v31 = vld [vmem:[#allocation20_spill] sm:$0xff] }
 0x26d   : > { %7406 = vmatprep.subr.bf16.mxu1 %v7773_v2 }
 0x26e   : > { %7192 = vmatpush3.bf16.msra.mxu0 %v8301_v36 }
 0x26f   : > { %7193 = vmatprep.subr.bf16.mxu0 %v7773_v2 }
 0x270   : > { %7408 = vmatpush3.bf16.msra.mxu1 %v8301_v36  ;;  %v9756_v36 = vld [vmem:[#allocation21_spill] sm:$0xff] }
 0x271   : > { %7409 = vmatprep.subr.bf16.mxu1 %v7773_v2 }
 0x272   : > { %7195 = vmatpush3.bf16.msra.mxu0 %v8313_v44 }
 0x273   : > { %7196 = vmatprep.subr.bf16.mxu0 %v7773_v2 }
 0x274   : > { %7411 = vmatpush3.bf16.msra.mxu1 %v8313_v44  ;;  %v3486_v44 = vrot.slane %v9749_v62, 4  ;;  %v4376_v62 = vld [vmem:[%s9652_s5 + $0xe0] sm:$0xff] }
 0x275   : > { %7412 = vmatprep.subr.bf16.mxu1 %v7773_v2 }
 0x276   : > { %7198 = vmatpush3.bf16.msra.mxu0 %v8325_v51 }
 0x277   : > { %7199 = vmatprep.subr.bf16.mxu0 %v7773_v2 }
 0x278   : > { %7414 = vmatpush3.bf16.msra.mxu1 %v8325_v51  ;;  %v9757_v51 = vld [vmem:[#allocation22_spill] sm:$0xff] }
 0x279   : > { %7415 = vmatprep.subr.bf16.mxu1 %v7773_v2 }
 0x27a   : > { %7201 = vmatpush3.bf16.msra.mxu0 %v8337_v59 }
 0x27b   : > { %7202 = vmatprep.subr.bf16.mxu0 %v7773_v2 }
 0x27c   : > { %7417 = vmatpush3.bf16.msra.mxu1 %v8337_v59  ;;  %v9759_v59 = vld [vmem:[#allocation24_spill] sm:$0xff] }
 0x27d   : > { %5980 = vmatmul.mubr.f32.vlgmr.msra.gmra.mrb[22].mxu0 %v8132_v22  ;;  %7418 = vmatprep.subr.bf16.mxu1 %v7773_v2 }
 0x27e   : > { %7204 = vmatpush3.bf16.msra.mxu0 %v8349_v1  ;;  %6014 = vmatprep.mubr.msk.f32.mxu0 %vm7775_vm3, %v9718_v53 }
 0x27f   : > { %6295 = vmatmul.mubr.f32.vlgmr.msra.gmra.mrb[38].mxu1 %v8177_v50  ;;  %7205 = vmatprep.subr.bf16.mxu0 %v7773_v2 }
 0x280   : > { %7420 = vmatpush3.bf16.msra.mxu1 %v8349_v1  ;;  %6329 = vmatprep.mubr.msk.f32.mxu1 %vm7775_vm3, %v9718_v53  ;;  %v9760_v1 = vld [vmem:[#allocation25_spill] sm:$0xff] }
 0x281   : > { %7421 = vmatprep.subr.bf16.mxu1 %v7773_v2 }
 0x282   : > { %7207 = vmatpush3.bf16.msra.mxu0 %v8363_v0 }
 0x283   : > { %7208 = vmatprep.subr.bf16.mxu0 %v7773_v2 }
 0x284   : > { %7423 = vmatpush3.bf16.msra.mxu1 %v8363_v0  ;;  %v9761_v0 = vld [vmem:[#allocation26_spill] sm:$0xff] }
 0x285   : > { %7424 = vmatprep.subr.bf16.mxu1 %v7773_v2 }
 0x286   : > { %7210 = vmatpush3.bf16.msra.mxu0 %v8381_v18 }
 0x287   : > { %7211 = vmatprep.subr.bf16.mxu0 %v7773_v2 }
 0x288   : > { %7426 = vmatpush3.bf16.msra.mxu1 %v8381_v18  ;;  %v4364_v18 = vld [vmem:[%s9652_s5 + $0x80] sm:$0xff] }
 0x289   : > { %7427 = vmatprep.subr.bf16.mxu1 %v7773_v2 }
 0x28a   : > { %7213 = vmatpush3.bf16.msra.mxu0 %v8393_v25 }
 0x28b   : > { %7214 = vmatprep.subr.bf16.mxu0 %v7773_v2 }
 0x28c   : > { %7429 = vmatpush3.bf16.msra.mxu1 %v8393_v25  ;;  %v4365_v25 = vld [vmem:[%s9652_s5 + $0x88] sm:$0xff] }
 0x28d   : > { %7430 = vmatprep.subr.bf16.mxu1 %v7773_v2 }
 0x28e   : > { %7216 = vmatpush3.bf16.msra.mxu0 %v8405_v32 }
 0x28f   : > { %7217 = vmatprep.subr.bf16.mxu0 %v7773_v2 }
 0x290   : > { %7432 = vmatpush3.bf16.msra.mxu1 %v8405_v32  ;;  %v3674_v32 = vld [vmem:[%s9652_s5] sm:$0xff] }
 0x291   : > { %7433 = vmatprep.subr.bf16.mxu1 %v7773_v2 }
 0x292   : > { %7219 = vmatpush3.bf16.msra.mxu0 %v8417_v54 }
 0x293   : > { %7220 = vmatprep.subr.bf16.mxu0 %v7773_v2 }
 0x294   : > { %7435 = vmatpush3.bf16.msra.mxu1 %v8417_v54  ;;  %v3675_v54 = vld [vmem:[%s9652_s5 + $0x8] sm:$0xff] }
 0x295   : > { %7436 = vmatprep.subr.bf16.mxu1 %v7773_v2 }
 0x296   : > { %7222 = vmatpush3.bf16.msra.mxu0 %v8429_v3 }
 0x297   : > { %7223 = vmatprep.subr.bf16.mxu0 %v7773_v2 }
 0x298   : > { %7438 = vmatpush3.bf16.msra.mxu1 %v8429_v3  ;;  %v7563_v3 = vpack.c.bf16 %v4365_v25, %v4364_v18 }
 0x299   : > { %7439 = vmatprep.subr.bf16.mxu1 %v7773_v2 }
 0x29a   : > { %7225 = vmatpush3.bf16.msra.mxu0 %v8441_v13 }
 0x29b   : > { %7226 = vmatprep.subr.bf16.mxu0 %v7773_v2 }
 0x29c   : > { %7441 = vmatpush3.bf16.msra.mxu1 %v8441_v13  ;;  %v4366_v13 = vld [vmem:[%s9652_s5 + $0x90] sm:$0xff] }
 0x29d   : > { %6015 = vmatmul.mubr.f32.vlgmr.msra.gmra.mrb[22].mxu0 %v8790_v11  ;;  %7442 = vmatprep.subr.bf16.mxu1 %v7773_v2 }
 0x29e   : > { %7228 = vmatpush3.bf16.msra.mxu0 %v8453_v24  ;;  %6049 = vmatprep.mubr.msk.f32.mxu0 %vm7775_vm3, %v9718_v53 }
 0x29f   : > { %6330 = vmatmul.mubr.f32.vlgmr.msra.gmra.mrb[38].mxu1 %v2767_v34  ;;  %7229 = vmatprep.subr.bf16.mxu0 %v7773_v2 }
 0x2a0   : > { %7444 = vmatpush3.bf16.msra.mxu1 %v8453_v24  ;;  %6364 = vmatprep.mubr.msk.f32.mxu1 %vm7775_vm3, %v9718_v53  ;;  %v4367_v24 = vld [vmem:[%s9652_s5 + $0x98] sm:$0xff] }
 0x2a1   : > { %7445 = vmatprep.subr.bf16.mxu1 %v7773_v2 }
 0x2a2   : > { %7231 = vmatpush3.bf16.msra.mxu0 %v8472_v39 }
 0x2a3   : > { %7232 = vmatprep.subr.bf16.mxu0 %v7773_v2 }
 0x2a4   : > { %7447 = vmatpush3.bf16.msra.mxu1 %v8472_v39  ;;  %v7587_v39 = vpack.c.bf16 %v3675_v54, %v3674_v32  ;;  %v4380_v32 = vld [vmem:[%s9652_s5 + $0x100] sm:$0xff]  ;;  %v4381_v54 = vld [vmem:[%s9652_s5 + $0x108] sm:$0xff] }
 0x2a5   : > { %7448 = vmatprep.subr.bf16.mxu1 %v7773_v2 }
 0x2a6   : > { %7234 = vmatpush3.bf16.msra.mxu0 %v8489_v35 }
 0x2a7   : > { %7235 = vmatprep.subr.bf16.mxu0 %v7773_v2 }
 0x2a8   : > { %7450 = vmatpush3.bf16.msra.mxu1 %v8489_v35  ;;  %v3676_v35 = vld [vmem:[%s9652_s5 + $0x10] sm:$0xff] }
 0x2a9   : > { %7451 = vmatprep.subr.bf16.mxu1 %v7773_v2 }
 0x2aa   : > { %7237 = vmatpush3.bf16.msra.mxu0 %v8501_v57 }
 0x2ab   : > { %7238 = vmatprep.subr.bf16.mxu0 %v7773_v2 }
 0x2ac   : > { %7453 = vmatpush3.bf16.msra.mxu1 %v8501_v57  ;;  %v3677_v57 = vld [vmem:[%s9652_s5 + $0x18] sm:$0xff] }
 0x2ad   : > { %7454 = vmatprep.subr.bf16.mxu1 %v7773_v2 }
 0x2ae   : > { %7240 = vmatpush3.bf16.msra.mxu0 %v8513_v9 }
 0x2af   : > { %7241 = vmatprep.subr.bf16.mxu0 %v7773_v2 }
 0x2b0   : > { %7456 = vmatpush3.bf16.msra.mxu1 %v8513_v9 }
 0x2b1   : > { %7457 = vmatprep.subr.bf16.mxu1 %v7773_v2 }
 0x2b2   : > { %7243 = vmatpush3.bf16.msra.mxu0 %v8525_v28 }
 0x2b3   : > { %7244 = vmatprep.subr.bf16.mxu0 %v7773_v2 }
 0x2b4   : > { %7459 = vmatpush3.bf16.msra.mxu1 %v8525_v28  ;;  %v7566_v28 = vpack.c.bf16 %v4367_v24, %v4366_v13  ;;  %v4396_v24 = vld [vmem:[%s9652_s5 + $0x180] sm:$0xff] }
 0x2b5   : > { %7460 = vmatprep.subr.bf16.mxu1 %v7773_v2 }
 0x2b6   : > { %7246 = vmatpush3.bf16.msra.mxu0 %v8537_v20 }
 0x2b7   : > { %7247 = vmatprep.subr.bf16.mxu0 %v7773_v2 }
 0x2b8   : > { %7462 = vmatpush3.bf16.msra.mxu1 %v8537_v20 }
 0x2b9   : > { %7463 = vmatprep.subr.bf16.mxu1 %v7773_v2 }
 0x2ba   : > { %7249 = vmatpush3.bf16.msra.mxu0 %v8549_v58 }
 0x2bb   : > { %7250 = vmatprep.subr.bf16.mxu0 %v7773_v2 }
 0x2bc   : > { %7465 = vmatpush3.bf16.msra.mxu1 %v8549_v58  ;;  %v9762_v58 = vld [vmem:[#allocation4_spill] sm:$0xff] }
 0x2bd   : > { %6050 = vmatmul.mubr.f32.vlgmr.msra.gmra.mrb[22].mxu0 %v8169_v47  ;;  %7466 = vmatprep.subr.bf16.mxu1 %v7773_v2 }
 0x2be   : > { %7252 = vmatpush3.bf16.msra.mxu0 %v8561_v17  ;;  %6084 = vmatprep.mubr.msk.f32.mxu0 %vm7775_vm3, %v9718_v53 }
 0x2bf   : > { %6365 = vmatmul.mubr.f32.vlgmr.msra.gmra.mrb[38].mxu1 %v8195_v60  ;;  %7253 = vmatprep.subr.bf16.mxu0 %v7773_v2 }
 0x2c0   : > { %7468 = vmatpush3.bf16.msra.mxu1 %v8561_v17  ;;  %6399 = vmatprep.mubr.msk.f32.mxu1 %vm7775_vm3, %v9718_v53  ;;  %v4368_v17 = vld [vmem:[%s9652_s5 + $0xa0] sm:$0xff] }
 0x2c1   : > { %7469 = vmatprep.subr.bf16.mxu1 %v7773_v2 }
 0x2c2   : > { %7255 = vmatpush3.bf16.msra.mxu0 %v8581_v45 }
 0x2c3   : > { %7256 = vmatprep.subr.bf16.mxu0 %v7773_v2 }
 0x2c4   : > { %7471 = vmatpush3.bf16.msra.mxu1 %v8581_v45  ;;  %v7590_v45 = vpack.c.bf16 %v3677_v57, %v3676_v35  ;;  %v4382_v57 = vld [vmem:[%s9652_s5 + $0x110] sm:$0xff] }
 0x2c5   : > { %7472 = vmatprep.subr.bf16.mxu1 %v7773_v2 }
 0x2c6   : > { %7258 = vmatpush3.bf16.msra.mxu0 %v8598_v41 }
 0x2c7   : > { %7259 = vmatprep.subr.bf16.mxu0 %v7773_v2 }
 0x2c8   : > { %7474 = vmatpush3.bf16.msra.mxu1 %v8598_v41 }
 0x2c9   : > { %7475 = vmatprep.subr.bf16.mxu1 %v7773_v2 }
 0x2ca   : > { %7261 = vmatpush3.bf16.msra.mxu0 %v8610_v19 }
 0x2cb   : > { %7262 = vmatprep.subr.bf16.mxu0 %v7773_v2 }
 0x2cc   : > { %7477 = vmatpush3.bf16.msra.mxu1 %v8610_v19  ;;  %v3678_v19 = vld [vmem:[%s9652_s5 + $0x20] sm:$0xff] }
 0x2cd   : > { %7478 = vmatprep.subr.bf16.mxu1 %v7773_v2 }
 0x2ce   : > { %7264 = vmatpush3.bf16.msra.mxu0 %v8622_v63 }
 0x2cf   : > { %7265 = vmatprep.subr.bf16.mxu0 %v7773_v2 }
 0x2d0   : > { %7480 = vmatpush3.bf16.msra.mxu1 %v8622_v63  ;;  %v3679_v63 = vld [vmem:[%s9652_s5 + $0x28] sm:$0xff] }
 0x2d1   : > { %7481 = vmatprep.subr.bf16.mxu1 %v7773_v2 }
 0x2d2   : > { %7267 = vmatpush3.bf16.msra.mxu0 %v8634_v56 }
 0x2d3   : > { %7268 = vmatprep.subr.bf16.mxu0 %v7773_v2 }
 0x2d4   : > { %7483 = vmatpush3.bf16.msra.mxu1 %v8634_v56  ;;  %v9748_v56 = vld [vmem:[#allocation14_spill] sm:$0xff] }
 0x2d5   : > { %7484 = vmatprep.subr.bf16.mxu1 %v7773_v2 }
 0x2d6   : > { %7270 = vmatpush3.bf16.msra.mxu0 %v9738_v37 }
 0x2d7   : > { %7271 = vmatprep.subr.bf16.mxu0 %v7773_v2 }
 0x2d8   : > { %7486 = vmatpush3.bf16.msra.mxu1 %v9738_v37  ;;  %v4372_v37 = vld [vmem:[%s9652_s5 + $0xc0] sm:$0xff] }
 0x2d9   : > { %7487 = vmatprep.subr.bf16.mxu1 %v7773_v2 }
 0x2da   : > { %7273 = vmatpush3.bf16.msra.mxu0 %v9739_v40 }
 0x2db   : > { %7274 = vmatprep.subr.bf16.mxu0 %v7773_v2 }
 0x2dc   : > { %7489 = vmatpush3.bf16.msra.mxu1 %v9739_v40  ;;  %v4373_v40 = vld [vmem:[%s9652_s5 + $0xc8] sm:$0xff] }
 0x2dd   : > { %6085 = vmatmul.mubr.f32.vlgmr.msra.gmra.mrb[22].mxu0 %v8177_v50  ;;  %7490 = vmatprep.subr.bf16.mxu1 %v7773_v2  ;;  %v9747_v50 = vld [vmem:[#allocation13_spill] sm:$0xff] }
 0x2de   : > { %7276 = vmatpush3.bf16.msra.mxu0 %v9740_v43  ;;  %6119 = vmatprep.mubr.msk.f32.mxu0 %vm7775_vm3, %v9718_v53 }
 0x2df   : > { %6400 = vmatmul.mubr.f32.vlgmr.msra.gmra.mrb[38].mxu1 %v9741_v46  ;;  %7277 = vmatprep.subr.bf16.mxu0 %v7773_v2 }
 0x2e0   : > { %7492 = vmatpush3.bf16.msra.mxu1 %v9740_v43  ;;  %6434 = vmatprep.mubr.msk.f32.mxu1 %vm7775_vm3, %v9718_v53  ;;  %v7596_v43 = vpack.c.bf16 %v3681_v61, %v3680_v29  ;;  %v4403_v61 = vld [vmem:[%s9652_s5 + $0x1b8] sm:$0xff] }
 0x2e1   : > { %7493 = vmatprep.subr.bf16.mxu1 %v7773_v2 }
 0x2e2   : > { %7279 = vmatpush3.bf16.msra.mxu0 %v9742_v49 }
 0x2e3   : > { %7280 = vmatprep.subr.bf16.mxu0 %v7773_v2 }
 0x2e4   : > { %7495 = vmatpush3.bf16.msra.mxu1 %v9742_v49  ;;  %v3682_v49 = vld [vmem:[%s9652_s5 + $0x40] sm:$0xff] }
 0x2e5   : > { %7496 = vmatprep.subr.bf16.mxu1 %v7773_v2 }
 0x2e6   : > { %7282 = vmatpush3.bf16.msra.mxu0 %v9743_v52 }
 0x2e7   : > { %7283 = vmatprep.subr.bf16.mxu0 %v7773_v2 }
 0x2e8   : > { %7498 = vmatpush3.bf16.msra.mxu1 %v9743_v52  ;;  %v3683_v52 = vld [vmem:[%s9652_s5 + $0x48] sm:$0xff] }
 0x2e9   : > { %7499 = vmatprep.subr.bf16.mxu1 %v7773_v2 }
 0x2ea   : > { %7285 = vmatpush3.bf16.msra.mxu0 %v9744_v55 }
 0x2eb   : > { %7286 = vmatprep.subr.bf16.mxu0 %v7773_v2 }
 0x2ec   : > { %7501 = vmatpush3.bf16.msra.mxu1 %v9744_v55  ;;  %v7575_v55 = vpack.c.bf16 %v4373_v40, %v4372_v37  ;;  %v4389_v37 = vld [vmem:[%s9652_s5 + $0x148] sm:$0xff]  ;;  %v4404_v40 = vld [vmem:[%s9652_s5 + $0x1c0] sm:$0xff] }
 0x2ed   : > { %7502 = vmatprep.subr.bf16.mxu1 %v7773_v2 }
 0x2ee   : > { %7288 = vmatpush3.bf16.msra.mxu0 %v9745_v4 }
 0x2ef   : > { %7289 = vmatprep.subr.bf16.mxu0 %v7773_v2 }
 0x2f0   : > { %v1689_v14 = vpop.f32.mrb[20].mxu0  ;;  %7504 = vmatpush3.bf16.msra.mxu1 %v9745_v4 }
 0x2f1   : > { %v5561_v21 = vpop.f32.mrb[21].mxu0  ;;  %7505 = vmatprep.subr.bf16.mxu1 %v7773_v2 }
 0x2f2   : > { %v2338_v22 = vpop.f32.mrb[36].mxu1  ;;  %7291 = vmatpush3.bf16.msra.mxu0 %v9746_v30  ;;  %v4375_v21 = vld [vmem:[%s9652_s5 + $0xd8] sm:$0xff] }
 0x2f3   : > { %v9237_v47 = vmax.f32 %v1689_v14, %v2338_v22  ;;  %v5876_v48 = vpop.f32.mrb[37].mxu1  ;;  %7292 = vmatprep.subr.bf16.mxu0 %v7773_v2  ;;  %v4374_v14 = vld [vmem:[%s9652_s5 + $0xd0] sm:$0xff]  ;;  %v7599_v22 = vpack.c.bf16 %v3683_v52, %v3682_v49 }
 0x2f4   : > { %7507 = vmatpush3.bf16.msra.mxu1 %v9746_v30  ;;  %v3685_v48 = vld [vmem:[%s9652_s5 + $0x58] sm:$0xff]  ;;  %v4390_v52 = vld [vmem:[%s9652_s5 + $0x150] sm:$0xff] }
 0x2f5   : > { %7508 = vmatprep.subr.bf16.mxu1 %v7773_v2  ;;  %v3646_v38 = vsel %vm3645_vm7, %v9237_v47, -inf  ;;  %v3636_v9 = vsel %vm1439_vm5, %v9237_v47, -inf  ;;  %v3684_v47 = vld [vmem:[%s9652_s5 + $0x50] sm:$0xff] }
 0x2f6   : > { %7294 = vmatpush3.bf16.msra.mxu0 %v9747_v50  ;;  %v3647_v20 = vrot.slane %v3646_v38, 4  ;;  %v3637_v41 = vrot.slane %v3636_v9, 4 }
 0x2f7   : > { %7295 = vmatprep.subr.bf16.mxu0 %v7773_v2 }
 0x2f8   : > { %7510 = vmatpush3.bf16.msra.mxu1 %v9747_v50  ;;  %v3648_v11 = vmax.f32 %v3646_v38, %v3647_v20  ;;  %v3638_v12 = vmax.f32 %v3636_v9, %v3637_v41  ;;  %v7578_v50 = vpack.c.bf16 %v4375_v21, %v4374_v14  ;;  %v4397_v38 = vld [vmem:[%s9652_s5 + $0x188] sm:$0xff]  ;;  %v4383_v9 = vld [vmem:[%s9652_s5 + $0x118] sm:$0xff] }
 0x2f9   : > { %7511 = vmatprep.subr.bf16.mxu1 %v7773_v2  ;;  %v4385_v41 = vld [vmem:[%s9652_s5 + $0x128] sm:$0xff]  ;;  %v4407_v21 = vld [vmem:[%s9652_s5 + $0x1d8] sm:$0xff] }
 0x2fa   : > { %7297 = vmatpush3.bf16.msra.mxu0 %v9748_v56 }
 0x2fb   : > { %7298 = vmatprep.subr.bf16.mxu0 %v7773_v2 }
 0x2fc   : > { %7513 = vmatpush3.bf16.msra.mxu1 %v9748_v56 }
 0x2fd   : > { %6120 = vmatmul.mubr.f32.vlgmr.msra.gmra.mrb[22].mxu0 %v2767_v34  ;;  %7514 = vmatprep.subr.bf16.mxu1 %v7773_v2  ;;  %v3649_v34 = vrot.slane %v3648_v11, 2 }
 0x2fe   : > { %7300 = vmatpush3.bf16.msra.mxu0 %v8773_v42  ;;  %6154 = vmatprep.mubr.msk.f32.mxu0 %vm7775_vm3, %v9718_v53 }
 0x2ff   : > { %6435 = vmatmul.mubr.f32.vlgmr.msra.gmra.mrb[38].mxu1 %v3413_v7  ;;  %7301 = vmatprep.subr.bf16.mxu0 %v7773_v2  ;;  %v3650_v4 = vmax.f32 %v3648_v11, %v3649_v34  ;;  %v4377_v7 = vld [vmem:[%s9652_s5 + $0xe8] sm:$0xff]  ;;  %v4388_v34 = vld [vmem:[%s9652_s5 + $0x140] sm:$0xff] }
 0x300   : > { %7516 = vmatpush3.bf16.msra.mxu1 %v8773_v42  ;;  %6469 = vmatprep.mubr.msk.f32.mxu1 %vm7775_vm3, %v9718_v53  ;;  %v7569_v42 = vpack.c.bf16 %v4369_v33, %v4368_v17  ;;  %v4399_v17 = vld [vmem:[%s9652_s5 + $0x198] sm:$0xff]  ;;  %v7614_v33 = vpack.c.bf16 %v4383_v9, %v4382_v57 }
 0x301   : > { %7517 = vmatprep.subr.bf16.mxu1 %v7773_v2  ;;  %v3651_v56 = vrot.slane %v3650_v4, 1 }
 0x302   : > { %7303 = vmatpush3.bf16.msra.mxu0 %v9750_v27 }
 0x303   : > { %7304 = vmatprep.subr.bf16.mxu0 %v7773_v2 }
 0x304   : > { %7519 = vmatpush3.bf16.msra.mxu1 %v9750_v27  ;;  %v7602_v27 = vpack.c.bf16 %v3685_v48, %v3684_v47  ;;  %v4393_v47 = vld [vmem:[%s9652_s5 + $0x168] sm:$0xff]  ;;  %v4408_v48 = vld [vmem:[%s9652_s5 + $0x1e0] sm:$0xff] }
 0x305   : > { %7520 = vmatprep.subr.bf16.mxu1 %v7773_v2 }
 0x306   : > { %7306 = vmatpush3.bf16.msra.mxu0 %v9751_v10 }
 0x307   : > { %7307 = vmatprep.subr.bf16.mxu0 %v7773_v2 }
 0x308   : > { %7522 = vmatpush3.bf16.msra.mxu1 %v9751_v10 }
 0x309   : > { %7523 = vmatprep.subr.bf16.mxu1 %v7773_v2 }
 0x30a   : > { %7309 = vmatpush3.bf16.msra.mxu0 %v9752_v15 }
 0x30b   : > { %7310 = vmatprep.subr.bf16.mxu0 %v7773_v2 }
 0x30c   : > { %7525 = vmatpush3.bf16.msra.mxu1 %v9752_v15  ;;  %v3686_v15 = vld [vmem:[%s9652_s5 + $0x60] sm:$0xff] }
 0x30d   : > { %7526 = vmatprep.subr.bf16.mxu1 %v7773_v2 }
 0x30e   : > { %7312 = vmatpush3.bf16.msra.mxu0 %v9753_v23 }
 0x30f   : > { %7313 = vmatprep.subr.bf16.mxu0 %v7773_v2 }
 0x310   : > { %7528 = vmatpush3.bf16.msra.mxu1 %v9753_v23  ;;  %v3687_v23 = vld [vmem:[%s9652_s5 + $0x68] sm:$0xff] }
 0x311   : > { %7529 = vmatprep.subr.bf16.mxu1 %v7773_v2 }
 0x312   : > { %7315 = vmatpush3.bf16.msra.mxu0 %v9754_v26 }
 0x313   : > { %7316 = vmatprep.subr.bf16.mxu0 %v7773_v2 }
 0x314   : > { %7531 = vmatpush3.bf16.msra.mxu1 %v9754_v26  ;;  %v7581_v26 = vpack.c.bf16 %v4377_v7, %v4376_v62  ;;  %v4394_v7 = vld [vmem:[%s9652_s5 + $0x170] sm:$0xff] }
 0x315   : > { %7532 = vmatprep.subr.bf16.mxu1 %v7773_v2 }
 0x316   : > { %7318 = vmatpush3.bf16.msra.mxu0 %v9755_v31 }
 0x317   : > { %7319 = vmatprep.subr.bf16.mxu0 %v7773_v2 }
 0x318   : > { %7534 = vmatpush3.bf16.msra.mxu1 %v9755_v31  ;;  %v3652_v31 = vmax.f32 %v3650_v4, %v3651_v56  ;;  %v4406_v4 = vld [vmem:[%s9652_s5 + $0x1d0] sm:$0xff]  ;;  %v4409_v56 = vld [vmem:[%s9652_s5 + $0x1e8] sm:$0xff] }
 0x319   : > { %7535 = vmatprep.subr.bf16.mxu1 %v7773_v2  ;;  %v7653_v62 = vpack.c.bf16 %v4409_v56, %v4408_v48 }
 0x31a   : > { %7321 = vmatpush3.bf16.msra.mxu0 %v9756_v36 }
 0x31b   : > { %7322 = vmatprep.subr.bf16.mxu0 %v7773_v2 }
 0x31c   : > { %7537 = vmatpush3.bf16.msra.mxu1 %v9756_v36  ;;  %v4378_v36 = vld [vmem:[%s9652_s5 + $0xf0] sm:$0xff] }
 0x31d   : > { %6155 = vmatmul.mubr.f32.vlgmr.msra.gmra.mrb[22].mxu0 %v8195_v60  ;;  %7538 = vmatprep.subr.bf16.mxu1 %v7773_v2  ;;  %v9758_v60 = vld [vmem:[#allocation23_spill] sm:$0xff] }
 0x31e   : > { %7324 = vmatpush3.bf16.msra.mxu0 %v9757_v51  ;;  %6189 = vmatprep.mubr.msk.f32.mxu0 %vm7775_vm3, %v9718_v53 }
 0x31f   : > { %6470 = vmatmul.mubr.f32.vlgmr.msra.gmra.mrb[38].mxu1 %v3486_v44  ;;  %7325 = vmatprep.subr.bf16.mxu0 %v7773_v2  ;;  %v4379_v44 = vld [vmem:[%s9652_s5 + $0xf8] sm:$0xff] }
 0x320   : > { %7540 = vmatpush3.bf16.msra.mxu1 %v9757_v51  ;;  %6504 = vmatprep.mubr.msk.f32.mxu1 %vm7775_vm3, %v9718_v53  ;;  %v7605_v51 = vpack.c.bf16 %v3687_v23, %v3686_v15  ;;  %v7584_v18 = vpack.c.bf16 %v4379_v44, %v4378_v36  ;;  %v4411_v23 = vld [vmem:[%s9652_s5 + $0x1f8] sm:$0xff] }
 0x321   : > { %7541 = vmatprep.subr.bf16.mxu1 %v7773_v2 }
 0x322   : > { %7327 = vmatpush3.bf16.msra.mxu0 %v9758_v60 }
 0x323   : > { %7328 = vmatprep.subr.bf16.mxu0 %v7773_v2 }
 0x324   : > { %7543 = vmatpush3.bf16.msra.mxu1 %v9758_v60  ;;  %v9441_v60 = vld [vmem:[%s9651_s4] sm:$0x1] }
 0x325   : > { %7544 = vmatprep.subr.bf16.mxu1 %v7773_v2  ;;  %v3653_v25 = vadd.f32 %v3652_v31, %v9441_v60 }
 0x326   : > { %7330 = vmatpush3.bf16.msra.mxu0 %v9759_v59 }
 0x327   : > { %7331 = vmatprep.subr.bf16.mxu0 %v7773_v2  ;;  %v3654_v35 = vmax.f32 %v3653_v25, 0.0 }
 0x328   : > { %7546 = vmatpush3.bf16.msra.mxu1 %v9759_v59 }
 0x329   : > { %7547 = vmatprep.subr.bf16.mxu1 %v7773_v2 }
 0x32a   : > { %7333 = vmatpush3.bf16.msra.mxu0 %v9760_v1 }
 0x32b   : > { %7334 = vmatprep.subr.bf16.mxu0 %v7773_v2 }
 0x32c   : > { %7549 = vmatpush3.bf16.msra.mxu1 %v9760_v1  ;;  %v3688_v1 = vld [vmem:[%s9652_s5 + $0x70] sm:$0xff] }
 0x32d   : > { %7550 = vmatprep.subr.bf16.mxu1 %v7773_v2 }
 0x32e   : > { %7336 = vmatpush3.bf16.msra.mxu0 %v9761_v0 }
 0x32f   : > { %7337 = vmatprep.subr.bf16.mxu0 %v7773_v2 }
 0x330   : > { %7552 = vmatpush3.bf16.msra.mxu1 %v9761_v0  ;;  %v3689_v0 = vld [vmem:[%s9652_s5 + $0x78] sm:$0xff] }
 0x331   : > { %7553 = vmatprep.subr.bf16.mxu1 %v7773_v2 }
 0x332   : > { %7339 = vmatpush3.bf16.msra.mxu0 %v8947_v16 }
 0x333   : > { %7340 = vmatprep.subr.bf16.mxu0 %v7773_v2 }
 0x334   : > { %7555 = vmatpush3.bf16.msra.mxu1 %v8947_v16  ;;  %v7593_v16 = vpack.c.bf16 %v3679_v63, %v3678_v19  ;;  %v4400_v63 = vld [vmem:[%s9652_s5 + $0x1a0] sm:$0xff] }
 0x335   : > { %7556 = vmatprep.subr.bf16.mxu1 %v7773_v2 }
 0x336   : > { %7342 = vmatpush3.bf16.msra.mxu0 %v8959_v6 }
 0x337   : > { %7343 = vmatprep.subr.bf16.mxu0 %v7773_v2 }
 0x338   : > { %7558 = vmatpush3.bf16.msra.mxu1 %v8959_v6  ;;  %v4370_v6 = vld [vmem:[%s9652_s5 + $0xb0] sm:$0xff] }
 0x339   : > { %7559 = vmatprep.subr.bf16.mxu1 %v7773_v2 }
 0x33a   : > { %7345 = vmatpush3.bf16.msra.mxu0 %v8971_v5 }
 0x33b   : > { %7562 = vmatprep.subr.bf16.mxu0 %v7773_v2 }
 0x33c   : > { %7561 = vmatpush3.bf16.msra.mxu1 %v8971_v5  ;;  %v4371_v5 = vld [vmem:[%s9652_s5 + $0xb8] sm:$0xff] }
 0x33d   : > { %6190 = vmatmul.mubr.f32.vlgmr.msra.gmra.mrb[22].mxu0 %v9741_v46  ;;  %7586 = vmatprep.subr.bf16.mxu1 %v7773_v2  ;;  %v7572_v8 = vpack.c.bf16 %v4371_v5, %v4370_v6  ;;  %v3639_v46 = vrot.slane %v3638_v12, 2  ;;  %v4386_v5 = vld [vmem:[%s9652_s5 + $0x130] sm:$0xff] }
 0x33e   : > { %7564 = vmatpush3.bf16.msra.mxu0 %v7563_v3  ;;  %6539 = vmatprep.mubr.msk.f32.mxu0 %vm7775_vm3, %v9718_v53  ;;  %v7608_v3 = vpack.c.bf16 %v3689_v0, %v3688_v1 }
 0x33f   : > { %6505 = vmatmul.mubr.f32.vlgmr.msra.gmra.mrb[38].mxu1 %v9762_v58  ;;  %7565 = vmatprep.subr.bf16.mxu0 %v7773_v2  ;;  %v3640_v30 = vmax.f32 %v3638_v12, %v3639_v46  ;;  %v4398_v58 = vld [vmem:[%s9652_s5 + $0x190] sm:$0xff]  ;;  %v4405_v46 = vld [vmem:[%s9652_s5 + $0x1c8] sm:$0xff] }
 0x340   : > { %7588 = vmatpush3.bf16.msra.mxu1 %v7587_v39  ;;  %6574 = vmatprep.mubr.msk.f32.mxu1 %vm7775_vm3, %v9718_v53  ;;  %v7611_v39 = vpack.c.bf16 %v4381_v54, %v4380_v32  ;;  %v7638_v19 = vpack.c.bf16 %v4399_v17, %v4398_v58  ;;  %v4402_v12 = vld [vmem:[%s9652_s5 + $0x1b0] sm:$0xff]  ;;  %v7647_v49 = vpack.c.bf16 %v4405_v46, %v4404_v40 }
 0x341   : > { %7589 = vmatprep.subr.bf16.mxu1 %v7773_v2  ;;  %v3641_v10 = vrot.slane %v3640_v30, 1  ;;  %v4036_v46 = vld [vmem:[%s9654_s7 + $0x50] sm:$0xff] }
 0x342   : > { %7567 = vmatpush3.bf16.msra.mxu0 %v7566_v28  ;;  %v7635_v28 = vpack.c.bf16 %v4397_v38, %v4396_v24 }
 0x343   : > { %7568 = vmatprep.subr.bf16.mxu0 %v7773_v2  ;;  %v3642_v59 = vmax.f32 %v3640_v30, %v3641_v10  ;;  %v4392_v30 = vld [vmem:[%s9652_s5 + $0x160] sm:$0xff]  ;;  %v4410_v10 = vld [vmem:[%s9652_s5 + $0x1f0] sm:$0xff] }
 0x344   : > { %7591 = vmatpush3.bf16.msra.mxu1 %v7590_v45  ;;  %v4384_v45 = vld [vmem:[%s9652_s5 + $0x120] sm:$0xff] }
 0x345   : > { %7592 = vmatprep.subr.bf16.mxu1 %v7773_v2  ;;  %v3643_v13 = vadd.f32 %v3642_v59, %v9441_v60  ;;  %v7617_v11 = vpack.c.bf16 %v4385_v41, %v4384_v45 }
 0x346   : > { %7570 = vmatpush3.bf16.msra.mxu0 %v7569_v42  ;;  %v4401_v42 = vld [vmem:[%s9652_s5 + $0x1a8] sm:$0xff] }
 0x347   : > { %7571 = vmatprep.subr.bf16.mxu0 %v7773_v2  ;;  %v3644_v20 = vmax.f32 %v3643_v13, 0.0  ;;  %v7641_v6 = vpack.c.bf16 %v4401_v42, %v4400_v63  ;;  %v4029_v63 = vld [vmem:[%s9654_s7 + $0x18] sm:$0xff] }
 0x348   : > { %7594 = vmatpush3.bf16.msra.mxu1 %v7593_v16  ;;  %v4387_v16 = vld [vmem:[%s9652_s5 + $0x138] sm:$0xff] }
 0x349   : > { %7595 = vmatprep.subr.bf16.mxu1 %v7773_v2  ;;  %v7620_v29 = vpack.c.bf16 %v4387_v16, %v4386_v5  ;;  %v4032_v5 = vld [vmem:[%s9654_s7 + $0x30] sm:$0xff] }
 0x34a   : > { %7573 = vmatpush3.bf16.msra.mxu0 %v7572_v8  ;;  %v7644_v8 = vpack.c.bf16 %v4403_v61, %v4402_v12  ;;  %v4035_v61 = vld [vmem:[%s9654_s7 + $0x48] sm:$0xff] }
 0x34b   : > { %7574 = vmatprep.subr.bf16.mxu0 %v7773_v2 }
 0x34c   : > { %7597 = vmatpush3.bf16.msra.mxu1 %v7596_v43  ;;  %v7623_v43 = vpack.c.bf16 %v4389_v37, %v4388_v34 }
 0x34d   : > { %7598 = vmatprep.subr.bf16.mxu1 %v7773_v2 }
 0x34e   : > { %7576 = vmatpush3.bf16.msra.mxu0 %v7575_v55  ;;  %v4391_v55 = vld [vmem:[%s9652_s5 + $0x158] sm:$0xff] }
 0x34f   : > { %7577 = vmatprep.subr.bf16.mxu0 %v7773_v2  ;;  %v7626_v14 = vpack.c.bf16 %v4391_v55, %v4390_v52  ;;  %v4038_v55 = vld [vmem:[%s9654_s7 + $0x60] sm:$0xff] }
 0x350   : > { %7600 = vmatpush3.bf16.msra.mxu1 %v7599_v22  ;;  %v7650_v22 = vpack.c.bf16 %v4407_v21, %v4406_v4  ;;  %v4039_v4 = vld [vmem:[%s9654_s7 + $0x68] sm:$0xff]  ;;  %v4040_v21 = vld [vmem:[%s9654_s7 + $0x70] sm:$0xff] }
 0x351   : > { %7601 = vmatprep.subr.bf16.mxu1 %v7773_v2 }
 0x352   : > { %7579 = vmatpush3.bf16.msra.mxu0 %v7578_v50  ;;  %v7629_v50 = vpack.c.bf16 %v4393_v47, %v4392_v30 }
 0x353   : > { %7580 = vmatprep.subr.bf16.mxu0 %v7773_v2 }
 0x354   : > { %7603 = vmatpush3.bf16.msra.mxu1 %v7602_v27  ;;  %v4395_v27 = vld [vmem:[%s9652_s5 + $0x178] sm:$0xff] }
 0x355   : > { %7604 = vmatprep.subr.bf16.mxu1 %v7773_v2  ;;  %v7632_v15 = vpack.c.bf16 %v4395_v27, %v4394_v7  ;;  %v4023_v7 = vld [vmem:[%s9653_s6] sm:$0x1] }
 0x356   : > { %7582 = vmatpush3.bf16.msra.mxu0 %v7581_v26  ;;  %v7656_v26 = vpack.c.bf16 %v4411_v23, %v4410_v10 }
 0x357   : > { %7583 = vmatprep.subr.bf16.mxu0 %v7773_v2 }
 0x358   : > { %7606 = vmatpush3.bf16.msra.mxu1 %v7605_v51 }
 0x359   : > { %7607 = vmatprep.subr.bf16.mxu1 %v7773_v2 }
 0x35a   : > { %7585 = vmatpush3.bf16.msra.mxu0 %v7584_v18 }
 0x35b   : > { %7610 = vmatprep.subr.bf16.mxu0 %v7773_v2 }
 0x35c   : > { %7609 = vmatpush3.bf16.msra.mxu1 %v7608_v3 }
 0x35d   : > { %6540 = vmatmul.mubr.f32.vlgmr.msra.gmra.mrb[24].mxu0 %v3654_v35  ;;  %7634 = vmatprep.subr.bf16.mxu1 %v7773_v2 }
 0x35e   : > { %7612 = vmatpush3.bf16.msra.mxu0 %v7611_v39  ;;  %6609 = vmatprep.mubr.msk.f32.mxu0 %vm7775_vm3, %v9718_v53 }
 0x35f   : > { %6575 = vmatmul.mubr.f32.vlgmr.msra.gmra.mrb[40].mxu1 %v3644_v20  ;;  %7613 = vmatprep.subr.bf16.mxu0 %v7773_v2  ;;  %v4027_v20 = vld [vmem:[%s9654_s7 + $0x8] sm:$0xff] }
 0x360   : > { %7636 = vmatpush3.bf16.msra.mxu1 %v7635_v28  ;;  %6644 = vmatprep.mubr.msk.f32.mxu1 %vm7775_vm3, %v9718_v53  ;;  %v4026_v28 = vld [vmem:[%s9654_s7] sm:$0xff] }
 0x361   : > { %7637 = vmatprep.subr.bf16.mxu1 %v7773_v2 }
 0x362   : > { %7615 = vmatpush3.bf16.msra.mxu0 %v7614_v33  ;;  %v7659_v33 = vpack.c.bf16 %v4027_v20, %v4026_v28 }
 0x363   : > { %7616 = vmatprep.subr.bf16.mxu0 %v7773_v2 }
 0x364   : > { %7639 = vmatpush3.bf16.msra.mxu1 %v7638_v19  ;;  %v4028_v19 = vld [vmem:[%s9654_s7 + $0x10] sm:$0xff] }
 0x365   : > { %7640 = vmatprep.subr.bf16.mxu1 %v7773_v2  ;;  %v7662_v42 = vpack.c.bf16 %v4029_v63, %v4028_v19 }
 0x366   : > { %7618 = vmatpush3.bf16.msra.mxu0 %v7617_v11  ;;  %v4031_v11 = vld [vmem:[%s9654_s7 + $0x28] sm:$0xff] }
 0x367   : > { %7619 = vmatprep.subr.bf16.mxu0 %v7773_v2 }
 0x368   : > { %7642 = vmatpush3.bf16.msra.mxu1 %v7641_v6 }
 0x369   : > { %7643 = vmatprep.subr.bf16.mxu1 %v7773_v2 }
 0x36a   : > { %7621 = vmatpush3.bf16.msra.mxu0 %v7620_v29  ;;  %v4034_v29 = vld [vmem:[%s9654_s7 + $0x40] sm:$0xff] }
 0x36b   : > { %7622 = vmatprep.subr.bf16.mxu0 %v7773_v2 }
 0x36c   : > { %7645 = vmatpush3.bf16.msra.mxu1 %v7644_v8 }
 0x36d   : > { %7646 = vmatprep.subr.bf16.mxu1 %v7773_v2 }
 0x36e   : > { %7624 = vmatpush3.bf16.msra.mxu0 %v7623_v43  ;;  %v7671_v43 = vpack.c.bf16 %v4035_v61, %v4034_v29 }
 0x36f   : > { %7625 = vmatprep.subr.bf16.mxu0 %v7773_v2 }
 0x370   : > { %7648 = vmatpush3.bf16.msra.mxu1 %v7647_v49  ;;  %v4037_v49 = vld [vmem:[%s9654_s7 + $0x58] sm:$0xff] }
 0x371   : > { %7649 = vmatprep.subr.bf16.mxu1 %v7773_v2  ;;  %v7674_v52 = vpack.c.bf16 %v4037_v49, %v4036_v46 }
 0x372   : > { %7627 = vmatpush3.bf16.msra.mxu0 %v7626_v14  ;;  %v7677_v14 = vpack.c.bf16 %v4039_v4, %v4038_v55 }
 0x373   : > { %7628 = vmatprep.subr.bf16.mxu0 %v7773_v2 }
 0x374   : > { %7651 = vmatpush3.bf16.msra.mxu1 %v7650_v22  ;;  %v4041_v22 = vld [vmem:[%s9654_s7 + $0x78] sm:$0xff] }
 0x375   : > { %7652 = vmatprep.subr.bf16.mxu1 %v7773_v2  ;;  %v7680_v30 = vpack.c.bf16 %v4041_v22, %v4040_v21 }
 0x376   : > { %7630 = vmatpush3.bf16.msra.mxu0 %v7629_v50 }
 0x377   : > { %7631 = vmatprep.subr.bf16.mxu0 %v7773_v2 }
 0x378   : > { %7654 = vmatpush3.bf16.msra.mxu1 %v7653_v62 }
 0x379   : > { %7655 = vmatprep.subr.bf16.mxu1 %v7773_v2 }
 0x37a   : > { %7633 = vmatpush3.bf16.msra.mxu0 %v7632_v15  ;;  %v4113_v15 = vlaneseq }
 0x37b   : > { %7658 = vmatprep.subr.bf16.mxu0 %v7773_v2 }
 0x37c   : > { %7657 = vmatpush3.bf16.msra.mxu1 %v7656_v26  ;;  %v4114_v23 = vand.u32 127, %v4113_v15  ;;  %v4042_v26 = vld [vmem:[%s9655_s8] sm:$0x1] }
 0x37e   : > { %vm4115_vm8 = vcmp.lt.s32.totalorder %v4114_v23, 10 }
 0x410   : > { %v2984_v31 = vpop.f32.mrb[22].mxu0 }
 0x411   : > { %v6191_v36 = vpop.f32.mrb[23].mxu0 }
 0x412   : > { %v3629_v44 = vpop.f32.mrb[38].mxu1 }
 0x413   : > { %v3655_v51 = vmax.f32 %v2984_v31, %v3629_v44  ;;  %v6506_v59 = vpop.f32.mrb[39].mxu1 }
 0x415   : > { %v3656_v1 = vsel %vm1439_vm5, %v3655_v51, -inf  ;;  %v3665_v0 = vsel %vm3645_vm7, %v3655_v51, -inf }
 0x416   : > { %v3657_v18 = vrot.slane %v3656_v1, 4  ;;  %v3666_v25 = vrot.slane %v3665_v0, 4 }
 0x418   : > { %v3658_v32 = vmax.f32 %v3656_v1, %v3657_v18  ;;  %v3667_v54 = vmax.f32 %v3665_v0, %v3666_v25 }
 0x41a   : > { %v3659_v3 = vrot.slane %v3658_v32, 2  ;;  %v3668_v13 = vrot.slane %v3667_v54, 2 }
 0x41c   : > { %v3660_v24 = vmax.f32 %v3658_v32, %v3659_v3  ;;  %v3669_v38 = vmax.f32 %v3667_v54, %v3668_v13 }
 0x41e   : > { %v3661_v39 = vrot.slane %v3660_v24, 1  ;;  %v3670_v35 = vrot.slane %v3669_v38, 1 }
 0x420   : > { %v3662_v57 = vmax.f32 %v3660_v24, %v3661_v39  ;;  %v3671_v9 = vmax.f32 %v3669_v38, %v3670_v35 }
 0x422   : > { %v3663_v58 = vadd.f32 %v3662_v57, %v9441_v60  ;;  %v3672_v17 = vadd.f32 %v3671_v9, %v9441_v60  ;;  %v4030_v60 = vld [vmem:[%s9654_s7 + $0x20] sm:$0xff] }
 0x423   : > { %v7665_v6 = vpack.c.bf16 %v4031_v11, %v4030_v60 }
 0x424   : > { %v3664_v45 = vmax.f32 %v3663_v58, 0.0  ;;  %v3673_v41 = vmax.f32 %v3672_v17, 0.0 }
 0x426   : > { %6610 = vmatmul.mubr.f32.vlgmr.msra.gmra.mrb[26].mxu0 %v3664_v45  ;;  %6645 = vmatmul.mubr.f32.vlgmr.msra.gmra.mrb[42].mxu1 %v3673_v41 }
 0x427   : > { %7660 = vmatpush3.bf16.msra.mxu0 %v7659_v33  ;;  %6679 = vmatprep.mubr.msk.f32.mxu0 %vm7775_vm3, %v9718_v53  ;;  %v4033_v53 = vld [vmem:[%s9654_s7 + $0x38] sm:$0xff] }
 0x428   : > { %7661 = vmatprep.subr.bf16.mxu0 %v7773_v2  ;;  %v7668_v16 = vpack.c.bf16 %v4033_v53, %v4032_v5 }
 0x42b   : > { %7663 = vmatpush3.bf16.msra.mxu0 %v7662_v42 }
 0x42c   : > { %7664 = vmatprep.subr.bf16.mxu0 %v7773_v2 }
 0x42f   : > { %7666 = vmatpush3.bf16.msra.mxu0 %v7665_v6 }
 0x430   : > { %v3773_v12 = vpop.f32.mrb[24].mxu0  ;;  %7667 = vmatprep.subr.bf16.mxu0 %v7773_v2 }
 0x431   : > { %v6541_v8 = vpop.f32.mrb[25].mxu0 }
 0x432   : > { %v3843_v34 = vpop.f32.mrb[40].mxu1 }
 0x433   : > { %v3844_v37 = vadd.f32 %v3843_v34, %v3773_v12  ;;  %v6576_v40 = vpop.f32.mrb[41].mxu1  ;;  %7669 = vmatpush3.bf16.msra.mxu0 %v7668_v16 }
 0x434   : > { %7670 = vmatprep.subr.bf16.mxu0 %v7773_v2 }
 0x437   : > { %7672 = vmatpush3.bf16.msra.mxu0 %v7671_v43 }
 0x438   : > { %7673 = vmatprep.subr.bf16.mxu0 %v7773_v2 }
 0x43b   : > { %7675 = vmatpush3.bf16.msra.mxu0 %v7674_v52 }
 0x43c   : > { %7676 = vmatprep.subr.bf16.mxu0 %v7773_v2 }
 0x43f   : > { %7678 = vmatpush3.bf16.msra.mxu0 %v7677_v14 }
 0x440   : > { %7679 = vmatprep.subr.bf16.mxu0 %v7773_v2 }
 0x443   : > { %7681 = vmatpush3.bf16.msra.mxu0 %v7680_v30 }
 0x4f9   : > { %v3930_v47 = vpop.f32.mrb[26].mxu0  ;;  %v4018_v48 = vpop.f32.mrb[42].mxu1 }
 0x4fa   : > { %v3934_v50 = vadd.f32 %v3930_v47, %v3844_v37  ;;  %v6611_v56 = vpop.f32.mrb[27].mxu0  ;;  %v6646_v62 = vpop.f32.mrb[43].mxu1 }
 0x4fc   : > { %v4022_v2 = vadd.f32 %v4018_v48, %v3934_v50 }
 0x4fe   : > { %v4024_v27 = vadd.f32 %v4023_v7, %v4022_v2 }
 0x500   : > { %v4025_v10 = vmax.f32 %v4024_v27, 0.0 }
 0x502   : > { %6680 = vmatmul.mubr.f32.vlgmr.msra.gmra.mrb[28].mxu0 %v4025_v10 }
 0x5d5   : > { %v4109_v31 = vpop.f32.mrb[28].mxu0 }
 0x5d6   : > { %v4110_v36 = vadd.f32 %v4109_v31, %v4042_v26  ;;  %v6681_v44 = vpop.f32.mrb[29].mxu0 }
 0x5d8   : > { %v4116_v51 = vsel %vm4115_vm8, %v4110_v36, -1e+30 }
 0x5d9   : > { %v4117_v59 = vsel %vm360_vm0, %v4116_v51, -inf }
 0x5da   : > { %4118 = vmax.xlane.f32.xlu0 %v4117_v59 }
 0x667   : > { %v4119_v1 = vpop.xlane.xlu0 %4118 }
 0x668   : > { %v4120_v0 = vsub.f32 %v4116_v51, %v4119_v1 }
 0x66a   : > { %v4121_v18 = vmul.f32 1.442695, %v4120_v0 }
 0x66c   : > { %7761 = vpow2.f32 %v4121_v18 }
 0x676   : > { %v7762_v25 = vpop.eup %7761 }
 0x677   : > { %v4123_v32 = vsel %vm360_vm0, %v7762_v25, 0.0 }
 0x678   : > { %4124 = vadd.xlane.f32.xlu0 %v4123_v32 }
 0x705   : > { %v4125_v54 = vpop.xlane.xlu0 %4124 }
 0x706   : > { %7763 = vrcp.f32 %v4125_v54 }
 0x710   : > { %v7764_v3 = vpop.eup %7763 }
 0x711   : > { %v4127_v13 = vmul.f32 %v7764_v3, %v7762_v25 }
 0x713   : > { %4128 = vst [vmem:[%s328_s22] sm:$0x1] %v4127_v13 }
 0x714 PF: > { %s19_s30 = sadd.s32 1, %s7771_s30  }
 0x715   : > { %p16_p4 = scmp.ge.s32.totalorder %s19_s30, 4  }
 0x717   :  { %18 = sbr.rel (!%p16_p4) target bundleno = 1 (0x1), region = 100 }

</bundles_post_ra>
